<compile_context>
chip_gen: v6e
topology: v6e:2x2x1
jax: 0.10.0
libtpu: 0.0.40
codegen_flags: <defaults>
</compile_context>

<pallas_src>
import functools

import jax
import jax.numpy as jnp
from jax.experimental import pallas as pl
from jax.experimental.pallas import tpu as pltpu


# ----------------------------------------------------------------------------
# Pallas kernel: fused OmniShift (5x5 depthwise conv) + channel-mix, per row-tile
# ----------------------------------------------------------------------------
def _channel_mix_kernel(xpad_ref, w5_ref, wkr_ref, wv_ref, o_ref, *, TR, W, hidden):
    """One (batch, row-tile) = TR image rows per grid step.

    xpad_ref : (1, H+4, W+4, C)  zero-padded NHWC input (full image, resident per batch)
    w5_ref   : (25, W, C)        reparam 5x5 depthwise weights, pre-broadcast over W (f32)
    wkr_ref  : (C, hidden + C)   packed [Wk | Wr]  (bf16)
    wv_ref   : (hidden, C)       Wv               (bf16)
    o_ref    : (1, TR*W, C)      output tile
    """
    C = o_ref.shape[-1]
    # first padded-image row of this tile (output row r uses padded rows r .. r+4)
    r0 = pl.multiple_of(pl.program_id(1) * TR, TR)

    # --- OmniShift: 5x5 depthwise conv, "same" zero padding ------------------
    acc = jnp.zeros((TR, W, C), jnp.float32)
    for tap in range(25):
        dy, dx = divmod(tap, 5)
        # shifted window read directly from the ref (dynamic row start, static col start)
        win = xpad_ref[0, pl.ds(r0 + dy, TR), pl.ds(dx, W), :]
        acc = acc + win * w5_ref[tap]            # w5_ref[tap] is already (W, C)

    xs = acc.reshape(TR * W, C)
    xs_b = xs.astype(jnp.bfloat16)

    # --- channel mix ----------------------------------------------------------
    # one MXU pass over xs for both the key and receptance projections
    kr = jnp.dot(xs_b, wkr_ref[...], preferred_element_type=jnp.float32)
    k = jnp.square(jnp.maximum(kr[:, :hidden], 0.0))        # relu(k)^2
    r = jax.nn.sigmoid(kr[:, hidden:])
    kv = jnp.dot(k.astype(jnp.bfloat16), wv_ref[...],
                 preferred_element_type=jnp.float32)

    o_ref[0] = (r * kv).astype(o_ref.dtype)


# ----------------------------------------------------------------------------
# Wrapper
# ----------------------------------------------------------------------------
def vrwkv_channel_mix(x, params, resolution, row_tile=8):
    """x: (B, N, C) float32, resolution = (H, W) with H*W == N."""
    H, W = resolution
    B, N, C = x.shape
    assert N == H * W
    hidden = params["wv"].shape[0]

    # Row-tile size: TR image rows -> TN = TR*W tokens per grid step.
    TR = row_tile
    if H % TR != 0 or (TR * W) % 8 != 0:
        TR = H                       # fallback: whole image per grid step
    TN = TR * W
    n_tiles = H // TR

    # ---- weight packing / casting (glue) ------------------------------------
    # pre-broadcast the 25 per-tap depthwise weights over the W (sublane) axis
    w5b = jnp.broadcast_to(params["w5"].reshape(25, 1, C), (25, W, C)).astype(jnp.float32)
    # pack key + receptance weights into one matrix -> single MXU pass over xs
    wkr = jnp.concatenate([params["wk"], params["wr"]], axis=1).astype(jnp.bfloat16)
    wv = params["wv"].astype(jnp.bfloat16)

    # ---- spatial view + 2-pixel zero halo ------------------------------------
    # TODO(synk): move the 2-px halo handling in-kernel (manual DMA / element-indexed
    # blocks) to remove this extra HBM copy of the activations.
    x_pad = jnp.pad(x.reshape(B, H, W, C), ((0, 0), (2, 2), (2, 2), (0, 0)))

    # ---- VMEM budget (blocks are double-buffered by the pipeline) -----------
    in_block_bytes = ((H + 4) * (W + 4) * C * 4      # padded image block (f32)
                      + 25 * W * C * 4               # conv weights (f32)
                      + C * (hidden + C) * 2         # [Wk|Wr] (bf16)
                      + hidden * C * 2)              # Wv (bf16)
    out_block_bytes = TN * C * 4
    scratch_bytes = (TN * C * 4                      # conv accumulator
                     + TN * (hidden + C) * 4         # kr
                     + TN * hidden * 4               # k
                     + 2 * TN * C * 4)               # kv, r*kv
    need = 2 * (in_block_bytes + out_block_bytes) + scratch_bytes + (4 << 20)
    vmem_limit = int(min(64 << 20, max(32 << 20, need)))

    # ---- cost estimate (helps XLA schedule the surrounding glue) ------------
    cost = pl.CostEstimate(
        flops=int(2 * B * N * C * 25                 # depthwise conv
                  + 2 * B * N * C * (hidden + C)     # xs @ [Wk|Wr]
                  + 2 * B * N * hidden * C),         # k @ Wv
        transcendentals=int(B * N * C),              # sigmoid
        bytes_accessed=int(x_pad.size * 4 + B * N * C * 4
                           + w5b.size * 4 + wkr.size * 2 + wv.size * 2),
    )

    kernel = functools.partial(_channel_mix_kernel, TR=TR, W=W, hidden=hidden)

    return pl.pallas_call(
        kernel,
        out_shape=jax.ShapeDtypeStruct((B, N, C), x.dtype),
        grid_spec=pltpu.PrefetchScalarGridSpec(
            num_scalar_prefetch=0,
            grid=(B, n_tiles),
            in_specs=[
                # full padded image per batch; index_map constant in t -> resident
                pl.BlockSpec((1, H + 4, W + 4, C), lambda b, t: (b, 0, 0, 0)),
                pl.BlockSpec((25, W, C), lambda b, t: (0, 0, 0)),
                pl.BlockSpec((C, hidden + C), lambda b, t: (0, 0)),
                pl.BlockSpec((hidden, C), lambda b, t: (0, 0)),
            ],
            out_specs=pl.BlockSpec((1, TN, C), lambda b, t: (b, t, 0)),
        ),
        compiler_params=pltpu.CompilerParams(
            dimension_semantics=("parallel", "parallel"),
            vmem_limit_bytes=vmem_limit,
        ),
        cost_estimate=cost,
    )(x_pad, w5b, wkr, wv)


# ----------------------------------------------------------------------------
# Deterministic parameter init (shapes match VRWKV_ChannelMix.__init__)
# ----------------------------------------------------------------------------
def init_params(key, n_embd, hidden_rate=4):
    hidden = int(hidden_rate * n_embd)
    ks = jax.random.split(key, 7)

    # OmniShift raw parameters (PyTorch shapes: depthwise (dim,1,kh,kw), alpha (4,))
    w1 = jax.random.normal(ks[0], (n_embd, 1, 1, 1), jnp.float32) * 0.1
    w3 = jax.random.normal(ks[1], (n_embd, 1, 3, 3), jnp.float32) * 0.1
    w5 = jax.random.normal(ks[2], (n_embd, 1, 5, 5), jnp.float32) * 0.1
    alpha = jax.random.normal(ks[3], (4,), jnp.float32)

    # reparam_5x5: combine into a single 5x5 depthwise weight (matches forward_train)
    ident = jnp.pad(jnp.ones_like(w1), ((0, 0), (0, 0), (2, 2), (2, 2)))
    w1p = jnp.pad(w1, ((0, 0), (0, 0), (2, 2), (2, 2)))
    w3p = jnp.pad(w3, ((0, 0), (0, 0), (1, 1), (1, 1)))
    combined = alpha[0] * ident + alpha[1] * w1p + alpha[2] * w3p + alpha[3] * w5
    # (dim, 1, 5, 5) -> (5, 5, dim) for the NHWC kernel
    w5_k = jnp.transpose(combined[:, 0, :, :], (1, 2, 0))

    # Linear weights stored as (in, out) so the kernel computes x @ W
    wk = jax.random.normal(ks[4], (n_embd, hidden), jnp.float32) * (1.0 / n_embd ** 0.5)
    wr = jax.random.normal(ks[5], (n_embd, n_embd), jnp.float32) * (1.0 / n_embd ** 0.5)
    wv = jax.random.normal(ks[6], (hidden, n_embd), jnp.float32) * (1.0 / hidden ** 0.5)

    return {"w5": w5_k, "wk": wk, "wr": wr, "wv": wv}


# ----------------------------------------------------------------------------
# Pure-JAX f32 reference (correctness oracle)
# ----------------------------------------------------------------------------
def ref_forward(x, params, resolution):
    H, W = resolution
    B, N, C = x.shape
    xi = x.reshape(B, H, W, C)
    xpad = jnp.pad(xi, ((0, 0), (2, 2), (2, 2), (0, 0)))
    out = jnp.zeros_like(xi)
    for tap in range(25):
        dy, dx = divmod(tap, 5)
        out = out + xpad[:, dy:dy + H, dx:dx + W, :] * params["w5"].reshape(25, C)[tap]
    xs = out.reshape(B, N, C)
    k = jnp.square(jnp.maximum(xs @ params["wk"], 0.0))
    kv = k @ params["wv"]
    r = jax.nn.sigmoid(xs @ params["wr"])
    return r * kv


if __name__ == "__main__":
    B, H, W = 2, 16, 16          # small spatial size
    n_embd = 128                 # lane-dense channel count (C is the lane dim)
    hidden_rate = 4
    N = H * W

    key = jax.random.PRNGKey(0)
    kx, kp = jax.random.split(key)
    x = jax.random.normal(kx, (B, N, n_embd), jnp.float32)
    params = init_params(kp, n_embd, hidden_rate)

    out = vrwkv_channel_mix(x, params, (H, W))
    out = jax.block_until_ready(out)

    ref = ref_forward(x, params, (H, W))
    assert out.shape == (B, N, n_embd)
    # kernel uses bf16 MXU operands with f32 accumulation -> ~1% deviation vs f32 oracle
    max_err = float(jnp.max(jnp.abs(out - ref)))
    assert jnp.allclose(out, ref, atol=7.5e-2, rtol=5e-2), f"mismatch vs reference: {max_err}"

    print("KERNEL_OK")
</pallas_src>

<mosaic_0001>
module attributes {stable_mosaic.version = 11 : i64} {
  func.func @_channel_mix_kernel(%arg0: i32, %arg1: i32, %arg2: memref<1x20x20x128xf32, #tpu.memory_space<vmem>>, %arg3: memref<25x16x128xf32, #tpu.memory_space<vmem>>, %arg4: memref<128x640xbf16, #tpu.memory_space<vmem>>, %arg5: memref<512x128xbf16, #tpu.memory_space<vmem>>, %arg6: memref<1x128x128xf32, #tpu.memory_space<vmem>>) attributes {dimension_semantics = [#tpu.dimension_semantics<parallel>, #tpu.dimension_semantics<parallel>], iteration_bounds = array<i64: 2, 2>, scalar_prefetch = 0 : i64, scratch_operands = 0 : i64, tpu.core_type = #tpu.core_type<tc>, window_params = [{transform_indices = @transform_0, window_bounds = array<i64: 1, 20, 20, 128>}, {pipeline_mode = #tpu.pipeline_mode<synchronous>, transform_indices = @transform_1, window_bounds = array<i64: 25, 16, 128>}, {pipeline_mode = #tpu.pipeline_mode<synchronous>, transform_indices = @transform_2, window_bounds = array<i64: 128, 640>}, {pipeline_mode = #tpu.pipeline_mode<synchronous>, transform_indices = @transform_3, window_bounds = array<i64: 512, 128>}, {transform_indices = @transform_4, window_bounds = array<i64: 1, 128, 128>}]} {
    %c8_i32 = arith.constant 8 : i32
    %0 = arith.muli %arg1, %c8_i32 : i32
    %1 = tpu.assume_multiple %0, 8 : i32
    %cst = arith.constant 0.000000e+00 : f32
    %2 = vector.broadcast %cst : f32 to vector<8x16x128xf32>
    %c0_i32 = arith.constant 0 : i32
    %3 = arith.addi %1, %c0_i32 : i32
    %c0 = arith.constant 0 : index
    %4 = arith.index_cast %3 : i32 to index
    %c0_0 = arith.constant 0 : index
    %c0_1 = arith.constant 0 : index
    %5 = vector.load %arg2[%c0, %4, %c0_0, %c0_1] : memref<1x20x20x128xf32, #tpu.memory_space<vmem>>, vector<1x8x16x128xf32>
    %6 = vector.shape_cast %5 : vector<1x8x16x128xf32> to vector<8x16x128xf32>
    %c0_2 = arith.constant 0 : index
    %c0_3 = arith.constant 0 : index
    %c0_4 = arith.constant 0 : index
    %7 = vector.load %arg3[%c0_2, %c0_3, %c0_4] : memref<25x16x128xf32, #tpu.memory_space<vmem>>, vector<1x16x128xf32>
    %8 = vector.shape_cast %7 : vector<1x16x128xf32> to vector<16x128xf32>
    %9 = vector.shape_cast %8 : vector<16x128xf32> to vector<1x16x128xf32>
    %10 = vector.broadcast %9 : vector<1x16x128xf32> to vector<8x16x128xf32>
    %11 = arith.mulf %6, %10 : vector<8x16x128xf32>
    %12 = arith.addf %2, %11 : vector<8x16x128xf32>
    %c0_i32_5 = arith.constant 0 : i32
    %13 = arith.addi %1, %c0_i32_5 : i32
    %c0_6 = arith.constant 0 : index
    %14 = arith.index_cast %13 : i32 to index
    %c1 = arith.constant 1 : index
    %c0_7 = arith.constant 0 : index
    %15 = vector.load %arg2[%c0_6, %14, %c1, %c0_7] : memref<1x20x20x128xf32, #tpu.memory_space<vmem>>, vector<1x8x16x128xf32>
    %16 = vector.shape_cast %15 : vector<1x8x16x128xf32> to vector<8x16x128xf32>
    %c1_8 = arith.constant 1 : index
    %c0_9 = arith.constant 0 : index
    %c0_10 = arith.constant 0 : index
    %17 = vector.load %arg3[%c1_8, %c0_9, %c0_10] : memref<25x16x128xf32, #tpu.memory_space<vmem>>, vector<1x16x128xf32>
    %18 = vector.shape_cast %17 : vector<1x16x128xf32> to vector<16x128xf32>
    %19 = vector.shape_cast %18 : vector<16x128xf32> to vector<1x16x128xf32>
    %20 = vector.broadcast %19 : vector<1x16x128xf32> to vector<8x16x128xf32>
    %21 = arith.mulf %16, %20 : vector<8x16x128xf32>
    %22 = arith.addf %12, %21 : vector<8x16x128xf32>
    %c0_i32_11 = arith.constant 0 : i32
    %23 = arith.addi %1, %c0_i32_11 : i32
    %c0_12 = arith.constant 0 : index
    %24 = arith.index_cast %23 : i32 to index
    %c2 = arith.constant 2 : index
    %c0_13 = arith.constant 0 : index
    %25 = vector.load %arg2[%c0_12, %24, %c2, %c0_13] : memref<1x20x20x128xf32, #tpu.memory_space<vmem>>, vector<1x8x16x128xf32>
    %26 = vector.shape_cast %25 : vector<1x8x16x128xf32> to vector<8x16x128xf32>
    %c2_14 = arith.constant 2 : index
    %c0_15 = arith.constant 0 : index
    %c0_16 = arith.constant 0 : index
    %27 = vector.load %arg3[%c2_14, %c0_15, %c0_16] : memref<25x16x128xf32, #tpu.memory_space<vmem>>, vector<1x16x128xf32>
    %28 = vector.shape_cast %27 : vector<1x16x128xf32> to vector<16x128xf32>
    %29 = vector.shape_cast %28 : vector<16x128xf32> to vector<1x16x128xf32>
    %30 = vector.broadcast %29 : vector<1x16x128xf32> to vector<8x16x128xf32>
    %31 = arith.mulf %26, %30 : vector<8x16x128xf32>
    %32 = arith.addf %22, %31 : vector<8x16x128xf32>
    %c0_i32_17 = arith.constant 0 : i32
    %33 = arith.addi %1, %c0_i32_17 : i32
    %c0_18 = arith.constant 0 : index
    %34 = arith.index_cast %33 : i32 to index
    %c3 = arith.constant 3 : index
    %c0_19 = arith.constant 0 : index
    %35 = vector.load %arg2[%c0_18, %34, %c3, %c0_19] : memref<1x20x20x128xf32, #tpu.memory_space<vmem>>, vector<1x8x16x128xf32>
    %36 = vector.shape_cast %35 : vector<1x8x16x128xf32> to vector<8x16x128xf32>
    %c3_20 = arith.constant 3 : index
    %c0_21 = arith.constant 0 : index
    %c0_22 = arith.constant 0 : index
    %37 = vector.load %arg3[%c3_20, %c0_21, %c0_22] : memref<25x16x128xf32, #tpu.memory_space<vmem>>, vector<1x16x128xf32>
    %38 = vector.shape_cast %37 : vector<1x16x128xf32> to vector<16x128xf32>
    %39 = vector.shape_cast %38 : vector<16x128xf32> to vector<1x16x128xf32>
    %40 = vector.broadcast %39 : vector<1x16x128xf32> to vector<8x16x128xf32>
    %41 = arith.mulf %36, %40 : vector<8x16x128xf32>
    %42 = arith.addf %32, %41 : vector<8x16x128xf32>
    %c0_i32_23 = arith.constant 0 : i32
    %43 = arith.addi %1, %c0_i32_23 : i32
    %c0_24 = arith.constant 0 : index
    %44 = arith.index_cast %43 : i32 to index
    %c4 = arith.constant 4 : index
    %c0_25 = arith.constant 0 : index
    %45 = vector.load %arg2[%c0_24, %44, %c4, %c0_25] : memref<1x20x20x128xf32, #tpu.memory_space<vmem>>, vector<1x8x16x128xf32>
    %46 = vector.shape_cast %45 : vector<1x8x16x128xf32> to vector<8x16x128xf32>
    %c4_26 = arith.constant 4 : index
    %c0_27 = arith.constant 0 : index
    %c0_28 = arith.constant 0 : index
    %47 = vector.load %arg3[%c4_26, %c0_27, %c0_28] : memref<25x16x128xf32, #tpu.memory_space<vmem>>, vector<1x16x128xf32>
    %48 = vector.shape_cast %47 : vector<1x16x128xf32> to vector<16x128xf32>
    %49 = vector.shape_cast %48 : vector<16x128xf32> to vector<1x16x128xf32>
    %50 = vector.broadcast %49 : vector<1x16x128xf32> to vector<8x16x128xf32>
    %51 = arith.mulf %46, %50 : vector<8x16x128xf32>
    %52 = arith.addf %42, %51 : vector<8x16x128xf32>
    %c1_i32 = arith.constant 1 : i32
    %53 = arith.addi %1, %c1_i32 : i32
    %c0_29 = arith.constant 0 : index
    %54 = arith.index_cast %53 : i32 to index
    %c0_30 = arith.constant 0 : index
    %c0_31 = arith.constant 0 : index
    %55 = vector.load %arg2[%c0_29, %54, %c0_30, %c0_31] : memref<1x20x20x128xf32, #tpu.memory_space<vmem>>, vector<1x8x16x128xf32>
    %56 = vector.shape_cast %55 : vector<1x8x16x128xf32> to vector<8x16x128xf32>
    %c5 = arith.constant 5 : index
    %c0_32 = arith.constant 0 : index
    %c0_33 = arith.constant 0 : index
    %57 = vector.load %arg3[%c5, %c0_32, %c0_33] : memref<25x16x128xf32, #tpu.memory_space<vmem>>, vector<1x16x128xf32>
    %58 = vector.shape_cast %57 : vector<1x16x128xf32> to vector<16x128xf32>
    %59 = vector.shape_cast %58 : vector<16x128xf32> to vector<1x16x128xf32>
    %60 = vector.broadcast %59 : vector<1x16x128xf32> to vector<8x16x128xf32>
    %61 = arith.mulf %56, %60 : vector<8x16x128xf32>
    %62 = arith.addf %52, %61 : vector<8x16x128xf32>
    %c1_i32_34 = arith.constant 1 : i32
    %63 = arith.addi %1, %c1_i32_34 : i32
    %c0_35 = arith.constant 0 : index
    %64 = arith.index_cast %63 : i32 to index
    %c1_36 = arith.constant 1 : index
    %c0_37 = arith.constant 0 : index
    %65 = vector.load %arg2[%c0_35, %64, %c1_36, %c0_37] : memref<1x20x20x128xf32, #tpu.memory_space<vmem>>, vector<1x8x16x128xf32>
    %66 = vector.shape_cast %65 : vector<1x8x16x128xf32> to vector<8x16x128xf32>
    %c6 = arith.constant 6 : index
    %c0_38 = arith.constant 0 : index
    %c0_39 = arith.constant 0 : index
    %67 = vector.load %arg3[%c6, %c0_38, %c0_39] : memref<25x16x128xf32, #tpu.memory_space<vmem>>, vector<1x16x128xf32>
    %68 = vector.shape_cast %67 : vector<1x16x128xf32> to vector<16x128xf32>
    %69 = vector.shape_cast %68 : vector<16x128xf32> to vector<1x16x128xf32>
    %70 = vector.broadcast %69 : vector<1x16x128xf32> to vector<8x16x128xf32>
    %71 = arith.mulf %66, %70 : vector<8x16x128xf32>
    %72 = arith.addf %62, %71 : vector<8x16x128xf32>
    %c1_i32_40 = arith.constant 1 : i32
    %73 = arith.addi %1, %c1_i32_40 : i32
    %c0_41 = arith.constant 0 : index
    %74 = arith.index_cast %73 : i32 to index
    %c2_42 = arith.constant 2 : index
    %c0_43 = arith.constant 0 : index
    %75 = vector.load %arg2[%c0_41, %74, %c2_42, %c0_43] : memref<1x20x20x128xf32, #tpu.memory_space<vmem>>, vector<1x8x16x128xf32>
    %76 = vector.shape_cast %75 : vector<1x8x16x128xf32> to vector<8x16x128xf32>
    %c7 = arith.constant 7 : index
    %c0_44 = arith.constant 0 : index
    %c0_45 = arith.constant 0 : index
    %77 = vector.load %arg3[%c7, %c0_44, %c0_45] : memref<25x16x128xf32, #tpu.memory_space<vmem>>, vector<1x16x128xf32>
    %78 = vector.shape_cast %77 : vector<1x16x128xf32> to vector<16x128xf32>
    %79 = vector.shape_cast %78 : vector<16x128xf32> to vector<1x16x128xf32>
    %80 = vector.broadcast %79 : vector<1x16x128xf32> to vector<8x16x128xf32>
    %81 = arith.mulf %76, %80 : vector<8x16x128xf32>
    %82 = arith.addf %72, %81 : vector<8x16x128xf32>
    %c1_i32_46 = arith.constant 1 : i32
    %83 = arith.addi %1, %c1_i32_46 : i32
    %c0_47 = arith.constant 0 : index
    %84 = arith.index_cast %83 : i32 to index
    %c3_48 = arith.constant 3 : index
    %c0_49 = arith.constant 0 : index
    %85 = vector.load %arg2[%c0_47, %84, %c3_48, %c0_49] : memref<1x20x20x128xf32, #tpu.memory_space<vmem>>, vector<1x8x16x128xf32>
    %86 = vector.shape_cast %85 : vector<1x8x16x128xf32> to vector<8x16x128xf32>
    %c8 = arith.constant 8 : index
    %c0_50 = arith.constant 0 : index
    %c0_51 = arith.constant 0 : index
    %87 = vector.load %arg3[%c8, %c0_50, %c0_51] : memref<25x16x128xf32, #tpu.memory_space<vmem>>, vector<1x16x128xf32>
    %88 = vector.shape_cast %87 : vector<1x16x128xf32> to vector<16x128xf32>
    %89 = vector.shape_cast %88 : vector<16x128xf32> to vector<1x16x128xf32>
    %90 = vector.broadcast %89 : vector<1x16x128xf32> to vector<8x16x128xf32>
    %91 = arith.mulf %86, %90 : vector<8x16x128xf32>
    %92 = arith.addf %82, %91 : vector<8x16x128xf32>
    %c1_i32_52 = arith.constant 1 : i32
    %93 = arith.addi %1, %c1_i32_52 : i32
    %c0_53 = arith.constant 0 : index
    %94 = arith.index_cast %93 : i32 to index
    %c4_54 = arith.constant 4 : index
    %c0_55 = arith.constant 0 : index
    %95 = vector.load %arg2[%c0_53, %94, %c4_54, %c0_55] : memref<1x20x20x128xf32, #tpu.memory_space<vmem>>, vector<1x8x16x128xf32>
    %96 = vector.shape_cast %95 : vector<1x8x16x128xf32> to vector<8x16x128xf32>
    %c9 = arith.constant 9 : index
    %c0_56 = arith.constant 0 : index
    %c0_57 = arith.constant 0 : index
    %97 = vector.load %arg3[%c9, %c0_56, %c0_57] : memref<25x16x128xf32, #tpu.memory_space<vmem>>, vector<1x16x128xf32>
    %98 = vector.shape_cast %97 : vector<1x16x128xf32> to vector<16x128xf32>
    %99 = vector.shape_cast %98 : vector<16x128xf32> to vector<1x16x128xf32>
    %100 = vector.broadcast %99 : vector<1x16x128xf32> to vector<8x16x128xf32>
    %101 = arith.mulf %96, %100 : vector<8x16x128xf32>
    %102 = arith.addf %92, %101 : vector<8x16x128xf32>
    %c2_i32 = arith.constant 2 : i32
    %103 = arith.addi %1, %c2_i32 : i32
    %c0_58 = arith.constant 0 : index
    %104 = arith.index_cast %103 : i32 to index
    %c0_59 = arith.constant 0 : index
    %c0_60 = arith.constant 0 : index
    %105 = vector.load %arg2[%c0_58, %104, %c0_59, %c0_60] : memref<1x20x20x128xf32, #tpu.memory_space<vmem>>, vector<1x8x16x128xf32>
    %106 = vector.shape_cast %105 : vector<1x8x16x128xf32> to vector<8x16x128xf32>
    %c10 = arith.constant 10 : index
    %c0_61 = arith.constant 0 : index
    %c0_62 = arith.constant 0 : index
    %107 = vector.load %arg3[%c10, %c0_61, %c0_62] : memref<25x16x128xf32, #tpu.memory_space<vmem>>, vector<1x16x128xf32>
    %108 = vector.shape_cast %107 : vector<1x16x128xf32> to vector<16x128xf32>
    %109 = vector.shape_cast %108 : vector<16x128xf32> to vector<1x16x128xf32>
    %110 = vector.broadcast %109 : vector<1x16x128xf32> to vector<8x16x128xf32>
    %111 = arith.mulf %106, %110 : vector<8x16x128xf32>
    %112 = arith.addf %102, %111 : vector<8x16x128xf32>
    %c2_i32_63 = arith.constant 2 : i32
    %113 = arith.addi %1, %c2_i32_63 : i32
    %c0_64 = arith.constant 0 : index
    %114 = arith.index_cast %113 : i32 to index
    %c1_65 = arith.constant 1 : index
    %c0_66 = arith.constant 0 : index
    %115 = vector.load %arg2[%c0_64, %114, %c1_65, %c0_66] : memref<1x20x20x128xf32, #tpu.memory_space<vmem>>, vector<1x8x16x128xf32>
    %116 = vector.shape_cast %115 : vector<1x8x16x128xf32> to vector<8x16x128xf32>
    %c11 = arith.constant 11 : index
    %c0_67 = arith.constant 0 : index
    %c0_68 = arith.constant 0 : index
    %117 = vector.load %arg3[%c11, %c0_67, %c0_68] : memref<25x16x128xf32, #tpu.memory_space<vmem>>, vector<1x16x128xf32>
    %118 = vector.shape_cast %117 : vector<1x16x128xf32> to vector<16x128xf32>
    %119 = vector.shape_cast %118 : vector<16x128xf32> to vector<1x16x128xf32>
    %120 = vector.broadcast %119 : vector<1x16x128xf32> to vector<8x16x128xf32>
    %121 = arith.mulf %116, %120 : vector<8x16x128xf32>
    %122 = arith.addf %112, %121 : vector<8x16x128xf32>
    %c2_i32_69 = arith.constant 2 : i32
    %123 = arith.addi %1, %c2_i32_69 : i32
    %c0_70 = arith.constant 0 : index
    %124 = arith.index_cast %123 : i32 to index
    %c2_71 = arith.constant 2 : index
    %c0_72 = arith.constant 0 : index
    %125 = vector.load %arg2[%c0_70, %124, %c2_71, %c0_72] : memref<1x20x20x128xf32, #tpu.memory_space<vmem>>, vector<1x8x16x128xf32>
    %126 = vector.shape_cast %125 : vector<1x8x16x128xf32> to vector<8x16x128xf32>
    %c12 = arith.constant 12 : index
    %c0_73 = arith.constant 0 : index
    %c0_74 = arith.constant 0 : index
    %127 = vector.load %arg3[%c12, %c0_73, %c0_74] : memref<25x16x128xf32, #tpu.memory_space<vmem>>, vector<1x16x128xf32>
    %128 = vector.shape_cast %127 : vector<1x16x128xf32> to vector<16x128xf32>
    %129 = vector.shape_cast %128 : vector<16x128xf32> to vector<1x16x128xf32>
    %130 = vector.broadcast %129 : vector<1x16x128xf32> to vector<8x16x128xf32>
    %131 = arith.mulf %126, %130 : vector<8x16x128xf32>
    %132 = arith.addf %122, %131 : vector<8x16x128xf32>
    %c2_i32_75 = arith.constant 2 : i32
    %133 = arith.addi %1, %c2_i32_75 : i32
    %c0_76 = arith.constant 0 : index
    %134 = arith.index_cast %133 : i32 to index
    %c3_77 = arith.constant 3 : index
    %c0_78 = arith.constant 0 : index
    %135 = vector.load %arg2[%c0_76, %134, %c3_77, %c0_78] : memref<1x20x20x128xf32, #tpu.memory_space<vmem>>, vector<1x8x16x128xf32>
    %136 = vector.shape_cast %135 : vector<1x8x16x128xf32> to vector<8x16x128xf32>
    %c13 = arith.constant 13 : index
    %c0_79 = arith.constant 0 : index
    %c0_80 = arith.constant 0 : index
    %137 = vector.load %arg3[%c13, %c0_79, %c0_80] : memref<25x16x128xf32, #tpu.memory_space<vmem>>, vector<1x16x128xf32>
    %138 = vector.shape_cast %137 : vector<1x16x128xf32> to vector<16x128xf32>
    %139 = vector.shape_cast %138 : vector<16x128xf32> to vector<1x16x128xf32>
    %140 = vector.broadcast %139 : vector<1x16x128xf32> to vector<8x16x128xf32>
    %141 = arith.mulf %136, %140 : vector<8x16x128xf32>
    %142 = arith.addf %132, %141 : vector<8x16x128xf32>
    %c2_i32_81 = arith.constant 2 : i32
    %143 = arith.addi %1, %c2_i32_81 : i32
    %c0_82 = arith.constant 0 : index
    %144 = arith.index_cast %143 : i32 to index
    %c4_83 = arith.constant 4 : index
    %c0_84 = arith.constant 0 : index
    %145 = vector.load %arg2[%c0_82, %144, %c4_83, %c0_84] : memref<1x20x20x128xf32, #tpu.memory_space<vmem>>, vector<1x8x16x128xf32>
    %146 = vector.shape_cast %145 : vector<1x8x16x128xf32> to vector<8x16x128xf32>
    %c14 = arith.constant 14 : index
    %c0_85 = arith.constant 0 : index
    %c0_86 = arith.constant 0 : index
    %147 = vector.load %arg3[%c14, %c0_85, %c0_86] : memref<25x16x128xf32, #tpu.memory_space<vmem>>, vector<1x16x128xf32>
    %148 = vector.shape_cast %147 : vector<1x16x128xf32> to vector<16x128xf32>
    %149 = vector.shape_cast %148 : vector<16x128xf32> to vector<1x16x128xf32>
    %150 = vector.broadcast %149 : vector<1x16x128xf32> to vector<8x16x128xf32>
    %151 = arith.mulf %146, %150 : vector<8x16x128xf32>
    %152 = arith.addf %142, %151 : vector<8x16x128xf32>
    %c3_i32 = arith.constant 3 : i32
    %153 = arith.addi %1, %c3_i32 : i32
    %c0_87 = arith.constant 0 : index
    %154 = arith.index_cast %153 : i32 to index
    %c0_88 = arith.constant 0 : index
    %c0_89 = arith.constant 0 : index
    %155 = vector.load %arg2[%c0_87, %154, %c0_88, %c0_89] : memref<1x20x20x128xf32, #tpu.memory_space<vmem>>, vector<1x8x16x128xf32>
    %156 = vector.shape_cast %155 : vector<1x8x16x128xf32> to vector<8x16x128xf32>
    %c15 = arith.constant 15 : index
    %c0_90 = arith.constant 0 : index
    %c0_91 = arith.constant 0 : index
    %157 = vector.load %arg3[%c15, %c0_90, %c0_91] : memref<25x16x128xf32, #tpu.memory_space<vmem>>, vector<1x16x128xf32>
    %158 = vector.shape_cast %157 : vector<1x16x128xf32> to vector<16x128xf32>
    %159 = vector.shape_cast %158 : vector<16x128xf32> to vector<1x16x128xf32>
    %160 = vector.broadcast %159 : vector<1x16x128xf32> to vector<8x16x128xf32>
    %161 = arith.mulf %156, %160 : vector<8x16x128xf32>
    %162 = arith.addf %152, %161 : vector<8x16x128xf32>
    %c3_i32_92 = arith.constant 3 : i32
    %163 = arith.addi %1, %c3_i32_92 : i32
    %c0_93 = arith.constant 0 : index
    %164 = arith.index_cast %163 : i32 to index
    %c1_94 = arith.constant 1 : index
    %c0_95 = arith.constant 0 : index
    %165 = vector.load %arg2[%c0_93, %164, %c1_94, %c0_95] : memref<1x20x20x128xf32, #tpu.memory_space<vmem>>, vector<1x8x16x128xf32>
    %166 = vector.shape_cast %165 : vector<1x8x16x128xf32> to vector<8x16x128xf32>
    %c16 = arith.constant 16 : index
    %c0_96 = arith.constant 0 : index
    %c0_97 = arith.constant 0 : index
    %167 = vector.load %arg3[%c16, %c0_96, %c0_97] : memref<25x16x128xf32, #tpu.memory_space<vmem>>, vector<1x16x128xf32>
    %168 = vector.shape_cast %167 : vector<1x16x128xf32> to vector<16x128xf32>
    %169 = vector.shape_cast %168 : vector<16x128xf32> to vector<1x16x128xf32>
    %170 = vector.broadcast %169 : vector<1x16x128xf32> to vector<8x16x128xf32>
    %171 = arith.mulf %166, %170 : vector<8x16x128xf32>
    %172 = arith.addf %162, %171 : vector<8x16x128xf32>
    %c3_i32_98 = arith.constant 3 : i32
    %173 = arith.addi %1, %c3_i32_98 : i32
    %c0_99 = arith.constant 0 : index
    %174 = arith.index_cast %173 : i32 to index
    %c2_100 = arith.constant 2 : index
    %c0_101 = arith.constant 0 : index
    %175 = vector.load %arg2[%c0_99, %174, %c2_100, %c0_101] : memref<1x20x20x128xf32, #tpu.memory_space<vmem>>, vector<1x8x16x128xf32>
    %176 = vector.shape_cast %175 : vector<1x8x16x128xf32> to vector<8x16x128xf32>
    %c17 = arith.constant 17 : index
    %c0_102 = arith.constant 0 : index
    %c0_103 = arith.constant 0 : index
    %177 = vector.load %arg3[%c17, %c0_102, %c0_103] : memref<25x16x128xf32, #tpu.memory_space<vmem>>, vector<1x16x128xf32>
    %178 = vector.shape_cast %177 : vector<1x16x128xf32> to vector<16x128xf32>
    %179 = vector.shape_cast %178 : vector<16x128xf32> to vector<1x16x128xf32>
    %180 = vector.broadcast %179 : vector<1x16x128xf32> to vector<8x16x128xf32>
    %181 = arith.mulf %176, %180 : vector<8x16x128xf32>
    %182 = arith.addf %172, %181 : vector<8x16x128xf32>
    %c3_i32_104 = arith.constant 3 : i32
    %183 = arith.addi %1, %c3_i32_104 : i32
    %c0_105 = arith.constant 0 : index
    %184 = arith.index_cast %183 : i32 to index
    %c3_106 = arith.constant 3 : index
    %c0_107 = arith.constant 0 : index
    %185 = vector.load %arg2[%c0_105, %184, %c3_106, %c0_107] : memref<1x20x20x128xf32, #tpu.memory_space<vmem>>, vector<1x8x16x128xf32>
    %186 = vector.shape_cast %185 : vector<1x8x16x128xf32> to vector<8x16x128xf32>
    %c18 = arith.constant 18 : index
    %c0_108 = arith.constant 0 : index
    %c0_109 = arith.constant 0 : index
    %187 = vector.load %arg3[%c18, %c0_108, %c0_109] : memref<25x16x128xf32, #tpu.memory_space<vmem>>, vector<1x16x128xf32>
    %188 = vector.shape_cast %187 : vector<1x16x128xf32> to vector<16x128xf32>
    %189 = vector.shape_cast %188 : vector<16x128xf32> to vector<1x16x128xf32>
    %190 = vector.broadcast %189 : vector<1x16x128xf32> to vector<8x16x128xf32>
    %191 = arith.mulf %186, %190 : vector<8x16x128xf32>
    %192 = arith.addf %182, %191 : vector<8x16x128xf32>
    %c3_i32_110 = arith.constant 3 : i32
    %193 = arith.addi %1, %c3_i32_110 : i32
    %c0_111 = arith.constant 0 : index
    %194 = arith.index_cast %193 : i32 to index
    %c4_112 = arith.constant 4 : index
    %c0_113 = arith.constant 0 : index
    %195 = vector.load %arg2[%c0_111, %194, %c4_112, %c0_113] : memref<1x20x20x128xf32, #tpu.memory_space<vmem>>, vector<1x8x16x128xf32>
    %196 = vector.shape_cast %195 : vector<1x8x16x128xf32> to vector<8x16x128xf32>
    %c19 = arith.constant 19 : index
    %c0_114 = arith.constant 0 : index
    %c0_115 = arith.constant 0 : index
    %197 = vector.load %arg3[%c19, %c0_114, %c0_115] : memref<25x16x128xf32, #tpu.memory_space<vmem>>, vector<1x16x128xf32>
    %198 = vector.shape_cast %197 : vector<1x16x128xf32> to vector<16x128xf32>
    %199 = vector.shape_cast %198 : vector<16x128xf32> to vector<1x16x128xf32>
    %200 = vector.broadcast %199 : vector<1x16x128xf32> to vector<8x16x128xf32>
    %201 = arith.mulf %196, %200 : vector<8x16x128xf32>
    %202 = arith.addf %192, %201 : vector<8x16x128xf32>
    %c4_i32 = arith.constant 4 : i32
    %203 = arith.addi %1, %c4_i32 : i32
    %c0_116 = arith.constant 0 : index
    %204 = arith.index_cast %203 : i32 to index
    %c0_117 = arith.constant 0 : index
    %c0_118 = arith.constant 0 : index
    %205 = vector.load %arg2[%c0_116, %204, %c0_117, %c0_118] : memref<1x20x20x128xf32, #tpu.memory_space<vmem>>, vector<1x8x16x128xf32>
    %206 = vector.shape_cast %205 : vector<1x8x16x128xf32> to vector<8x16x128xf32>
    %c20 = arith.constant 20 : index
    %c0_119 = arith.constant 0 : index
    %c0_120 = arith.constant 0 : index
    %207 = vector.load %arg3[%c20, %c0_119, %c0_120] : memref<25x16x128xf32, #tpu.memory_space<vmem>>, vector<1x16x128xf32>
    %208 = vector.shape_cast %207 : vector<1x16x128xf32> to vector<16x128xf32>
    %209 = vector.shape_cast %208 : vector<16x128xf32> to vector<1x16x128xf32>
    %210 = vector.broadcast %209 : vector<1x16x128xf32> to vector<8x16x128xf32>
    %211 = arith.mulf %206, %210 : vector<8x16x128xf32>
    %212 = arith.addf %202, %211 : vector<8x16x128xf32>
    %c4_i32_121 = arith.constant 4 : i32
    %213 = arith.addi %1, %c4_i32_121 : i32
    %c0_122 = arith.constant 0 : index
    %214 = arith.index_cast %213 : i32 to index
    %c1_123 = arith.constant 1 : index
    %c0_124 = arith.constant 0 : index
    %215 = vector.load %arg2[%c0_122, %214, %c1_123, %c0_124] : memref<1x20x20x128xf32, #tpu.memory_space<vmem>>, vector<1x8x16x128xf32>
    %216 = vector.shape_cast %215 : vector<1x8x16x128xf32> to vector<8x16x128xf32>
    %c21 = arith.constant 21 : index
    %c0_125 = arith.constant 0 : index
    %c0_126 = arith.constant 0 : index
    %217 = vector.load %arg3[%c21, %c0_125, %c0_126] : memref<25x16x128xf32, #tpu.memory_space<vmem>>, vector<1x16x128xf32>
    %218 = vector.shape_cast %217 : vector<1x16x128xf32> to vector<16x128xf32>
    %219 = vector.shape_cast %218 : vector<16x128xf32> to vector<1x16x128xf32>
    %220 = vector.broadcast %219 : vector<1x16x128xf32> to vector<8x16x128xf32>
    %221 = arith.mulf %216, %220 : vector<8x16x128xf32>
    %222 = arith.addf %212, %221 : vector<8x16x128xf32>
    %c4_i32_127 = arith.constant 4 : i32
    %223 = arith.addi %1, %c4_i32_127 : i32
    %c0_128 = arith.constant 0 : index
    %224 = arith.index_cast %223 : i32 to index
    %c2_129 = arith.constant 2 : index
    %c0_130 = arith.constant 0 : index
    %225 = vector.load %arg2[%c0_128, %224, %c2_129, %c0_130] : memref<1x20x20x128xf32, #tpu.memory_space<vmem>>, vector<1x8x16x128xf32>
    %226 = vector.shape_cast %225 : vector<1x8x16x128xf32> to vector<8x16x128xf32>
    %c22 = arith.constant 22 : index
    %c0_131 = arith.constant 0 : index
    %c0_132 = arith.constant 0 : index
    %227 = vector.load %arg3[%c22, %c0_131, %c0_132] : memref<25x16x128xf32, #tpu.memory_space<vmem>>, vector<1x16x128xf32>
    %228 = vector.shape_cast %227 : vector<1x16x128xf32> to vector<16x128xf32>
    %229 = vector.shape_cast %228 : vector<16x128xf32> to vector<1x16x128xf32>
    %230 = vector.broadcast %229 : vector<1x16x128xf32> to vector<8x16x128xf32>
    %231 = arith.mulf %226, %230 : vector<8x16x128xf32>
    %232 = arith.addf %222, %231 : vector<8x16x128xf32>
    %c4_i32_133 = arith.constant 4 : i32
    %233 = arith.addi %1, %c4_i32_133 : i32
    %c0_134 = arith.constant 0 : index
    %234 = arith.index_cast %233 : i32 to index
    %c3_135 = arith.constant 3 : index
    %c0_136 = arith.constant 0 : index
    %235 = vector.load %arg2[%c0_134, %234, %c3_135, %c0_136] : memref<1x20x20x128xf32, #tpu.memory_space<vmem>>, vector<1x8x16x128xf32>
    %236 = vector.shape_cast %235 : vector<1x8x16x128xf32> to vector<8x16x128xf32>
    %c23 = arith.constant 23 : index
    %c0_137 = arith.constant 0 : index
    %c0_138 = arith.constant 0 : index
    %237 = vector.load %arg3[%c23, %c0_137, %c0_138] : memref<25x16x128xf32, #tpu.memory_space<vmem>>, vector<1x16x128xf32>
    %238 = vector.shape_cast %237 : vector<1x16x128xf32> to vector<16x128xf32>
    %239 = vector.shape_cast %238 : vector<16x128xf32> to vector<1x16x128xf32>
    %240 = vector.broadcast %239 : vector<1x16x128xf32> to vector<8x16x128xf32>
    %241 = arith.mulf %236, %240 : vector<8x16x128xf32>
    %242 = arith.addf %232, %241 : vector<8x16x128xf32>
    %c4_i32_139 = arith.constant 4 : i32
    %243 = arith.addi %1, %c4_i32_139 : i32
    %c0_140 = arith.constant 0 : index
    %244 = arith.index_cast %243 : i32 to index
    %c4_141 = arith.constant 4 : index
    %c0_142 = arith.constant 0 : index
    %245 = vector.load %arg2[%c0_140, %244, %c4_141, %c0_142] : memref<1x20x20x128xf32, #tpu.memory_space<vmem>>, vector<1x8x16x128xf32>
    %246 = vector.shape_cast %245 : vector<1x8x16x128xf32> to vector<8x16x128xf32>
    %c24 = arith.constant 24 : index
    %c0_143 = arith.constant 0 : index
    %c0_144 = arith.constant 0 : index
    %247 = vector.load %arg3[%c24, %c0_143, %c0_144] : memref<25x16x128xf32, #tpu.memory_space<vmem>>, vector<1x16x128xf32>
    %248 = vector.shape_cast %247 : vector<1x16x128xf32> to vector<16x128xf32>
    %249 = vector.shape_cast %248 : vector<16x128xf32> to vector<1x16x128xf32>
    %250 = vector.broadcast %249 : vector<1x16x128xf32> to vector<8x16x128xf32>
    %251 = arith.mulf %246, %250 : vector<8x16x128xf32>
    %252 = arith.addf %242, %251 : vector<8x16x128xf32>
    %253 = vector.shape_cast %252 : vector<8x16x128xf32> to vector<128x128xf32>
    %254 = arith.truncf %253 : vector<128x128xf32> to vector<128x128xbf16>
    %c0_145 = arith.constant 0 : index
    %c0_146 = arith.constant 0 : index
    %255 = vector.load %arg4[%c0_145, %c0_146] : memref<128x640xbf16, #tpu.memory_space<vmem>>, vector<128x640xbf16>
    %cst_147 = arith.constant dense<0.000000e+00> : vector<128x640xf32>
    %256 = tpu.matmul %254, %255, %cst_147 {dimension_numbers = #tpu.dot_dimension_numbers<[1], [0], [0], [1], [0, 0, 1, 1], [], []>} : vector<128x128xbf16>, vector<128x640xbf16>, vector<128x640xf32> -> vector<128x640xf32>
    %257 = vector.extract_strided_slice %256 {offsets = [0, 0], sizes = [128, 512], strides = [1, 1]} : vector<128x640xf32> to vector<128x512xf32>
    %cst_148 = arith.constant 0.000000e+00 : f32
    %258 = vector.broadcast %cst_148 : f32 to vector<128x512xf32>
    %259 = arith.maximumf %257, %258 : vector<128x512xf32>
    %260 = arith.mulf %259, %259 : vector<128x512xf32>
    %261 = vector.extract_strided_slice %256 {offsets = [0, 512], sizes = [128, 128], strides = [1, 1]} : vector<128x640xf32> to vector<128x128xf32>
    %262 = arith.negf %261 : vector<128x128xf32>
    %263 = math.exp %262 : vector<128x128xf32>
    %cst_149 = arith.constant 1.000000e+00 : f32
    %264 = vector.broadcast %cst_149 : f32 to vector<128x128xf32>
    %265 = arith.addf %264, %263 : vector<128x128xf32>
    %266 = arith.divf %264, %265 : vector<128x128xf32>
    %267 = arith.truncf %260 : vector<128x512xf32> to vector<128x512xbf16>
    %c0_150 = arith.constant 0 : index
    %c0_151 = arith.constant 0 : index
    %268 = vector.load %arg5[%c0_150, %c0_151] : memref<512x128xbf16, #tpu.memory_space<vmem>>, vector<512x128xbf16>
    %cst_152 = arith.constant dense<0.000000e+00> : vector<128x128xf32>
    %269 = tpu.matmul %267, %268, %cst_152 {dimension_numbers = #tpu.dot_dimension_numbers<[1], [0], [0], [1], [0, 0, 1, 1], [], []>} : vector<128x512xbf16>, vector<512x128xbf16>, vector<128x128xf32> -> vector<128x128xf32>
    %270 = arith.mulf %266, %269 : vector<128x128xf32>
    %c0_153 = arith.constant 0 : index
    %c0_154 = arith.constant 0 : index
    %c0_155 = arith.constant 0 : index
    %271 = vector.load %arg6[%c0_153, %c0_154, %c0_155] : memref<1x128x128xf32, #tpu.memory_space<vmem>>, vector<1x128x128xf32>
    %272 = vector.shape_cast %271 : vector<1x128x128xf32> to vector<128x128xf32>
    %273 = vector.shape_cast %270 : vector<128x128xf32> to vector<1x128x128xf32>
    tpu.vector_store %arg6[%c0_153, %c0_154, %c0_155], %273 {strides = array<i32>} : memref<1x128x128xf32, #tpu.memory_space<vmem>>, vector<1x128x128xf32>,
    return
  }
  func.func @transform_0(%arg0: i32, %arg1: i32) -> (i32, i32, i32, i32) {
    %c0_i32 = arith.constant 0 : i32
    %c0_i32_0 = arith.constant 0 : i32
    %c0_i32_1 = arith.constant 0 : i32
    %c0_i32_2 = arith.constant 0 : i32
    return %arg0, %c0_i32, %c0_i32_0, %c0_i32_1 : i32, i32, i32, i32
  }
  func.func @transform_1(%arg0: i32, %arg1: i32) -> (i32, i32, i32) {
    %c0_i32 = arith.constant 0 : i32
    %c0_i32_0 = arith.constant 0 : i32
    %c0_i32_1 = arith.constant 0 : i32
    %c0_i32_2 = arith.constant 0 : i32
    return %c0_i32, %c0_i32_0, %c0_i32_1 : i32, i32, i32
  }
  func.func @transform_2(%arg0: i32, %arg1: i32) -> (i32, i32) {
    %c0_i32 = arith.constant 0 : i32
    %c0_i32_0 = arith.constant 0 : i32
    %c0_i32_1 = arith.constant 0 : i32
    return %c0_i32, %c0_i32_0 : i32, i32
  }
  func.func @transform_3(%arg0: i32, %arg1: i32) -> (i32, i32) {
    %c0_i32 = arith.constant 0 : i32
    %c0_i32_0 = arith.constant 0 : i32
    %c0_i32_1 = arith.constant 0 : i32
    return %c0_i32, %c0_i32_0 : i32, i32
  }
  func.func @transform_4(%arg0: i32, %arg1: i32) -> (i32, i32, i32) {
    %c0_i32 = arith.constant 0 : i32
    %c0_i32_0 = arith.constant 0 : i32
    return %arg0, %arg1, %c0_i32 : i32, i32, i32
  }
}

</mosaic_0001>

<bundles_post_ra>
// kernel: tpu_custom_call.1
= control target key start
LH: loop header
LB: loop body
LE: loop exit
PB: predicated region body
PF: predicated region fallthrough
CT: control target
= control target key end

     0   :  { %9 = vsyncpa [#allocation3], 0  ;;  %s6060_s0 = inlined_call_operand.vmem [shape: f32[2,20,20,128], index: 0, kind: input, shape index: {}]   ;;  %s6061_s1 = inlined_call_operand.vmem [shape: f32[25,16,128], index: 1, kind: input, shape index: {}]   ;;  %s6062_s2 = inlined_call_operand.vmem [shape: bf16[128,640], index: 2, kind: input, shape index: {}]   ;;  %s6063_s3 = inlined_call_operand.vmem [shape: bf16[512,128], index: 3, kind: input, shape index: {}]   ;;  %s6064_s4 = inlined_call_operand.hbm [shape: f32[2,256,128], index: 4, kind: output, shape index: {}]  }
   0x1   :  { %11 = vsyncpa [#allocation3 + $0x1], 0  ;;  %s4007_s15 = smov 0   ;;  %s4009_s16 = smov 0  }
   0x2   :  { %s4011_s17 = smov 0   ;;  %s4013_s18 = smov 0  }
   0x3   :  { %s4015_s19 = smov 0   ;;  %s4017_s20 = smov 0  }
   0x4   :  { %s4019_s21 = smov 0   ;;  %s4021_s22 = smov 0  }
   0x5 LB: > { %s2936_s23 = sadd.s32 4294967295, %s3976_s22   ;;  %s2937_s24 = sadd.s32 4294967294, %s3976_s22   ;;  %s3976_s22 = sphi %s4021_s22, %s17_s22   ;;  %s3972_s21 = sphi %s4019_s21, %s6706_s21   ;;  %s3968_s20 = sphi %s4017_s20, %s6705_s20   ;;  %s3964_s19 = sphi %s4015_s19, %s6704_s19   ;;  %s3960_s18 = sphi %s4013_s18, %s6703_s18   ;;  %s3956_s17 = sphi %s4011_s17, %s6702_s17   ;;  %s3952_s16 = sphi %s4009_s16, %s6701_s16   ;;  %s3948_s15 = sphi %s4007_s15, %s6700_s15  }
   0x6   : > { %s26_s25 = sadd.s32 1, %s3968_s20  ;;  %s29_s26 = sadd.s32 1, %s3972_s21 }
   0x7   : > { %p27_p0 = scmp.ge.s32.totalorder %s26_s25, 2  ;;  %p137_p1 = scmp.ne.s32.totalorder %s3956_s17, %s3952_s16 }
   0x8   : > { %p138_p2 = scmp.eq.s32.totalorder %s2936_s23, 3  ;;  %p143_p5 = scmp.ne.s32.totalorder %s3952_s16, %s3948_s15 }
   0x9   : > { %s6708_s25 = smov (%p27_p0, %s26_s25), 0  ;;  %s6710_s26 = smov (!%p27_p0, %s29_s26), %s3972_s21 }
   0xa   : > { %s123_s27 = ssub.s32 %s3968_s20, %s6708_s25  ;;  %p4058_p3 = por %p138_p2, %p137_p1 }
   0xb   : > { %p31_p4 = scmp.ge.s32.totalorder %s6710_s26, 2  ;;  %p144_p6 = scmp.eq.s32.totalorder %s2937_s24, 3 }
   0xc   : > { %p2940_p7 = scmp.ge.s32.totalorder %s3976_s22, 1  ;;  %p179_p9 = scmp.lt.s32.totalorder %s3976_s22, 5 }
   0xd   : > { %s6712_s26 = smov (%p31_p4, %s6710_s26), 0  ;;  %p4067_p8 = por %p144_p6, %p143_p5 }
   0xe   : > { %s122_s30 = ssub.s32 %s3972_s21, %s6712_s26  ;;  %s127_s5 = sadd.s32 1, %s3956_s17 }
   0xf   : > { %s124_s6 = sor.u32 %s123_s27, %s122_s30  ;;  %p180_p10 = pnand %p2940_p7, %p179_p9 }
  0x10   : > { %p125_p11 = scmp.eq.s32.totalorder %s124_s6, 0 }
  0x11   : > { %183 = sbr.rel (%p180_p10) target bundleno = 717 (0x2cd), region = 36 }
  0x12   : > { %s4076_s7 = scalar_select %p125_p11, %s3956_s17, %s127_s5  }
  0x16   : > { %v3682_v0 = vld [vmem:[%s6062_s2 + $0x11c] ss:$20 sps:$4 sm:$0xff]   ;;  %v3684_v1 = vld [vmem:[%s6062_s2 + $0x124] ss:$20 sps:$4 sm:$0xff]   ;;  %v6065_v2 = vmov 0   ;;  %p205_p12 = scmp.lt.s32.totalorder %s3964_s19, 1 }
  0x17   : > { %1797 = vmatprep.mubr.bf16.mxu0 %v6065_v2  ;;  %1910 = vmatprep.mubr.bf16.mxu1 %v6065_v2  ;;  %v3686_v3 = vld [vmem:[%s6062_s2 + $0x118] ss:$20 sps:$4 sm:$0xff]   ;;  %v3687_v4 = vld [vmem:[%s6062_s2 + $0x120] ss:$20 sps:$4 sm:$0xff]   ;;  %v3690_v6 = vld [vmem:[%s6062_s2 + $0xfc] ss:$20 sps:$4 sm:$0xff]  }
  0x18   : > { %1765 = vmatprep.subr.bf16.mxu0 %v3682_v0  ;;  %1878 = vmatprep.subr.bf16.mxu1 %v3684_v1  ;;  %v3688_v5 = vld [vmem:[%s6062_s2 + $0xf4] ss:$20 sps:$4 sm:$0xff]   ;;  %v3692_v7 = vld [vmem:[%s6062_s2 + $0xf0] ss:$20 sps:$4 sm:$0xff]   ;;  %v3693_v8 = vld [vmem:[%s6062_s2 + $0xf8] ss:$20 sps:$4 sm:$0xff]  }
  0x19   : > { %1766 = vmatpush1.bf16.msra.mxu0 %v3686_v3  ;;  %1879 = vmatpush1.bf16.msra.mxu1 %v3687_v4  ;;  %v3694_v9 = vld [vmem:[%s6062_s2 + $0xcc] ss:$20 sps:$4 sm:$0xff]   ;;  %s206_s13 = scalar_select %p205_p12, %s3964_s19, 1  ;;  %v3696_v10 = vld [vmem:[%s6062_s2 + $0xd4] ss:$20 sps:$4 sm:$0xff]   ;;  %v4202_v40 = vld [vmem:[%s6061_s1 + $0x18] sm:$0xff] }
  0x1a   : > { %1767 = vmatprep.subr.bf16.mxu0 %v3688_v5  ;;  %1880 = vmatprep.subr.bf16.mxu1 %v3690_v6  ;;  %v3698_v11 = vld [vmem:[%s6062_s2 + $0xc8] ss:$20 sps:$4 sm:$0xff]   ;;  %v3699_v12 = vld [vmem:[%s6062_s2 + $0xd0] ss:$20 sps:$4 sm:$0xff]   ;;  %v3702_v14 = vld [vmem:[%s6062_s2 + $0xac] ss:$20 sps:$4 sm:$0xff]  }
  0x1b   : > { %v3700_v13 = vld [vmem:[%s6062_s2 + $0xa4] ss:$20 sps:$4 sm:$0xff]   ;;  %v3704_v15 = vld [vmem:[%s6062_s2 + $0xa0] ss:$20 sps:$4 sm:$0xff]   ;;  %s3607_s14 = smul.u32 480, %s206_s13  ;;  %v4182_v32 = vld [vmem:[%s6061_s1 + $0x8] sm:$0xff] }
  0x1c   : > { %v3705_v16 = vld [vmem:[%s6062_s2 + $0xa8] ss:$20 sps:$4 sm:$0xff]   ;;  %v3708_v18 = vld [vmem:[%s6062_s2 + $0x84] ss:$20 sps:$4 sm:$0xff]   ;;  %s2944_s8 = smul.u32 192, %s3960_s18  ;;  %6326 = vst [vmem:[#allocation6_spill] sm:$0xff] %v4182_v32 }
  0x1d   : > { %1768 = vmatpush1.bf16.msra.mxu0 %v3692_v7  ;;  %1881 = vmatpush1.bf16.msra.mxu1 %v3693_v8  ;;  %v3706_v17 = vld [vmem:[%s6062_s2 + $0x7c] ss:$20 sps:$4 sm:$0xff]   ;;  %v3710_v19 = vld [vmem:[%s6062_s2 + $0x78] ss:$20 sps:$4 sm:$0xff]   ;;  %v3711_v20 = vld [vmem:[%s6062_s2 + $0x80] ss:$20 sps:$4 sm:$0xff]   ;;  %s209_s24 = scalar_lea.vmem %s6060_s0, %s3607_s14 }
  0x1e   : > { %1769 = vmatprep.subr.bf16.mxu0 %v3694_v9  ;;  %1882 = vmatprep.subr.bf16.mxu1 %v3696_v10  ;;  %v3712_v21 = vld [vmem:[%s6062_s2 + $0x54] ss:$20 sps:$4 sm:$0xff]   ;;  %v3714_v22 = vld [vmem:[%s6062_s2 + $0x5c] ss:$20 sps:$4 sm:$0xff]   ;;  %s4152_s9 = scalar_lea.vmem %s209_s24, %s2944_s8  ;;  %v3717_v24 = vld [vmem:[%s6062_s2 + $0x58] ss:$20 sps:$4 sm:$0xff]  }
  0x1f   : > { %v3716_v23 = vld [vmem:[%s6062_s2 + $0x50] ss:$20 sps:$4 sm:$0xff]   ;;  %v3718_v25 = vld [vmem:[%s6062_s2 + $0x2c] ss:$20 sps:$4 sm:$0xff]   ;;  %v3720_v26 = vld [vmem:[%s6062_s2 + $0x34] ss:$20 sps:$4 sm:$0xff]  }
  0x20   : > { %v215_v27 = vld [vmem:[%s4152_s9] sm:$0xff]  ;;  %v216_v28 = vld [vmem:[%s4152_s9 + $0x8] sm:$0xff]  ;;  %v4197_v39 = vld [vmem:[%s6061_s1 + $0x10] sm:$0xff]  ;;  %6328 = vst [vmem:[#allocation8_spill] sm:$0xff] %v4202_v40  ;;  %s202_s30 = sand.u32 1, %s3952_s16   ;;  %s3410_s10 = sshll.u32 %s3960_s18, 4 }
  0x21   : > { %1770 = vmatpush1.bf16.msra.mxu0 %v3698_v11  ;;  %1883 = vmatpush1.bf16.msra.mxu1 %v3699_v12  ;;  %v3722_v29 = vld [vmem:[%s6062_s2 + $0x28] ss:$20 sps:$4 sm:$0xff]   ;;  %v3723_v30 = vld [vmem:[%s6062_s2 + $0x30] ss:$20 sps:$4 sm:$0xff]   ;;  %v3726_v35 = vld [vmem:[%s6062_s2 + $0xc] ss:$20 sps:$4 sm:$0xff]   ;;  %v234_v37 = vmul.f32 %v4182_v32, %v216_v28 }
  0x22   : > { %1771 = vmatprep.subr.bf16.mxu0 %v3700_v13  ;;  %1884 = vmatprep.subr.bf16.mxu1 %v3702_v14  ;;  %v4177_v31 = vld [vmem:[%s6061_s1] sm:$0xff]  ;;  %v266_v38 = vld [vmem:[%s4152_s9 + $0x9] sm:$0xff]  ;;  %6327 = vst [vmem:[#allocation7_spill] sm:$0xff] %v4197_v39  ;;  %v4236_v56 = vld [vmem:[%s6061_s1 + $0x38] sm:$0xff]  ;;  %s2941_s5 = sshll.u32 %s202_s30, 7  ;;  %s3411_s13 = sshll.u32 %s3964_s19, 5 }
  0x23   : > { %6325 = vst [vmem:[#allocation5_spill] sm:$0xff] %v4177_v31  ;;  %v265_v33 = vld [vmem:[%s4152_s9 + $0x1] sm:$0xff]  ;;  %v233_v36 = vmul.f32 %v4177_v31, %v215_v27  ;;  %v285_v42 = vmul.f32 %v4202_v40, %v266_v38  ;;  %v317_v44 = vld [vmem:[%s4152_s9 + $0xa] sm:$0xff]  ;;  %6332 = vst [vmem:[#allocation12_spill] sm:$0xff] %v4236_v56  ;;  %s5969_s6 = scalar_lea.vmem [#allocation2], %s2941_s5  ;;  %s2839_s14 = sadd.s32 %s3411_s13, %s3410_s10 }
  0x24   : > { %v3724_v34 = vld [vmem:[%s6062_s2 + $0x4] ss:$20 sps:$4 sm:$0xff]   ;;  %v284_v41 = vmul.f32 %v4197_v39, %v265_v33  ;;  %v4216_v46 = vld [vmem:[%s6061_s1 + $0x28] sm:$0xff]  ;;  %v3728_v50 = vld [vmem:[%s6062_s2] ss:$20 sps:$4 sm:$0xff]   ;;  %s3412_s18 = sshll.u32 %s2839_s14, 7 }
  0x25   : > { %1772 = vmatpush1.bf16.msra.mxu0 %v3704_v15  ;;  %1885 = vmatpush1.bf16.msra.mxu1 %v3705_v16  ;;  %v316_v43 = vld [vmem:[%s4152_s9 + $0x2] sm:$0xff]  ;;  %6330 = vst [vmem:[#allocation10_spill] sm:$0xff] %v4216_v46  ;;  %v368_v49 = vld [vmem:[%s4152_s9 + $0xb] sm:$0xff]  ;;  %v301_v53 = vadd.f32 %v285_v42, %v234_v37  ;;  %v336_v54 = vmul.f32 %v4216_v46, %v317_v44  ;;  %v2955_v3 = vld [vmem:[%s4152_s9 + $0x18] sm:$0xff]  ;;  %s2842_s19 = sshll.u32 %s5969_s6, 4  ;;  %s6002_s23 = scalar_lea.hbm %s6064_s4, %s3412_s18  ;;  %s6004_s19 = int_to_ptr.vmem [resolvable:$true] %s2842_s19 }
  0x26   : > { %1773 = vmatprep.subr.bf16.mxu0 %v3706_v17  ;;  %1886 = vmatprep.subr.bf16.mxu1 %v3708_v18  ;;  %v4211_v45 = vld [vmem:[%s6061_s1 + $0x20] sm:$0xff]  ;;  %v3729_v51 = vld [vmem:[%s6062_s2 + $0x8] ss:$20 sps:$4 sm:$0xff]   ;;  %v300_v52 = vadd.f32 %v284_v41, %v233_v36  ;;  %v4231_v55 = vld [vmem:[%s6061_s1 + $0x30] sm:$0xff]  ;;  %v387_v59 = vmul.f32 %v4236_v56, %v368_v49  ;;  %v235_v11 = vmul.f32 %v2955_v3, %v4177_v31  ;;  %s3884_s8 = scalar_lea.vmem %s6004_s19, 2048  ;;  %s3979_s24 = smov [#allocation2]  }
  0x27   : > { %6329 = vst [vmem:[#allocation9_spill] sm:$0xff] %v4211_v45  ;;  %v335_v47 = vmul.f32 %v4211_v45, %v316_v43  ;;  %v367_v48 = vld [vmem:[%s4152_s9 + $0x3] sm:$0xff]  ;;  %6331 = vst [vmem:[#allocation11_spill] sm:$0xff] %v4231_v55  ;;  %v419_v60 = vld [vmem:[%s4152_s9 + $0xc] sm:$0xff]  ;;  %v352_v0 = vadd.f32 %v336_v54, %v301_v53  ;;  %p3885_p13 = scmp.ne.s32.totalorder %s6004_s19, %s3884_s8  ;;  %s3888_s27 = sshll.u32 %s3979_s24, 4  ;;  %s3889_s27 = int_to_ptr.vmem [resolvable:$false] %s3888_s27 }
  0x28   : > { %v418_v57 = vld [vmem:[%s4152_s9 + $0x4] sm:$0xff]  ;;  %v386_v58 = vmul.f32 %v4231_v55, %v367_v48  ;;  %v4258_v5 = vld [vmem:[%s6061_s1 + $0x50] sm:$0xff]  ;;  %v4264_v7 = vld [vmem:[%s6061_s1 + $0x58] sm:$0xff]  ;;  %s3890_s5 = scalar_lea.vmem %s3889_s27, 4096  ;;  %p3891_p2 = scmp.lt.s32.totalorder %s6004_s19, %s3889_s27 }
  0x29   : > { %1774 = vmatpush1.bf16.msra.mxu0 %v3710_v19  ;;  %1887 = vmatpush1.bf16.msra.mxu1 %v3711_v20  ;;  %v4245_v61 = vld [vmem:[%s6061_s1 + $0x40] sm:$0xff]  ;;  %v4250_v62 = vld [vmem:[%s6061_s1 + $0x48] sm:$0xff]  ;;  %v351_v63 = vadd.f32 %v335_v47, %v300_v52  ;;  %6335 = vst [vmem:[#allocation15_spill] sm:$0xff] %v4258_v5  ;;  %6336 = vst [vmem:[#allocation16_spill] sm:$0xff] %v4264_v7  ;;  %v491_v8 = vmul.f32 %v4258_v5, %v2955_v3  ;;  %p3886_p0 = pnand %p3885_p13, %p4058_p3  ;;  %p3892_p4 = scmp.lt.s32.totalorder %s3890_s5, %s3884_s8 }
  0x2a   : > { %1775 = vmatprep.subr.bf16.mxu0 %v3712_v21  ;;  %1888 = vmatprep.subr.bf16.mxu1 %v3714_v22  ;;  %6333 = vst [vmem:[#allocation13_spill] sm:$0xff] %v4245_v61  ;;  %6334 = vst [vmem:[#allocation14_spill] sm:$0xff] %v4250_v62  ;;  %v437_v1 = vmul.f32 %v4245_v61, %v418_v57  ;;  %v2956_v4 = vld [vmem:[%s4152_s9 + $0x20] sm:$0xff]  ;;  %v438_v6 = vmul.f32 %v4250_v62, %v419_v60  ;;  %v4279_v16 = vld [vmem:[%s6061_s1 + $0x68] sm:$0xff] }
  0x2b   : > { %v2973_v9 = vld [vmem:[%s4152_s9 + $0x19] sm:$0xff]  ;;  %v2974_v10 = vld [vmem:[%s4152_s9 + $0x21] sm:$0xff]  ;;  %v402_v12 = vadd.f32 %v386_v58, %v351_v63  ;;  %v403_v13 = vadd.f32 %v387_v59, %v352_v0  ;;  %v492_v14 = vmul.f32 %v4264_v7, %v2956_v4  ;;  %6338 = vst [vmem:[#allocation18_spill] sm:$0xff] %v4279_v16  ;;  %v236_v17 = vmul.f32 %v2956_v4, %v4182_v32  ;;  %v4287_v20 = vld [vmem:[%s6061_s1 + $0x70] sm:$0xff]  ;;  %p3887_p1 = pneg %p3886_p0  ;;  %p3893_p5 = por %p3892_p4, %p3891_p2 }
  0x2c   : > { %v4274_v15 = vld [vmem:[%s6061_s1 + $0x60] sm:$0xff]  ;;  %6339 = vst [vmem:[#allocation19_spill] sm:$0xff] %v4287_v20  ;;  %v4292_v21 = vld [vmem:[%s6061_s1 + $0x78] sm:$0xff]  ;;  %v286_v22 = vmul.f32 %v2973_v9, %v4197_v39  ;;  %v4308_v33 = vld [vmem:[%s6061_s1 + $0x88] sm:$0xff] }
  0x2d   : > { %1776 = vmatpush1.bf16.msra.mxu0 %v3716_v23  ;;  %1889 = vmatpush1.bf16.msra.mxu1 %v3717_v24  ;;  %6337 = vst [vmem:[#allocation17_spill] sm:$0xff] %v4274_v15  ;;  %v542_v18 = vmul.f32 %v4274_v15, %v2973_v9  ;;  %v2991_v19 = vld [vmem:[%s4152_s9 + $0x1a] sm:$0xff]  ;;  %6340 = vst [vmem:[#allocation20_spill] sm:$0xff] %v4292_v21  ;;  %v287_v23 = vmul.f32 %v2974_v10, %v4202_v40  ;;  %v2992_v27 = vld [vmem:[%s4152_s9 + $0x22] sm:$0xff]  ;;  %p3894_p6 = pnand %p3893_p5, %p3887_p1 }
  0x2e   : > { %1777 = vmatprep.subr.bf16.mxu0 %v3718_v25  ;;  %1890 = vmatprep.subr.bf16.mxu1 %v3720_v26  ;;  %v453_v24 = vadd.f32 %v437_v1, %v402_v12  ;;  %v454_v25 = vadd.f32 %v438_v6, %v403_v13  ;;  %v543_v26 = vmul.f32 %v4279_v16, %v2974_v10  ;;  %v3009_v28 = vld [vmem:[%s4152_s9 + $0x1b] sm:$0xff]  ;;  %v3010_v41 = vld [vmem:[%s4152_s9 + $0x23] sm:$0xff]  ;;  %v4315_v42 = vld [vmem:[%s6061_s1 + $0x90] sm:$0xff] }
  0x2f   : > { %6342 = vst [vmem:[#allocation22_spill] sm:$0xff] %v4308_v33  ;;  %v594_v38 = vmul.f32 %v4292_v21, %v2992_v27  ;;  %6343 = vst [vmem:[#allocation23_spill] sm:$0xff] %v4315_v42  ;;  %v337_v43 = vmul.f32 %v2991_v19, %v4211_v45  ;;  %v3027_v44 = vld [vmem:[%s4152_s9 + $0x1c] sm:$0xff]  ;;  %v338_v48 = vmul.f32 %v2992_v27, %v4216_v46  ;;  %v4336_v57 = vld [vmem:[%s6061_s1 + $0xa8] sm:$0xff] }
  0x30   : > { %v507_v36 = vadd.f32 %v491_v8, %v453_v24  ;;  %v508_v37 = vadd.f32 %v492_v14, %v454_v25  ;;  %v4322_v47 = vld [vmem:[%s6061_s1 + $0x98] sm:$0xff]  ;;  %v388_v49 = vmul.f32 %v3009_v28, %v4231_v55  ;;  %v645_v53 = vmul.f32 %v4308_v33, %v3010_v41  ;;  %v4331_v54 = vld [vmem:[%s6061_s1 + $0xa0] sm:$0xff]  ;;  %6346 = vst [vmem:[#allocation26_spill] sm:$0xff] %v4336_v57  ;;  %v4343_v60 = vld [vmem:[%s6061_s1 + $0xb0] sm:$0xff] }
  0x31   : > { %1778 = vmatpush1.bf16.msra.mxu0 %v3722_v29  ;;  %1891 = vmatpush1.bf16.msra.mxu1 %v3723_v30  ;;  %v593_v29 = vmul.f32 %v4287_v20, %v2991_v19  ;;  %v4303_v30 = vld [vmem:[%s6061_s1 + $0x80] sm:$0xff]  ;;  %6344 = vst [vmem:[#allocation24_spill] sm:$0xff] %v4322_v47  ;;  %6345 = vst [vmem:[#allocation25_spill] sm:$0xff] %v4331_v54  ;;  %v695_v59 = vmul.f32 %v4315_v42, %v3027_v44  ;;  %v4348_v63 = vld [vmem:[%s6061_s1 + $0xb8] sm:$0xff] }
  0x32   : > { %1779 = vmatprep.subr.bf16.mxu0 %v3724_v34  ;;  %1892 = vmatprep.subr.bf16.mxu1 %v3726_v35  ;;  %6341 = vst [vmem:[#allocation21_spill] sm:$0xff] %v4303_v30  ;;  %v302_v34 = vadd.f32 %v286_v22, %v235_v11  ;;  %v303_v35 = vadd.f32 %v287_v23, %v236_v17  ;;  %v3028_v58 = vld [vmem:[%s4152_s9 + $0x24] sm:$0xff]  ;;  %6347 = vst [vmem:[#allocation27_spill] sm:$0xff] %v4343_v60  ;;  %v4353_v9 = vld [vmem:[%s4152_s9 + $0x30] sm:$0xff] }
  0x33   : > { %v644_v52 = vmul.f32 %v4303_v30, %v3009_v28  ;;  %6348 = vst [vmem:[#allocation28_spill] sm:$0xff] %v4348_v63  ;;  %v389_v3 = vmul.f32 %v3010_v41, %v4236_v56  ;;  %v696_v8 = vmul.f32 %v4322_v47, %v3028_v58  ;;  %6349 = vst [vmem:[#allocation29_spill] sm:$0xff] %v4353_v9  ;;  %v4356_v10 = vld [vmem:[%s4152_s9 + $0x38] sm:$0xff]  ;;  %v4361_v11 = vld [vmem:[%s6061_s1 + $0xc0] sm:$0xff] }
  0x34   : > { %v353_v0 = vadd.f32 %v337_v43, %v302_v34  ;;  %v354_v1 = vadd.f32 %v338_v48, %v303_v35  ;;  %6350 = vst [vmem:[#allocation30_spill] sm:$0xff] %v4356_v10  ;;  %6351 = vst [vmem:[#allocation31_spill] sm:$0xff] %v4361_v11  ;;  %v439_v12 = vmul.f32 %v3027_v44, %v4245_v61  ;;  %v4369_v17 = vld [vmem:[%s4152_s9 + $0x31] sm:$0xff]  ;;  %v4377_v19 = vld [vmem:[%s6061_s1 + $0xc8] sm:$0xff] }
  0x35   : > { %1780 = vmatpush1.bf16.msra.mxu0 %v3728_v50  ;;  %1893 = vmatpush1.bf16.msra.mxu1 %v3729_v51  ;;  %v558_v50 = vadd.f32 %v542_v18, %v507_v36  ;;  %v559_v51 = vadd.f32 %v543_v26, %v508_v37  ;;  %v749_v13 = vmul.f32 %v4331_v54, %v4353_v9  ;;  %v4372_v18 = vld [vmem:[%s4152_s9 + $0x39] sm:$0xff]  ;;  %v4449_v2 = vld [vmem:[%s4152_s9 + $0x48] sm:$0xff]  ;;  %v4486_v55 = vld [vmem:[%s4152_s9 + $0x51] sm:$0xff] }
  0x36   : > { %v750_v14 = vmul.f32 %v4336_v57, %v4356_v10  ;;  %6352 = vst [vmem:[#allocation32_spill] sm:$0xff] %v4369_v17  ;;  %6353 = vst [vmem:[#allocation33_spill] sm:$0xff] %v4372_v18  ;;  %v404_v22 = vadd.f32 %v388_v49, %v353_v0  ;;  %v405_v23 = vadd.f32 %v389_v3, %v354_v1  ;;  %v4384_v28 = vld [vmem:[%s4152_s9 + $0x32] sm:$0xff]  ;;  %v4397_v35 = vld [vmem:[%s4152_s9 + $0x3a] sm:$0xff] }
  0x37   : > { %v609_v4 = vadd.f32 %v593_v29, %v558_v50  ;;  %v610_v6 = vadd.f32 %v594_v38, %v559_v51  ;;  %6354 = vst [vmem:[#allocation34_spill] sm:$0xff] %v4377_v19  ;;  %v800_v26 = vmul.f32 %v4343_v60, %v4369_v17  ;;  %v801_v27 = vmul.f32 %v4348_v63, %v4372_v18  ;;  %v4389_v29 = vld [vmem:[%s6061_s1 + $0xd0] sm:$0xff]  ;;  %v4394_v34 = vld [vmem:[%s6061_s1 + $0xd8] sm:$0xff]  ;;  %v4404_v37 = vld [vmem:[%s6061_s1 + $0xe0] sm:$0xff] }
  0x38   : > { %6355 = vst [vmem:[#allocation35_spill] sm:$0xff] %v4384_v28  ;;  %6356 = vst [vmem:[#allocation36_spill] sm:$0xff] %v4389_v29  ;;  %v851_v36 = vmul.f32 %v4361_v11, %v4384_v28  ;;  %v4409_v38 = vld [vmem:[%s6061_s1 + $0xe8] sm:$0xff]  ;;  %v440_v41 = vmul.f32 %v3028_v58, %v4250_v62  ;;  %v455_v43 = vadd.f32 %v439_v12, %v404_v22  ;;  %v4417_v51 = vld [vmem:[%s4152_s9 + $0x33] sm:$0xff] }
  0x39   : > { %v660_v24 = vadd.f32 %v644_v52, %v609_v4  ;;  %v661_v25 = vadd.f32 %v645_v53, %v610_v6  ;;  %6357 = vst [vmem:[#allocation37_spill] sm:$0xff] %v4394_v34  ;;  %6358 = vst [vmem:[#allocation38_spill] sm:$0xff] %v4397_v35  ;;  %v493_v44 = vmul.f32 %v4353_v9, %v4258_v5  ;;  %v4420_v52 = vld [vmem:[%s4152_s9 + $0x3b] sm:$0xff]  ;;  %v4425_v53 = vld [vmem:[%s6061_s1 + $0xf0] sm:$0xff] }
  0x3a   : > { %6359 = vst [vmem:[#allocation39_spill] sm:$0xff] %v4404_v37  ;;  %6360 = vst [vmem:[#allocation40_spill] sm:$0xff] %v4409_v38  ;;  %v852_v50 = vmul.f32 %v4377_v19, %v4397_v35  ;;  %v494_v58 = vmul.f32 %v4356_v10, %v4264_v7  ;;  %v903_v0 = vmul.f32 %v4394_v34, %v4420_v52  ;;  %v4434_v1 = vld [vmem:[%s4152_s9 + $0x34] sm:$0xff]  ;;  %v4437_v3 = vld [vmem:[%s4152_s9 + $0x3c] sm:$0xff] }
  0x3b   : > { %v711_v48 = vadd.f32 %v695_v59, %v660_v24  ;;  %v712_v49 = vadd.f32 %v696_v8, %v661_v25  ;;  %6361 = vst [vmem:[#allocation41_spill] sm:$0xff] %v4417_v51  ;;  %6362 = vst [vmem:[#allocation42_spill] sm:$0xff] %v4420_v52  ;;  %v902_v59 = vmul.f32 %v4389_v29, %v4417_v51  ;;  %v4442_v4 = vld [vmem:[%s6061_s1 + $0xf8] sm:$0xff]  ;;  %v4454_v7 = vld [vmem:[%s6061_s1 + $0x100] sm:$0xff] }
  0x3c   : > { %6363 = vst [vmem:[#allocation43_spill] sm:$0xff] %v4425_v53  ;;  %6364 = vst [vmem:[#allocation44_spill] sm:$0xff] %v4434_v1  ;;  %v456_v6 = vadd.f32 %v440_v41, %v405_v23  ;;  %v509_v8 = vadd.f32 %v493_v44, %v455_v43  ;;  %v953_v24 = vmul.f32 %v4404_v37, %v4434_v1  ;;  %v4469_v41 = vld [vmem:[%s6061_s1 + $0x110] sm:$0xff]  ;;  %v4474_v43 = vld [vmem:[%s6061_s1 + $0x118] sm:$0xff] }
  0x3d   : > { %6365 = vst [vmem:[#allocation45_spill] sm:$0xff] %v4437_v3  ;;  %6366 = vst [vmem:[#allocation46_spill] sm:$0xff] %v4442_v4  ;;  %v765_v12 = vadd.f32 %v749_v13, %v711_v48  ;;  %v766_v22 = vadd.f32 %v750_v14, %v712_v49  ;;  %v954_v25 = vmul.f32 %v4409_v38, %v4437_v3  ;;  %v4459_v13 = vld [vmem:[%s6061_s1 + $0x108] sm:$0xff]  ;;  %v4462_v14 = vld [vmem:[%s4152_s9 + $0x50] sm:$0xff] }
  0x3e   : > { %6367 = vst [vmem:[#allocation47_spill] sm:$0xff] %v4449_v2  ;;  %6368 = vst [vmem:[#allocation48_spill] sm:$0xff] %v4454_v7  ;;  %v1007_v23 = vmul.f32 %v4425_v53, %v4449_v2  ;;  %v510_v44 = vadd.f32 %v494_v58, %v456_v6  ;;  %v544_v48 = vmul.f32 %v4369_v17, %v4274_v15  ;;  %v4483_v56 = vld [vmem:[%s4152_s9 + $0x49] sm:$0xff]  ;;  %v4491_v58 = vld [vmem:[%s6061_s1 + $0x120] sm:$0xff] }
  0x3f   : > { %6369 = vst [vmem:[#allocation49_spill] sm:$0xff] %v4459_v13  ;;  %6370 = vst [vmem:[#allocation50_spill] sm:$0xff] %v4469_v41  ;;  %v545_v49 = vmul.f32 %v4372_v18, %v4279_v16  ;;  %v816_v5 = vadd.f32 %v800_v26, %v765_v12  ;;  %v817_v62 = vadd.f32 %v801_v27, %v766_v22  ;;  %v4500_v12 = vld [vmem:[%s4152_s9 + $0x4a] sm:$0xff]  ;;  %v4503_v22 = vld [vmem:[%s4152_s9 + $0x52] sm:$0xff] }
  0x40   : > { %6371 = vst [vmem:[#allocation51_spill] sm:$0xff] %v4474_v43  ;;  %v1008_v61 = vmul.f32 %v4442_v4, %v4462_v14  ;;  %6372 = vst [vmem:[#allocation52_spill] sm:$0xff] %v4491_v58  ;;  %v595_v6 = vmul.f32 %v4384_v28, %v4287_v20  ;;  %v1058_v26 = vmul.f32 %v4454_v7, %v4483_v56  ;;  %v4508_v16 = vld [vmem:[%s6061_s1 + $0x128] sm:$0xff]  ;;  %v4520_v17 = vld [vmem:[%s6061_s1 + $0x130] sm:$0xff] }
  0x41   : > { %v1059_v27 = vmul.f32 %v4459_v13, %v4486_v55  ;;  %6373 = vst [vmem:[#allocation53_spill] sm:$0xff] %v4500_v12  ;;  %6374 = vst [vmem:[#allocation54_spill] sm:$0xff] %v4503_v22  ;;  %v560_v15 = vadd.f32 %v544_v48, %v509_v8  ;;  %v561_v46 = vadd.f32 %v545_v49, %v510_v44  ;;  %v4515_v40 = vld [vmem:[%s4152_s9 + $0x4b] sm:$0xff]  ;;  %v4554_v31 = vld [vmem:[%s4152_s9 + $0x54] sm:$0xff] }
  0x42   : > { %6375 = vst [vmem:[#allocation55_spill] sm:$0xff] %v4508_v16  ;;  %v867_v45 = vadd.f32 %v851_v36, %v816_v5  ;;  %v868_v18 = vadd.f32 %v852_v50, %v817_v62  ;;  %v1109_v20 = vmul.f32 %v4469_v41, %v4500_v12  ;;  %v1110_v28 = vmul.f32 %v4474_v43, %v4503_v22  ;;  %v4525_v5 = vld [vmem:[%s6061_s1 + $0x138] sm:$0xff]  ;;  %v4537_v50 = vld [vmem:[%s6061_s1 + $0x140] sm:$0xff]  ;;  %v4542_v8 = vld [vmem:[%s6061_s1 + $0x148] sm:$0xff] }
  0x43   : > { %6376 = vst [vmem:[#allocation56_spill] sm:$0xff] %v4520_v17  ;;  %6377 = vst [vmem:[#allocation57_spill] sm:$0xff] %v4525_v5  ;;  %v4528_v62 = vld [vmem:[%s4152_s9 + $0x53] sm:$0xff]  ;;  %v4532_v36 = vmul.f32 %v4491_v58, %v4515_v40  ;;  %v596_v44 = vmul.f32 %v4397_v35, %v4292_v21  ;;  %v611_v48 = vadd.f32 %v595_v6, %v560_v15 }
  0x44   : > { %6378 = vst [vmem:[#allocation58_spill] sm:$0xff] %v4537_v50  ;;  %6379 = vst [vmem:[#allocation59_spill] sm:$0xff] %v4542_v8  ;;  %v646_v49 = vmul.f32 %v4417_v51, %v4303_v30  ;;  %v918_v39 = vadd.f32 %v902_v59, %v867_v45  ;;  %v919_v10 = vadd.f32 %v903_v0, %v868_v18  ;;  %v4551_v9 = vld [vmem:[%s4152_s9 + $0x4c] sm:$0xff]  ;;  %v4568_v59 = vld [vmem:[%s4152_s9 + $0x60] sm:$0xff] }
  0x45   : > { %v1161_v32 = vmul.f32 %v4508_v16, %v4528_v62  ;;  %v4559_v58 = vld [vmem:[%s6061_s1 + $0x150] sm:$0xff]  ;;  %v647_v15 = vmul.f32 %v4420_v52, %v4308_v33  ;;  %v1211_v45 = vmul.f32 %v4520_v17, %v4551_v9  ;;  %v1212_v18 = vmul.f32 %v4525_v5, %v4554_v31  ;;  %v4571_v0 = vld [vmem:[%s4152_s9 + $0x68] sm:$0xff]  ;;  %v4576_v6 = vld [vmem:[%s6061_s1 + $0x158] sm:$0xff] }
  0x46   : > { %6380 = vst [vmem:[#allocation60_spill] sm:$0xff] %v4559_v58  ;;  %6381 = vst [vmem:[#allocation61_spill] sm:$0xff] %v4576_v6  ;;  %v612_v30 = vadd.f32 %v596_v44, %v561_v46  ;;  %v662_v21 = vadd.f32 %v646_v49, %v611_v48  ;;  %v969_v51 = vadd.f32 %v953_v24, %v918_v39  ;;  %v4583_v5 = vld [vmem:[%s4152_s9 + $0x61] sm:$0xff]  ;;  %v4596_v39 = vld [vmem:[%s4152_s9 + $0x69] sm:$0xff] }
  0x47   : > { %v970_v33 = vadd.f32 %v954_v25, %v919_v10  ;;  %v1265_v52 = vmul.f32 %v4537_v50, %v4568_v59  ;;  %v1266_v35 = vmul.f32 %v4542_v8, %v4571_v0  ;;  %v4588_v17 = vld [vmem:[%s6061_s1 + $0x160] sm:$0xff]  ;;  %v4593_v46 = vld [vmem:[%s6061_s1 + $0x168] sm:$0xff]  ;;  %v1316_v10 = vmul.f32 %v4559_v58, %v4583_v5 }
  0x48   : > { %6382 = vst [vmem:[#allocation62_spill] sm:$0xff] %v4588_v17  ;;  %6383 = vst [vmem:[#allocation63_spill] sm:$0xff] %v4593_v46  ;;  %v663_v24 = vadd.f32 %v647_v15, %v612_v30  ;;  %v697_v25 = vmul.f32 %v4434_v1, %v4315_v42  ;;  %v698_v44 = vmul.f32 %v4437_v3, %v4322_v47  ;;  %v4607_v50 = vld [vmem:[%s4152_s9 + $0x62] sm:$0xff]  ;;  %v4610_v16 = vld [vmem:[%s4152_s9 + $0x6a] sm:$0xff] }
  0x49   : > { %v1023_v48 = vadd.f32 %v1007_v23, %v969_v51  ;;  %v1024_v49 = vadd.f32 %v1008_v61, %v970_v33  ;;  %v1317_v8 = vmul.f32 %v4576_v6, %v4596_v39  ;;  %v4615_v30 = vld [vmem:[%s6061_s1 + $0x170] sm:$0xff]  ;;  %v751_v15 = vmul.f32 %v4449_v2, %v4331_v54  ;;  %v4624_v3 = vld [vmem:[%s4152_s9 + $0x63] sm:$0xff]  ;;  %v4629_v1 = vld [vmem:[%s6061_s1 + $0x178] sm:$0xff] }
  0x4a   : > { %6384 = vst [vmem:[#allocation64_spill] sm:$0xff] %v4615_v30  ;;  %v1367_v47 = vmul.f32 %v4588_v17, %v4607_v50  ;;  %v1368_v61 = vmul.f32 %v4593_v46, %v4610_v16  ;;  %v713_v33 = vadd.f32 %v697_v25, %v662_v21  ;;  %v714_v51 = vadd.f32 %v698_v44, %v663_v24  ;;  %v4634_v54 = vld [vmem:[%s6061_s1 + $0x180] sm:$0xff] }
  0x4b   : > { %v1074_v23 = vadd.f32 %v1058_v26, %v1023_v48  ;;  %v1075_v42 = vadd.f32 %v1059_v27, %v1024_v49  ;;  %6385 = vst [vmem:[#allocation65_spill] sm:$0xff] %v4629_v1  ;;  %6386 = vst [vmem:[#allocation66_spill] sm:$0xff] %v4634_v54  ;;  %v752_v2 = vmul.f32 %v4462_v14, %v4336_v57  ;;  %v4647_v49 = vld [vmem:[%s4152_s9 + $0x6b] sm:$0xff] }
  0x4c   : > { %v802_v21 = vmul.f32 %v4483_v56, %v4343_v60  ;;  %v1418_v26 = vmul.f32 %v4615_v30, %v4624_v3  ;;  %v767_v27 = vadd.f32 %v751_v15, %v713_v33  ;;  %v803_v24 = vmul.f32 %v4486_v55, %v4348_v63  ;;  %v4650_v46 = vld [vmem:[%s4152_s9 + $0x64] sm:$0xff]  ;;  %v4667_v63 = vld [vmem:[%s4152_s9 + $0x6c] sm:$0xff] }
  0x4d   : > { %v853_v25 = vmul.f32 %v4500_v12, %v4361_v11  ;;  %v1125_v44 = vadd.f32 %v1109_v20, %v1074_v23  ;;  %v1126_v48 = vadd.f32 %v1110_v28, %v1075_v42  ;;  %v4655_v60 = vld [vmem:[%s6061_s1 + $0x188] sm:$0xff]  ;;  %v768_v57 = vadd.f32 %v752_v2, %v714_v51  ;;  %6388 = vst [vmem:[#allocation68_spill] sm:$0xff] %v4667_v63 }
  0x4e   : > { %6387 = vst [vmem:[#allocation67_spill] sm:$0xff] %v4655_v60  ;;  %v854_v15 = vmul.f32 %v4503_v22, %v4377_v19  ;;  %v1419_v33 = vmul.f32 %v4629_v1, %v4647_v49  ;;  %v1469_v20 = vmul.f32 %v4634_v54, %v4650_v46  ;;  %v818_v42 = vadd.f32 %v802_v21, %v767_v27 }
  0x4f   : > { %v904_v28 = vmul.f32 %v4515_v40, %v4389_v29  ;;  %v1176_v23 = vadd.f32 %v4532_v36, %v1125_v44  ;;  %v1177_v11 = vadd.f32 %v1161_v32, %v1126_v48  ;;  %v819_v12 = vadd.f32 %v803_v24, %v768_v57 }
  0x50   : > { %v905_v2 = vmul.f32 %v4528_v62, %v4394_v34  ;;  %v1470_v51 = vmul.f32 %v4655_v60, %v4667_v63  ;;  %v869_v19 = vadd.f32 %v853_v25, %v818_v42  ;;  %v955_v22 = vmul.f32 %v4551_v9, %v4404_v37 }
  0x51   : > { %v956_v21 = vmul.f32 %v4554_v31, %v4409_v38  ;;  %v1227_v27 = vadd.f32 %v1211_v45, %v1176_v23  ;;  %v1228_v29 = vadd.f32 %v1212_v18, %v1177_v11  ;;  %v870_v36 = vadd.f32 %v854_v15, %v819_v12  ;;  %v6389_v18 = vld [vmem:[#allocation52_spill] sm:$0xff] }
  0x52   : > { %v1009_v32 = vmul.f32 %v4568_v59, %v4425_v53  ;;  %v920_v57 = vadd.f32 %v904_v28, %v869_v19  ;;  %v1010_v24 = vmul.f32 %v4571_v0, %v4442_v4  ;;  %v1060_v25 = vmul.f32 %v4583_v5, %v4454_v7  ;;  %v6390_v28 = vld [vmem:[#allocation55_spill] sm:$0xff]  ;;  %v6405_v4 = vld [vmem:[#allocation30_spill] sm:$0xff]  ;;  %v6409_v53 = vld [vmem:[#allocation33_spill] sm:$0xff] }
  0x53   : > { %v1061_v44 = vmul.f32 %v4596_v39, %v4459_v13  ;;  %v1281_v48 = vadd.f32 %v1265_v52, %v1227_v27  ;;  %v1282_v42 = vadd.f32 %v1266_v35, %v1228_v29  ;;  %v921_v45 = vadd.f32 %v905_v2, %v870_v36  ;;  %v6391_v35 = vld [vmem:[#allocation56_spill] sm:$0xff]  ;;  %v6403_v13 = vld [vmem:[#allocation29_spill] sm:$0xff] }
  0x54   : > { %v1111_v11 = vmul.f32 %v4607_v50, %v4469_v41  ;;  %v971_v12 = vadd.f32 %v955_v22, %v920_v57  ;;  %v1112_v19 = vmul.f32 %v4610_v16, %v4474_v43  ;;  %v1162_v15 = vmul.f32 %v4624_v3, %v6389_v18  ;;  %v4696_v27 = vld [vmem:[%s4152_s9 + $0x78] sm:$0xff]  ;;  %v4699_v22 = vld [vmem:[%s4152_s9 + $0x80] sm:$0xff]  ;;  %v6395_v43 = vld [vmem:[#allocation58_spill] sm:$0xff] }
  0x55   : > { %v1163_v23 = vmul.f32 %v4647_v49, %v6390_v28  ;;  %v1332_v7 = vadd.f32 %v1316_v10, %v1281_v48  ;;  %v1333_v52 = vadd.f32 %v1317_v8, %v1282_v42  ;;  %v972_v29 = vadd.f32 %v956_v21, %v921_v45  ;;  %6392 = vst [vmem:[#allocation69_spill] sm:$0xff] %v4696_v27  ;;  %v6394_v57 = vld [vmem:[#allocation57_spill] sm:$0xff]  ;;  %v6396_v10 = vld [vmem:[#allocation59_spill] sm:$0xff] }
  0x56   : > { %v1213_v2 = vmul.f32 %v4650_v46, %v6391_v35  ;;  %6393 = vst [vmem:[#allocation70_spill] sm:$0xff] %v4699_v22  ;;  %v1025_v36 = vadd.f32 %v1009_v32, %v971_v12  ;;  %v1214_v18 = vmul.f32 %v4667_v63, %v6394_v57  ;;  %v1267_v41 = vmul.f32 %v6395_v43, %v4696_v27  ;;  %v4708_v8 = vld [vmem:[%s4152_s9 + $0x79] sm:$0xff]  ;;  %v4711_v35 = vld [vmem:[%s4152_s9 + $0x81] sm:$0xff] }
  0x57   : > { %v1268_v48 = vmul.f32 %v6396_v10, %v4699_v22  ;;  %6397 = vst [vmem:[#allocation71_spill] sm:$0xff] %v4708_v8  ;;  %v1383_v21 = vadd.f32 %v1367_v47, %v1332_v7  ;;  %v1384_v42 = vadd.f32 %v1368_v61, %v1333_v52  ;;  %v1026_v45 = vadd.f32 %v1010_v24, %v972_v29  ;;  %v4716_v32 = vld [vmem:[%s4152_s9 + $0x7a] sm:$0xff]  ;;  %v4719_v12 = vld [vmem:[%s4152_s9 + $0x82] sm:$0xff]  ;;  %v6401_v7 = vld [vmem:[#allocation63_spill] sm:$0xff] }
  0x58   : > { %6398 = vst [vmem:[#allocation72_spill] sm:$0xff] %v4711_v35  ;;  %v1318_v28 = vmul.f32 %v4559_v58, %v4708_v8  ;;  %6399 = vst [vmem:[#allocation73_spill] sm:$0xff] %v4716_v32  ;;  %v1076_v57 = vadd.f32 %v1060_v25, %v1025_v36  ;;  %v1319_v43 = vmul.f32 %v4576_v6, %v4711_v35  ;;  %v6402_v29 = vld [vmem:[#allocation5_spill] sm:$0xff]  ;;  %v6404_v22 = vld [vmem:[#allocation6_spill] sm:$0xff] }
  0x59   : > { %6400 = vst [vmem:[#allocation74_spill] sm:$0xff] %v4719_v12  ;;  %v1369_v10 = vmul.f32 %v4588_v17, %v4716_v32  ;;  %v1370_v47 = vmul.f32 %v6401_v7, %v4719_v12  ;;  %v1434_v61 = vadd.f32 %v1418_v26, %v1383_v21  ;;  %v1435_v24 = vadd.f32 %v1419_v33, %v1384_v42  ;;  %v6406_v25 = vld [vmem:[#allocation7_spill] sm:$0xff]  ;;  %v6407_v36 = vld [vmem:[#allocation32_spill] sm:$0xff]  ;;  %v6410_v26 = vld [vmem:[#allocation9_spill] sm:$0xff] }
  0x5a   : > { %v1077_v52 = vadd.f32 %v1061_v44, %v1026_v45  ;;  %v237_v58 = vmul.f32 %v6403_v13, %v6402_v29  ;;  %v1127_v8 = vadd.f32 %v1111_v11, %v1076_v57  ;;  %v238_v27 = vmul.f32 %v6405_v4, %v6404_v22  ;;  %v6408_v35 = vld [vmem:[#allocation8_spill] sm:$0xff]  ;;  %v6411_v33 = vld [vmem:[#allocation35_spill] sm:$0xff]  ;;  %v6412_v11 = vld [vmem:[#allocation10_spill] sm:$0xff] }
  0x5b   : > { %v288_v6 = vmul.f32 %v6407_v36, %v6406_v25  ;;  %v289_v17 = vmul.f32 %v6409_v53, %v6408_v35  ;;  %v1485_v32 = vadd.f32 %v1469_v20, %v1434_v61  ;;  %v1486_v63 = vadd.f32 %v1470_v51, %v1435_v24  ;;  %v6413_v57 = vld [vmem:[#allocation38_spill] sm:$0xff]  ;;  %v6415_v22 = vld [vmem:[#allocation11_spill] sm:$0xff]  ;;  %v6416_v36 = vld [vmem:[#allocation41_spill] sm:$0xff] }
  0x5c   : > { %v1128_v7 = vadd.f32 %v1112_v19, %v1077_v52  ;;  %v339_v44 = vmul.f32 %v6411_v33, %v6410_v26  ;;  %v1178_v21 = vadd.f32 %v1162_v15, %v1127_v8  ;;  %v340_v45 = vmul.f32 %v6413_v57, %v6412_v11  ;;  %v6417_v29 = vld [vmem:[#allocation12_spill] sm:$0xff]  ;;  %v6418_v53 = vld [vmem:[#allocation42_spill] sm:$0xff]  ;;  %v6419_v15 = vld [vmem:[#allocation13_spill] sm:$0xff] }
  0x5d   : > { %v304_v42 = vadd.f32 %v288_v6, %v237_v58  ;;  %v305_v13 = vadd.f32 %v289_v17, %v238_v27  ;;  %v4739_v4 = vpack.c.bf16 %v1486_v63, %v1485_v32  ;;  %v390_v25 = vmul.f32 %v6416_v36, %v6415_v22  ;;  %v4746_v19 = vld [vmem:[%s4152_s9 + $0x7b] sm:$0xff]  ;;  %v6421_v6 = vld [vmem:[#allocation14_spill] sm:$0xff]  ;;  %v6423_v8 = vld [vmem:[#allocation15_spill] sm:$0xff] }
  0x5e   : > { %v1179_v12 = vadd.f32 %v1163_v23, %v1128_v7  ;;  %v391_v20 = vmul.f32 %v6418_v53, %v6417_v29  ;;  %v1229_v51 = vadd.f32 %v1213_v2, %v1178_v21  ;;  %v6420_v58 = vld [vmem:[#allocation44_spill] sm:$0xff]  ;;  %v6422_v23 = vld [vmem:[#allocation45_spill] sm:$0xff]  ;;  %v6424_v32 = vld [vmem:[#allocation47_spill] sm:$0xff]  ;;  %v6425_v7 = vmov 0  }
  0x5f   : > { %6414 = vst [vmem:[#allocation29_spill] sm:$0xff] %v4739_v4  ;;  %v355_v61 = vadd.f32 %v339_v44, %v304_v42  ;;  %v356_v24 = vadd.f32 %v340_v45, %v305_v13  ;;  %v441_v17 = vmul.f32 %v6420_v58, %v6419_v15  ;;  %1798 = vmatmul.mubr.bf16.vlgmr.msra.gmra.mxu0 %v4739_v4  ;;  %v6426_v13 = vld [vmem:[#allocation16_spill] sm:$0xff]  ;;  %v4765_v36 = vld [vmem:[%s4152_s9 + $0x83] sm:$0xff] }
  0x60   : > { %1911 = vmatmul.mubr.bf16.vlgmr.msra.gmra.mxu1 %v4739_v4  ;;  %v1230_v63 = vadd.f32 %v1214_v18, %v1179_v12  ;;  %v442_v27 = vmul.f32 %v6422_v23, %v6421_v6  ;;  %v495_v2 = vmul.f32 %v6424_v32, %v6423_v8  ;;  %1807 = vmatprep.mubr.bf16.mxu0 %v6425_v7  ;;  %v6427_v12 = vld [vmem:[#allocation17_spill] sm:$0xff] }
  0x61   : > { %1920 = vmatprep.mubr.bf16.mxu1 %v6425_v7  ;;  %v1283_v52 = vadd.f32 %v1267_v41, %v1229_v51  ;;  %v406_v33 = vadd.f32 %v390_v25, %v355_v61  ;;  %v407_v44 = vadd.f32 %v391_v20, %v356_v24  ;;  %v1420_v42 = vmul.f32 %v4615_v30, %v4746_v19  ;;  %v4768_v53 = vld [vmem:[%s4152_s9 + $0x7c] sm:$0xff]  ;;  %v6428_v25 = vld [vmem:[#allocation18_spill] sm:$0xff]  ;;  %v6429_v24 = vld [vmem:[#allocation19_spill] sm:$0xff] }
  0x62   : > { %v1284_v21 = vadd.f32 %v1268_v48, %v1230_v63  ;;  %v496_v18 = vmul.f32 %v4462_v14, %v6426_v13  ;;  %v546_v57 = vmul.f32 %v4483_v56, %v6427_v12  ;;  %v547_v20 = vmul.f32 %v4486_v55, %v6428_v25  ;;  %v6430_v63 = vld [vmem:[#allocation53_spill] sm:$0xff]  ;;  %v6434_v13 = vld [vmem:[#allocation22_spill] sm:$0xff] }
  0x63   : > { %v1334_v45 = vadd.f32 %v1318_v28, %v1283_v52  ;;  %v457_v58 = vadd.f32 %v441_v17, %v406_v33  ;;  %v458_v41 = vadd.f32 %v442_v27, %v407_v44  ;;  %v1421_v51 = vmul.f32 %v4629_v1, %v4765_v36  ;;  %v4779_v52 = vld [vmem:[%s4152_s9 + $0x84] sm:$0xff]  ;;  %v6431_v17 = vld [vmem:[#allocation20_spill] sm:$0xff] }
  0x64   : > { %v1335_v48 = vadd.f32 %v1319_v43, %v1284_v21  ;;  %v1471_v61 = vmul.f32 %v4634_v54, %v4768_v53  ;;  %v597_v23 = vmul.f32 %v6430_v63, %v6429_v24  ;;  %v6432_v27 = vld [vmem:[#allocation54_spill] sm:$0xff]  ;;  %v1472_v43 = vmul.f32 %v4655_v60, %v4779_v52  ;;  %v6433_v21 = vld [vmem:[#allocation21_spill] sm:$0xff]  ;;  %v6435_v24 = vld [vmem:[#allocation23_spill] sm:$0xff] }
  0x65   : > { %v1385_v28 = vadd.f32 %v1369_v10, %v1334_v45  ;;  %v511_v4 = vadd.f32 %v495_v2, %v457_v58  ;;  %v512_v30 = vadd.f32 %v496_v18, %v458_v41  ;;  %v598_v33 = vmul.f32 %v6432_v27, %v6431_v17 }
  0x66   : > { %v1386_v44 = vadd.f32 %v1370_v47, %v1335_v48  ;;  %v648_v1 = vmul.f32 %v4515_v40, %v6433_v21  ;;  %v649_v10 = vmul.f32 %v4528_v62, %v6434_v13  ;;  %v699_v2 = vmul.f32 %v4551_v9, %v6435_v24  ;;  %v6436_v47 = vld [vmem:[#allocation24_spill] sm:$0xff]  ;;  %v6437_v21 = vld [vmem:[#allocation25_spill] sm:$0xff] }
  0x67   : > { %v1436_v25 = vadd.f32 %v1420_v42, %v1385_v28  ;;  %v562_v54 = vadd.f32 %v546_v57, %v511_v4  ;;  %v563_v12 = vadd.f32 %v547_v20, %v512_v30  ;;  %v700_v48 = vmul.f32 %v4554_v31, %v6436_v47  ;;  %v6438_v30 = vld [vmem:[#allocation26_spill] sm:$0xff]  ;;  %v6440_v28 = vld [vmem:[#allocation27_spill] sm:$0xff] }
  0x68   : > { %v1437_v45 = vadd.f32 %v1421_v51, %v1386_v44  ;;  %v753_v4 = vmul.f32 %v4568_v59, %v6437_v21  ;;  %v754_v42 = vmul.f32 %v4571_v0, %v6438_v30  ;;  %v6456_v30 = vld [vmem:[#allocation5_spill] sm:$0xff] }
  0x69   : > { %v1487_v18 = vadd.f32 %v1471_v61, %v1436_v25  ;;  %v613_v58 = vadd.f32 %v597_v23, %v562_v54  ;;  %v614_v41 = vadd.f32 %v598_v33, %v563_v12  ;;  %v804_v54 = vmul.f32 %v4583_v5, %v6440_v28  ;;  %v6441_v12 = vld [vmem:[#allocation28_spill] sm:$0xff]  ;;  %v6455_v28 = vld [vmem:[#allocation73_spill] sm:$0xff] }
  0x6a   : > { %v1488_v60 = vadd.f32 %v1472_v43, %v1437_v45  ;;  %v805_v25 = vmul.f32 %v4596_v39, %v6441_v12  ;;  %v6444_v33 = vld [vmem:[#allocation36_spill] sm:$0xff]  ;;  %v907_v43 = vmul.f32 %v4647_v49, %v4394_v34  ;;  %v6454_v12 = vld [vmem:[#allocation50_spill] sm:$0xff] }
  0x6b   : > { %v664_v17 = vadd.f32 %v648_v1, %v613_v58  ;;  %v665_v8 = vadd.f32 %v649_v10, %v614_v41  ;;  %v6442_v1 = vld [vmem:[#allocation31_spill] sm:$0xff]  ;;  %v906_v44 = vmul.f32 %v4624_v3, %v6444_v33  ;;  %v957_v10 = vmul.f32 %v4650_v46, %v4404_v37  ;;  %v6445_v45 = vld [vmem:[#allocation68_spill] sm:$0xff] }
  0x6c   : > { %v4797_v57 = vpack.c.bf16 %v1488_v60, %v1487_v18  ;;  %v855_v61 = vmul.f32 %v4607_v50, %v6442_v1  ;;  %v6446_v41 = vld [vmem:[#allocation43_spill] sm:$0xff]  ;;  %v6453_v1 = vld [vmem:[#allocation72_spill] sm:$0xff]  ;;  %v1113_v37 = vmul.f32 %v6455_v28, %v6454_v12  ;;  %v341_v12 = vmul.f32 %v6430_v63, %v6410_v26 }
  0x6d   : > { %v715_v20 = vadd.f32 %v699_v2, %v664_v17  ;;  %v716_v51 = vadd.f32 %v700_v48, %v665_v8  ;;  %v6443_v8 = vld [vmem:[#allocation34_spill] sm:$0xff]  ;;  %v958_v2 = vmul.f32 %v6445_v45, %v4409_v38  ;;  %v6447_v48 = vld [vmem:[#allocation69_spill] sm:$0xff]  ;;  %v239_v38 = vmul.f32 %v6424_v32, %v6456_v30 }
  0x6e   : > { %6439 = vst [vmem:[#allocation30_spill] sm:$0xff] %v4797_v57  ;;  %1808 = vmatmul.mubr.bf16.gmra.mxu0 %v4797_v57  ;;  %1921 = vmatmul.mubr.bf16.gmra.mxu1 %v4797_v57  ;;  %v856_v17 = vmul.f32 %v4610_v16, %v6443_v8  ;;  %v6450_v57 = vld [vmem:[#allocation48_spill] sm:$0xff]  ;;  %v6452_v8 = vld [vmem:[#allocation49_spill] sm:$0xff]  ;;  %v342_v32 = vmul.f32 %v6432_v27, %v6412_v11 }
  0x6f   : > { %1817 = vmatprep.mubr.bf16.mxu0 %v6425_v7  ;;  %1930 = vmatprep.mubr.bf16.mxu1 %v6425_v7  ;;  %v769_v60 = vadd.f32 %v753_v4, %v715_v20  ;;  %v770_v23 = vadd.f32 %v754_v42, %v716_v51  ;;  %v1011_v4 = vmul.f32 %v6447_v48, %v6446_v41  ;;  %v6448_v42 = vld [vmem:[#allocation46_spill] sm:$0xff]  ;;  %v6451_v7 = vld [vmem:[#allocation71_spill] sm:$0xff] }
  0x70   : > { %v6449_v20 = vld [vmem:[#allocation70_spill] sm:$0xff]  ;;  %v1062_v33 = vmul.f32 %v6451_v7, %v6450_v57  ;;  %v1063_v34 = vmul.f32 %v6453_v1, %v6452_v8  ;;  %v6458_v41 = vld [vmem:[#allocation7_spill] sm:$0xff]  ;;  %v291_v8 = vmul.f32 %v4486_v55, %v6408_v35  ;;  %v393_v26 = vmul.f32 %v4528_v62, %v6417_v29 }
  0x71   : > { %v820_v18 = vadd.f32 %v804_v54, %v769_v60  ;;  %v821_v58 = vadd.f32 %v805_v25, %v770_v23  ;;  %v1012_v51 = vmul.f32 %v6449_v20, %v6448_v42  ;;  %v6457_v60 = vld [vmem:[#allocation6_spill] sm:$0xff]  ;;  %v290_v42 = vmul.f32 %v4483_v56, %v6458_v41  ;;  %v6459_v20 = vld [vmem:[#allocation51_spill] sm:$0xff]  ;;  %v6461_v56 = vld [vmem:[#allocation52_spill] sm:$0xff] }
  0x72   : > { %v240_v23 = vmul.f32 %v4462_v14, %v6457_v60  ;;  %v6460_v48 = vld [vmem:[#allocation74_spill] sm:$0xff]  ;;  %v392_v14 = vmul.f32 %v4515_v40, %v6415_v22  ;;  %v6464_v22 = vld [vmem:[#allocation57_spill] sm:$0xff]  ;;  %v4860_v29 = vld [vmem:[%s4152_s9 + $0x90] sm:$0xff] }
  0x73   : > { %v871_v54 = vadd.f32 %v855_v61, %v820_v18  ;;  %v872_v25 = vadd.f32 %v856_v17, %v821_v58  ;;  %v1114_v57 = vmul.f32 %v6460_v48, %v6459_v20  ;;  %v306_v17 = vadd.f32 %v290_v42, %v239_v38  ;;  %v6462_v58 = vld [vmem:[#allocation55_spill] sm:$0xff] }
  0x74   : > { %v1164_v18 = vmul.f32 %v4746_v19, %v6461_v56  ;;  %v1165_v55 = vmul.f32 %v4765_v36, %v6462_v58  ;;  %v307_v35 = vadd.f32 %v291_v8, %v240_v23  ;;  %v443_v38 = vmul.f32 %v4551_v9, %v6419_v15  ;;  %v6465_v9 = vld [vmem:[#allocation15_spill] sm:$0xff] }
  0x75   : > { %v922_v30 = vadd.f32 %v906_v44, %v871_v54  ;;  %v923_v61 = vadd.f32 %v907_v43, %v872_v25  ;;  %v357_v27 = vadd.f32 %v341_v12, %v306_v17  ;;  %v6463_v44 = vld [vmem:[#allocation56_spill] sm:$0xff]  ;;  %v1216_v43 = vmul.f32 %v4779_v52, %v6464_v22  ;;  %v6467_v25 = vld [vmem:[#allocation59_spill] sm:$0xff]  ;;  %v6470_v17 = vld [vmem:[#allocation17_spill] sm:$0xff] }
  0x76   : > { %v1215_v40 = vmul.f32 %v4768_v53, %v6463_v44  ;;  %v358_v41 = vadd.f32 %v342_v32, %v307_v35  ;;  %v444_v8 = vmul.f32 %v4554_v31, %v6421_v6  ;;  %v4863_v12 = vld [vmem:[%s4152_s9 + $0x98] sm:$0xff]  ;;  %v497_v15 = vmul.f32 %v4568_v59, %v6465_v9  ;;  %v6474_v9 = vld [vmem:[#allocation19_spill] sm:$0xff]  ;;  %v6488_v44 = vld [vmem:[#allocation70_spill] sm:$0xff] }
  0x77   : > { %v973_v63 = vadd.f32 %v957_v10, %v922_v30  ;;  %v974_v11 = vadd.f32 %v958_v2, %v923_v61  ;;  %v408_v10 = vadd.f32 %v392_v14, %v357_v27  ;;  %v6466_v2 = vld [vmem:[#allocation58_spill] sm:$0xff]  ;;  %v1270_v60 = vmul.f32 %v6467_v25, %v4863_v12  ;;  %v6468_v31 = vld [vmem:[#allocation16_spill] sm:$0xff] }
  0x78   : > { %v1269_v54 = vmul.f32 %v6466_v2, %v4860_v29  ;;  %v409_v23 = vadd.f32 %v393_v26, %v358_v41  ;;  %v498_v6 = vmul.f32 %v4571_v0, %v6468_v31  ;;  %v4874_v32 = vld [vmem:[%s4152_s9 + $0x91] sm:$0xff]  ;;  %v4877_v30 = vld [vmem:[%s4152_s9 + $0x99] sm:$0xff]  ;;  %v548_v14 = vmul.f32 %v4583_v5, %v6470_v17  ;;  %v6473_v41 = vld [vmem:[#allocation18_spill] sm:$0xff] }
  0x79   : > { %v1027_v42 = vadd.f32 %v1011_v4, %v973_v63  ;;  %v1028_v62 = vadd.f32 %v1012_v51, %v974_v11  ;;  %6469 = vst [vmem:[#allocation32_spill] sm:$0xff] %v4874_v32  ;;  %v459_v61 = vadd.f32 %v443_v38, %v408_v10  ;;  %v6471_v35 = vld [vmem:[#allocation60_spill] sm:$0xff]  ;;  %v6472_v11 = vld [vmem:[#allocation61_spill] sm:$0xff]  ;;  %v599_v31 = vmul.f32 %v4607_v50, %v6474_v9  ;;  %v6475_v17 = vld [vmem:[#allocation62_spill] sm:$0xff] }
  0x7a   : > { %v1320_v63 = vmul.f32 %v6471_v35, %v4874_v32  ;;  %v1321_v26 = vmul.f32 %v6472_v11, %v4877_v30  ;;  %v460_v27 = vadd.f32 %v444_v8, %v409_v23  ;;  %v4891_v38 = vld [vmem:[%s4152_s9 + $0x9a] sm:$0xff]  ;;  %v6476_v11 = vld [vmem:[#allocation63_spill] sm:$0xff] }
  0x7b   : > { %v1078_v4 = vadd.f32 %v1062_v33, %v1027_v42  ;;  %v1079_v51 = vadd.f32 %v1063_v34, %v1028_v62  ;;  %v549_v34 = vmul.f32 %v4596_v39, %v6473_v41  ;;  %v4888_v62 = vld [vmem:[%s4152_s9 + $0x92] sm:$0xff]  ;;  %v513_v10 = vadd.f32 %v497_v15, %v459_v61  ;;  %v4905_v15 = vld [vmem:[%s4152_s9 + $0x9b] sm:$0xff] }
  0x7c   : > { %v1371_v35 = vmul.f32 %v6475_v17, %v4888_v62  ;;  %v1372_v8 = vmul.f32 %v6476_v11, %v4891_v38  ;;  %v514_v23 = vadd.f32 %v498_v6, %v460_v27  ;;  %v6477_v41 = vld [vmem:[#allocation20_spill] sm:$0xff]  ;;  %6478 = vst [vmem:[#allocation8_spill] sm:$0xff] %v4905_v15  ;;  %v6479_v9 = vld [vmem:[#allocation21_spill] sm:$0xff]  ;;  %v651_v27 = vmul.f32 %v4647_v49, %v6434_v13 }
  0x7d   : > { %v1129_v33 = vadd.f32 %v1113_v37, %v1078_v4  ;;  %v1130_v42 = vadd.f32 %v1114_v57, %v1079_v51  ;;  %v600_v37 = vmul.f32 %v4610_v16, %v6477_v41  ;;  %v4902_v51 = vld [vmem:[%s4152_s9 + $0x93] sm:$0xff]  ;;  %v564_v61 = vadd.f32 %v548_v14, %v513_v10  ;;  %v6481_v11 = vld [vmem:[#allocation65_spill] sm:$0xff]  ;;  %v6484_v41 = vld [vmem:[#allocation66_spill] sm:$0xff] }
  0x7e   : > { %v650_v25 = vmul.f32 %v4624_v3, %v6479_v9  ;;  %v6480_v17 = vld [vmem:[#allocation64_spill] sm:$0xff]  ;;  %v1423_v22 = vmul.f32 %v6481_v11, %v4905_v15  ;;  %v565_v6 = vadd.f32 %v549_v34, %v514_v23  ;;  %v701_v10 = vmul.f32 %v4650_v46, %v6435_v24  ;;  %v6489_v15 = vld [vmem:[#allocation27_spill] sm:$0xff] }
  0x7f   : > { %v1180_v57 = vadd.f32 %v1164_v18, %v1129_v33  ;;  %v1181_v4 = vadd.f32 %v1165_v55, %v1130_v42  ;;  %v1422_v2 = vmul.f32 %v6480_v17, %v4902_v51  ;;  %v4916_v33 = vld [vmem:[%s4152_s9 + $0x94] sm:$0xff]  ;;  %v4919_v42 = vld [vmem:[%s4152_s9 + $0x9c] sm:$0xff]  ;;  %v615_v14 = vadd.f32 %v599_v31, %v564_v61  ;;  %v6487_v61 = vld [vmem:[#allocation26_spill] sm:$0xff] }
  0x80   : > { %6482 = vst [vmem:[#allocation33_spill] sm:$0xff] %v4916_v33  ;;  %6483 = vst [vmem:[#allocation9_spill] sm:$0xff] %v4919_v42  ;;  %v1473_v9 = vmul.f32 %v6484_v41, %v4916_v33  ;;  %v6485_v17 = vld [vmem:[#allocation67_spill] sm:$0xff]  ;;  %v616_v34 = vadd.f32 %v600_v37, %v565_v6  ;;  %v702_v13 = vmul.f32 %v6445_v45, %v6436_v47  ;;  %v6490_v33 = vld [vmem:[#allocation28_spill] sm:$0xff] }
  0x81   : > { %v1231_v18 = vadd.f32 %v1215_v40, %v1180_v57  ;;  %v1232_v55 = vadd.f32 %v1216_v43, %v1181_v4  ;;  %v1474_v11 = vmul.f32 %v6485_v17, %v4919_v42  ;;  %v666_v23 = vadd.f32 %v650_v25, %v615_v14  ;;  %v6486_v57 = vld [vmem:[#allocation69_spill] sm:$0xff]  ;;  %v6491_v47 = vld [vmem:[#allocation31_spill] sm:$0xff] }
  0x82   : > { %v755_v4 = vmul.f32 %v6486_v57, %v6437_v21  ;;  %v667_v31 = vadd.f32 %v651_v27, %v616_v34  ;;  %v756_v24 = vmul.f32 %v6488_v44, %v6487_v61  ;;  %v806_v41 = vmul.f32 %v6451_v7, %v6489_v15  ;;  %v6493_v27 = vld [vmem:[#allocation36_spill] sm:$0xff] }
  0x83   : > { %v1285_v40 = vadd.f32 %v1269_v54, %v1231_v18  ;;  %v1286_v43 = vadd.f32 %v1270_v60, %v1232_v55  ;;  %v807_v17 = vmul.f32 %v6453_v1, %v6490_v33  ;;  %v717_v42 = vadd.f32 %v701_v10, %v666_v23  ;;  %v6492_v60 = vld [vmem:[#allocation34_spill] sm:$0xff]  ;;  %v6494_v55 = vld [vmem:[#allocation37_spill] sm:$0xff]  ;;  %v6495_v33 = vld [vmem:[#allocation39_spill] sm:$0xff] }
  0x84   : > { %v857_v54 = vmul.f32 %v6455_v28, %v6491_v47  ;;  %v718_v25 = vadd.f32 %v702_v13, %v667_v31  ;;  %v858_v21 = vmul.f32 %v6460_v48, %v6492_v60  ;;  %v908_v18 = vmul.f32 %v4746_v19, %v6493_v27  ;;  %v6496_v10 = vld [vmem:[#allocation40_spill] sm:$0xff]  ;;  %v6497_v13 = vld [vmem:[#allocation43_spill] sm:$0xff]  ;;  %v6498_v23 = vld [vmem:[#allocation46_spill] sm:$0xff] }
  0x85   : > { %v1336_v37 = vadd.f32 %v1320_v63, %v1285_v40  ;;  %v1337_v6 = vadd.f32 %v1321_v26, %v1286_v43  ;;  %v909_v14 = vmul.f32 %v4765_v36, %v6494_v55  ;;  %v771_v61 = vadd.f32 %v755_v4, %v717_v42  ;;  %v6499_v55 = vld [vmem:[#allocation48_spill] sm:$0xff]  ;;  %v6500_v42 = vld [vmem:[#allocation49_spill] sm:$0xff] }
  0x86   : > { %v959_v63 = vmul.f32 %v4768_v53, %v6495_v33  ;;  %v772_v26 = vadd.f32 %v756_v24, %v718_v25  ;;  %v960_v40 = vmul.f32 %v4779_v52, %v6496_v10  ;;  %v1013_v43 = vmul.f32 %v4860_v29, %v6497_v13  ;;  %v6501_v24 = vld [vmem:[#allocation50_spill] sm:$0xff]  ;;  %v5013_v10 = vld [vmem:[%s6061_s1 + $0x30] sm:$0xff] }
  0x87   : > { %v1387_v15 = vadd.f32 %v1371_v35, %v1336_v37  ;;  %v1388_v34 = vadd.f32 %v1372_v8, %v1337_v6  ;;  %v1014_v31 = vmul.f32 %v4863_v12, %v6498_v23  ;;  %v822_v27 = vadd.f32 %v806_v41, %v771_v61  ;;  %v4966_v6 = vld [vmem:[%s6061_s1] sm:$0xff]  ;;  %v4980_v61 = vld [vmem:[%s6061_s1 + $0x10] sm:$0xff] }
  0x88   : > { %v1064_v35 = vmul.f32 %v4874_v32, %v6499_v55  ;;  %v823_v8 = vadd.f32 %v807_v17, %v772_v26  ;;  %v4957_v4 = vmul.f32 %v4877_v30, %v6500_v42  ;;  %v4961_v37 = vmul.f32 %v4888_v62, %v6501_v24  ;;  %v4973_v17 = vld [vmem:[%s6061_s1 + $0x8] sm:$0xff] }
  0x89   : > { %v1438_v47 = vadd.f32 %v1422_v2, %v1387_v15  ;;  %v1439_v60 = vadd.f32 %v1423_v22, %v1388_v34  ;;  %v241_v22 = vmul.f32 %v4966_v6, %v4568_v59  ;;  %v873_v25 = vadd.f32 %v857_v54, %v822_v27  ;;  %v5006_v26 = vld [vmem:[%s6061_s1 + $0x28] sm:$0xff] }
  0x8a   : > { %v242_v15 = vmul.f32 %v4973_v17, %v4571_v0  ;;  %v874_v34 = vadd.f32 %v858_v21, %v823_v8  ;;  %v292_v59 = vmul.f32 %v4980_v61, %v4583_v5  ;;  %v4994_v0 = vld [vmem:[%s6061_s1 + $0x20] sm:$0xff]  ;;  %v3730_v5 = vld [vmem:[%s6062_s2 + $0x128] ss:$20 sps:$4 sm:$0xff]   ;;  %v6506_v8 = vmov 0  }
  0x8b   : > { %v1489_v2 = vadd.f32 %v1473_v9, %v1438_v47  ;;  %v1490_v41 = vadd.f32 %v1474_v11, %v1439_v60  ;;  %v4987_v11 = vld [vmem:[%s6061_s1 + $0x18] sm:$0xff]  ;;  %v343_v54 = vmul.f32 %v4994_v0, %v4607_v50  ;;  %v924_v33 = vadd.f32 %v908_v18, %v873_v25  ;;  %3559 = vmatprep.subr.bf16.mxu0 %v3730_v5  ;;  %v5039_v55 = vld [vmem:[%s6061_s1 + $0x48] sm:$0xff]  ;;  %v5058_v25 = vld [vmem:[%s6061_s1 + $0x50] sm:$0xff] }
  0x8c   : > { %v293_v9 = vmul.f32 %v4987_v11, %v4596_v39  ;;  %v344_v39 = vmul.f32 %v5006_v26, %v4610_v16  ;;  %v394_v50 = vmul.f32 %v5013_v10, %v4624_v3  ;;  %v3731_v18 = vld [vmem:[%s6063_s3 + $0x78] sm:$0xff]   ;;  %v925_v13 = vadd.f32 %v909_v14, %v874_v34  ;;  %v5032_v14 = vld [vmem:[%s6061_s1 + $0x40] sm:$0xff]  ;;  %6505 = vst [vmem:[#allocation11_spill] sm:$0xff] %v5039_v55 }
  0x8d   : > { %v5001_v21 = vpack.c.bf16 %v1490_v41, %v1489_v2  ;;  %v308_v23 = vadd.f32 %v292_v59, %v241_v22  ;;  %v5023_v60 = vld [vmem:[%s6061_s1 + $0x38] sm:$0xff]  ;;  %v975_v3 = vadd.f32 %v959_v63, %v924_v33  ;;  %6504 = vst [vmem:[#allocation38_spill] sm:$0xff] %v5032_v14  ;;  %v445_v27 = vmul.f32 %v5032_v14, %v4650_v46  ;;  %v3733_v46 = vld [vmem:[%s6062_s2 + $0x100] ss:$20 sps:$4 sm:$0xff]  }
  0x8e   : > { %v309_v47 = vadd.f32 %v293_v9, %v242_v15  ;;  %6503 = vst [vmem:[#allocation10_spill] sm:$0xff] %v5023_v60  ;;  %v395_v16 = vmul.f32 %v5023_v60, %v4647_v49  ;;  %v446_v49 = vmul.f32 %v5039_v55, %v6445_v45  ;;  %v3732_v63 = vld [vmem:[%s6063_s3 + $0x38] sm:$0xff]   ;;  %v976_v42 = vadd.f32 %v960_v40, %v925_v13 }
  0x8f   : > { %6502 = vst [vmem:[#allocation35_spill] sm:$0xff] %v5001_v21  ;;  %1818 = vmatmul.mubr.bf16.gmra.mxu0 %v5001_v21  ;;  %1931 = vmatmul.mubr.bf16.gmra.mxu1 %v5001_v21  ;;  %v359_v24 = vadd.f32 %v343_v54, %v308_v23  ;;  %v1029_v2 = vadd.f32 %v1013_v43, %v975_v3  ;;  %6507 = vst [vmem:[#allocation41_spill] sm:$0xff] %v5058_v25  ;;  %v3734_v43 = vld [vmem:[%s6063_s3 + $0x70] sm:$0xff]   ;;  %v6509_v54 = vld [vmem:[#allocation8_spill] sm:$0xff] }
  0x90   : > { %1827 = vmatprep.mubr.bf16.mxu0 %v6506_v8  ;;  %1940 = vmatprep.mubr.bf16.mxu1 %v6506_v8  ;;  %v360_v22 = vadd.f32 %v344_v39, %v309_v47  ;;  %v1116_v41 = vmul.f32 %v4891_v38, %v6459_v20  ;;  %v1166_v45 = vmul.f32 %v4902_v51, %v6461_v56  ;;  %v5068_v56 = vld [vmem:[%s6061_s1 + $0x58] sm:$0xff] }
  0x91   : > { %v499_v40 = vmul.f32 %v5058_v25, %v6486_v57  ;;  %3431 = vmatprep.subr.bf16.mxu1 %v3731_v18  ;;  %v1030_v15 = vadd.f32 %v1014_v31, %v976_v42  ;;  %v410_v34 = vadd.f32 %v394_v50, %v359_v24  ;;  %6508 = vst [vmem:[#allocation12_spill] sm:$0xff] %v5068_v56  ;;  %v6510_v39 = vld [vmem:[#allocation56_spill] sm:$0xff]  ;;  %v6511_v18 = vld [vmem:[#allocation33_spill] sm:$0xff] }
  0x92   : > { %v411_v20 = vadd.f32 %v395_v16, %v360_v22  ;;  %v500_v59 = vmul.f32 %v5068_v56, %v6488_v44  ;;  %3560 = vmatpush3.bf16.msra.mxu0 %v3730_v5  ;;  %v1080_v9 = vadd.f32 %v1064_v35, %v1029_v2  ;;  %v1167_v33 = vmul.f32 %v6509_v54, %v6462_v58  ;;  %v5079_v31 = vld [vmem:[%s6061_s1 + $0x60] sm:$0xff]  ;;  %v3735_v5 = vld [vmem:[%s6062_s2 + $0xd8] ss:$20 sps:$4 sm:$0xff]   ;;  %v5108_v2 = vld [vmem:[%s6061_s1 + $0x70] sm:$0xff] }
  0x93   : > { %v1217_v13 = vmul.f32 %v6511_v18, %v6510_v39  ;;  %6512 = vst [vmem:[#allocation42_spill] sm:$0xff] %v5079_v31  ;;  %v550_v50 = vmul.f32 %v5079_v31, %v6451_v7  ;;  %3432 = vmatpush3.bf16.msra.mxu1 %v3732_v63  ;;  %v1081_v35 = vadd.f32 %v4957_v4, %v1030_v15  ;;  %v5088_v58 = vld [vmem:[%s4152_s9 + $0xa8] sm:$0xff]  ;;  %v3736_v63 = vld [vmem:[%s6063_s3 + $0x30] sm:$0xff]   ;;  %v6515_v42 = vld [vmem:[#allocation57_spill] sm:$0xff] }
  0x94   : > { %6513 = vst [vmem:[#allocation13_spill] sm:$0xff] %v5088_v58  ;;  %v461_v23 = vadd.f32 %v445_v27, %v410_v34  ;;  %v462_v47 = vadd.f32 %v446_v49, %v411_v20  ;;  %v5093_v16 = vld [vmem:[%s6061_s1 + $0x68] sm:$0xff]  ;;  %3561 = vmatprep.subr.bf16.mxu0 %v3733_v46  ;;  %v1131_v4 = vadd.f32 %v4961_v37, %v1080_v9  ;;  %v6516_v24 = vld [vmem:[#allocation9_spill] sm:$0xff]  ;;  %6518 = vst [vmem:[#allocation14_spill] sm:$0xff] %v5108_v2 }
  0x95   : > { %6514 = vst [vmem:[#allocation44_spill] sm:$0xff] %v5093_v16  ;;  %v551_v3 = vmul.f32 %v5093_v16, %v6453_v1  ;;  %v1218_v22 = vmul.f32 %v6516_v24, %v6515_v42  ;;  %v6517_v27 = vld [vmem:[#allocation58_spill] sm:$0xff]  ;;  %v601_v15 = vmul.f32 %v5108_v2, %v6455_v28  ;;  %3433 = vmatprep.subr.bf16.mxu1 %v3734_v43  ;;  %v5116_v20 = vld [vmem:[%s4152_s9 + $0xb0] sm:$0xff]  ;;  %v6523_v2 = vld [vmem:[#allocation60_spill] sm:$0xff] }
  0x96   : > { %v1271_v49 = vmul.f32 %v6517_v27, %v5088_v58  ;;  %v3738_v34 = vld [vmem:[%s6063_s3 + $0x68] sm:$0xff]   ;;  %v1132_v37 = vadd.f32 %v1116_v41, %v1081_v35  ;;  %6519 = vst [vmem:[#allocation45_spill] sm:$0xff] %v5116_v20  ;;  %v515_v39 = vadd.f32 %v499_v40, %v461_v23  ;;  %v516_v42 = vadd.f32 %v500_v59, %v462_v47  ;;  %v5124_v27 = vld [vmem:[%s6061_s1 + $0x78] sm:$0xff]  ;;  %v6522_v41 = vld [vmem:[#allocation59_spill] sm:$0xff] }
  0x97   : > { %v5119_v9 = vld [vmem:[%s4152_s9 + $0xa9] sm:$0xff]  ;;  %6521 = vst [vmem:[#allocation53_spill] sm:$0xff] %v5124_v27  ;;  %v602_v43 = vmul.f32 %v5124_v27, %v6460_v48  ;;  %3562 = vmatpush3.bf16.msra.mxu0 %v3733_v46  ;;  %v1182_v21 = vadd.f32 %v1166_v45, %v1131_v4  ;;  %v1272_v35 = vmul.f32 %v6522_v41, %v5116_v20  ;;  %v5135_v40 = vld [vmem:[%s6061_s1 + $0x80] sm:$0xff]  ;;  %v5143_v23 = vld [vmem:[%s4152_s9 + $0xb1] sm:$0xff] }
  0x98   : > { %6520 = vst [vmem:[#allocation47_spill] sm:$0xff] %v5119_v9  ;;  %v1322_v16 = vmul.f32 %v6523_v2, %v5119_v9  ;;  %6524 = vst [vmem:[#allocation54_spill] sm:$0xff] %v5135_v40  ;;  %v652_v59 = vmul.f32 %v5135_v40, %v4746_v19  ;;  %3563 = vmatprep.subr.bf16.mxu0 %v3735_v5  ;;  %v3737_v46 = vld [vmem:[%s6062_s2 + $0xb0] ss:$20 sps:$4 sm:$0xff]   ;;  %v1183_v45 = vadd.f32 %v1167_v33, %v1132_v37  ;;  %v5151_v41 = vld [vmem:[%s6061_s1 + $0x88] sm:$0xff] }
  0x99   : > { %6525 = vst [vmem:[#allocation22_spill] sm:$0xff] %v5143_v23  ;;  %v5146_v47 = vld [vmem:[%s4152_s9 + $0xaa] sm:$0xff]  ;;  %v566_v4 = vadd.f32 %v550_v50, %v515_v39  ;;  %v567_v2 = vadd.f32 %v551_v3, %v516_v42  ;;  %6526 = vst [vmem:[#allocation23_spill] sm:$0xff] %v5151_v41  ;;  %v653_v40 = vmul.f32 %v5151_v41, %v4765_v36  ;;  %3434 = vmatpush3.bf16.msra.mxu1 %v3736_v63  ;;  %v6527_v27 = vld [vmem:[#allocation61_spill] sm:$0xff] }
  0x9a   : > { %v3740_v33 = vld [vmem:[%s6063_s3 + $0x28] sm:$0xff]   ;;  %v1233_v37 = vadd.f32 %v1217_v13, %v1182_v21  ;;  %v1323_v31 = vmul.f32 %v6527_v27, %v5143_v23  ;;  %v5165_v39 = vld [vmem:[%s6061_s1 + $0x90] sm:$0xff]  ;;  %3435 = vmatprep.subr.bf16.mxu1 %v3738_v34  ;;  %v3742_v63 = vld [vmem:[%s6063_s3 + $0x60] sm:$0xff]   ;;  %v1234_v21 = vadd.f32 %v1218_v22, %v1183_v45 }
  0x9b   : > { %v6528_v50 = vld [vmem:[#allocation62_spill] sm:$0xff]  ;;  %6529 = vst [vmem:[#allocation24_spill] sm:$0xff] %v5165_v39  ;;  %v703_v42 = vmul.f32 %v5165_v39, %v4768_v53  ;;  %v5173_v13 = vld [vmem:[%s4152_s9 + $0xb2] sm:$0xff]  ;;  %v618_v41 = vadd.f32 %v602_v43, %v567_v2  ;;  %3564 = vmatpush3.bf16.msra.mxu0 %v3735_v5 }
  0x9c   : > { %v1373_v3 = vmul.f32 %v6528_v50, %v5146_v47  ;;  %v5176_v27 = vld [vmem:[%s4152_s9 + $0xab] sm:$0xff]  ;;  %v617_v50 = vadd.f32 %v601_v15, %v566_v4  ;;  %v5181_v56 = vld [vmem:[%s6061_s1 + $0x98] sm:$0xff]  ;;  %v1287_v39 = vadd.f32 %v1271_v49, %v1233_v37  ;;  %v5192_v15 = vld [vmem:[%s6061_s1 + $0xa0] sm:$0xff]  ;;  %3565 = vmatprep.subr.bf16.mxu0 %v3737_v46  ;;  %v1288_v49 = vadd.f32 %v1272_v35, %v1234_v21 }
  0x9d   : > { %6530 = vst [vmem:[#allocation25_spill] sm:$0xff] %v5176_v27  ;;  %6531 = vst [vmem:[#allocation68_spill] sm:$0xff] %v5181_v56  ;;  %v704_v34 = vmul.f32 %v5181_v56, %v4779_v52  ;;  %v6532_v22 = vld [vmem:[#allocation63_spill] sm:$0xff]  ;;  %v6533_v25 = vld [vmem:[#allocation64_spill] sm:$0xff]  ;;  %v757_v43 = vmul.f32 %v5192_v15, %v4860_v29  ;;  %v669_v37 = vadd.f32 %v653_v40, %v618_v41  ;;  %3436 = vmatpush3.bf16.msra.mxu1 %v3740_v33 }
  0x9e   : > { %v1374_v45 = vmul.f32 %v6532_v22, %v5173_v13  ;;  %v1424_v55 = vmul.f32 %v6533_v25, %v5176_v27  ;;  %6534 = vst [vmem:[#allocation71_spill] sm:$0xff] %v5192_v15  ;;  %v3739_v5 = vld [vmem:[%s6062_s2 + $0x88] ss:$20 sps:$4 sm:$0xff]   ;;  %v5200_v4 = vld [vmem:[%s4152_s9 + $0xb3] sm:$0xff]  ;;  %v668_v25 = vadd.f32 %v652_v59, %v617_v50  ;;  %v3744_v35 = vld [vmem:[%s6063_s3 + $0x20] sm:$0xff]   ;;  %v1338_v21 = vadd.f32 %v1322_v16, %v1287_v39 }
  0x9f   : > { %v5203_v2 = vld [vmem:[%s4152_s9 + $0xac] sm:$0xff]  ;;  %v6537_v56 = vld [vmem:[#allocation65_spill] sm:$0xff]  ;;  %3437 = vmatprep.subr.bf16.mxu1 %v3742_v63  ;;  %v3746_v33 = vld [vmem:[%s6063_s3 + $0x58] sm:$0xff]   ;;  %v1339_v16 = vadd.f32 %v1323_v31, %v1288_v49  ;;  %3566 = vmatpush3.bf16.msra.mxu0 %v3737_v46 }
  0xa0   : > { %6535 = vst [vmem:[#allocation72_spill] sm:$0xff] %v5203_v2  ;;  %v5208_v22 = vld [vmem:[%s6061_s1 + $0xa8] sm:$0xff]  ;;  %v1425_v27 = vmul.f32 %v6537_v56, %v5200_v4  ;;  %v5222_v41 = vld [vmem:[%s6061_s1 + $0xb0] sm:$0xff]  ;;  %v719_v56 = vadd.f32 %v703_v42, %v668_v25  ;;  %v5244_v31 = vld [vmem:[%s6061_s1 + $0xc0] sm:$0xff]  ;;  %3567 = vmatprep.subr.bf16.mxu0 %v3739_v5 }
  0xa1   : > { %6536 = vst [vmem:[#allocation73_spill] sm:$0xff] %v5208_v22  ;;  %v758_v15 = vmul.f32 %v5208_v22, %v4863_v12  ;;  %v6538_v59 = vld [vmem:[#allocation66_spill] sm:$0xff]  ;;  %6539 = vst [vmem:[#allocation5_spill] sm:$0xff] %v5222_v41  ;;  %v808_v50 = vmul.f32 %v5222_v41, %v4874_v32  ;;  %v5230_v39 = vld [vmem:[%s4152_s9 + $0xb4] sm:$0xff]  ;;  %v720_v22 = vadd.f32 %v704_v34, %v669_v37  ;;  %3438 = vmatpush3.bf16.msra.mxu1 %v3744_v35 }
  0xa2   : > { %v1475_v40 = vmul.f32 %v6538_v59, %v5203_v2  ;;  %6540 = vst [vmem:[#allocation6_spill] sm:$0xff] %v5230_v39  ;;  %v5235_v59 = vld [vmem:[%s6061_s1 + $0xb8] sm:$0xff]  ;;  %v1389_v41 = vadd.f32 %v1373_v3, %v1338_v21  ;;  %v6542_v63 = vld [vmem:[#allocation67_spill] sm:$0xff]  ;;  %6543 = vst [vmem:[#allocation51_spill] sm:$0xff] %v5244_v31  ;;  %v859_v42 = vmul.f32 %v5244_v31, %v4888_v62  ;;  %3439 = vmatprep.subr.bf16.mxu1 %v3746_v33 }
  0xa3   : > { %6541 = vst [vmem:[#allocation7_spill] sm:$0xff] %v5235_v59  ;;  %v809_v2 = vmul.f32 %v5235_v59, %v4877_v30  ;;  %v1476_v32 = vmul.f32 %v6542_v63, %v5230_v39  ;;  %v5251_v34 = vld [vmem:[%s6061_s1 + $0xc8] sm:$0xff]  ;;  %v3741_v3 = vld [vmem:[%s6062_s2 + $0x60] ss:$20 sps:$4 sm:$0xff]   ;;  %v1390_v49 = vadd.f32 %v1374_v45, %v1339_v16  ;;  %v773_v25 = vadd.f32 %v757_v43, %v719_v56  ;;  %v5271_v45 = vld [vmem:[%s6061_s1 + $0xd8] sm:$0xff] }
  0xa4   : > { %6544 = vst [vmem:[#allocation74_spill] sm:$0xff] %v5251_v34  ;;  %v860_v46 = vmul.f32 %v5251_v34, %v4891_v38  ;;  %v774_v37 = vadd.f32 %v758_v15, %v720_v22  ;;  %v5261_v21 = vld [vmem:[%s6061_s1 + $0xd0] sm:$0xff]  ;;  %v3747_v34 = vld [vmem:[%s6063_s3 + $0x18] sm:$0xff]   ;;  %v1440_v31 = vadd.f32 %v1424_v55, %v1389_v41  ;;  %6546 = vst [vmem:[#allocation55_spill] sm:$0xff] %v5271_v45  ;;  %3568 = vmatpush3.bf16.msra.mxu0 %v3739_v5 }
  0xa5   : > { %6545 = vst [vmem:[#allocation52_spill] sm:$0xff] %v5261_v21  ;;  %v910_v63 = vmul.f32 %v5261_v21, %v4902_v51  ;;  %v911_v15 = vmul.f32 %v5271_v45, %v6509_v54  ;;  %v5278_v43 = vld [vmem:[%s6061_s1 + $0xe0] sm:$0xff]  ;;  %v5285_v55 = vld [vmem:[%s6061_s1 + $0xe8] sm:$0xff]  ;;  %v3752_v41 = vld [vmem:[%s6063_s3 + $0x50] sm:$0xff]   ;;  %v1441_v16 = vadd.f32 %v1425_v27, %v1390_v49  ;;  %v824_v56 = vadd.f32 %v808_v50, %v773_v25 }
  0xa6   : > { %6547 = vst [vmem:[#allocation15_spill] sm:$0xff] %v5278_v43  ;;  %v961_v22 = vmul.f32 %v5278_v43, %v6511_v18  ;;  %v962_v35 = vmul.f32 %v5285_v55, %v6516_v24  ;;  %v825_v45 = vadd.f32 %v809_v2, %v774_v37  ;;  %v5295_v43 = vld [vmem:[%s6061_s1 + $0xf0] sm:$0xff]  ;;  %v1491_v59 = vadd.f32 %v1475_v40, %v1440_v31  ;;  %v5302_v33 = vld [vmem:[%s6061_s1 + $0xf8] sm:$0xff]  ;;  %v5309_v2 = vld [vmem:[%s6061_s1 + $0x100] sm:$0xff] }
  0xa7   : > { %6548 = vst [vmem:[#allocation16_spill] sm:$0xff] %v5295_v43  ;;  %v1015_v21 = vmul.f32 %v5295_v43, %v5088_v58  ;;  %6549 = vst [vmem:[#allocation17_spill] sm:$0xff] %v5302_v33  ;;  %v1016_v27 = vmul.f32 %v5302_v33, %v5116_v20  ;;  %v1066_v50 = vmul.f32 %v5309_v2, %v5119_v9  ;;  %v5316_v5 = vld [vmem:[%s6061_s1 + $0x108] sm:$0xff]  ;;  %3569 = vmatprep.subr.bf16.mxu0 %v3741_v3 }
  0xa8   : > { %6550 = vst [vmem:[#allocation18_spill] sm:$0xff] %v5309_v2  ;;  %6551 = vst [vmem:[#allocation19_spill] sm:$0xff] %v5316_v5  ;;  %v1067_v40 = vmul.f32 %v5316_v5, %v5143_v23  ;;  %v3743_v31 = vld [vmem:[%s6062_s2 + $0x38] ss:$20 sps:$4 sm:$0xff]   ;;  %v1492_v49 = vadd.f32 %v1476_v32, %v1441_v16  ;;  %v875_v25 = vadd.f32 %v859_v42, %v824_v56  ;;  %v5326_v2 = vld [vmem:[%s6061_s1 + $0x110] sm:$0xff]  ;;  %3440 = vmatpush3.bf16.msra.mxu1 %v3747_v34 }
  0xa9   : > { %v876_v37 = vadd.f32 %v860_v46, %v825_v45  ;;  %6552 = vst [vmem:[#allocation20_spill] sm:$0xff] %v5326_v2  ;;  %v1117_v33 = vmul.f32 %v5326_v2, %v5146_v47  ;;  %v243_v5 = vmul.f32 %v4966_v6, %v6486_v57  ;;  %v244_v43 = vmul.f32 %v4973_v17, %v6488_v44 }
  0xaa   : > { %v294_v32 = vmul.f32 %v4980_v61, %v6451_v7  ;;  %v295_v42 = vmul.f32 %v4987_v11, %v6453_v1  ;;  %3441 = vmatprep.subr.bf16.mxu1 %v3752_v41  ;;  %v5338_v46 = vpack.c.bf16 %v1492_v49, %v1491_v59  ;;  %v926_v45 = vadd.f32 %v910_v63, %v875_v25  ;;  %v3745_v1 = vld [vmem:[%s6062_s2 + $0x10] ss:$20 sps:$4 sm:$0xff]  }
  0xab   : > { %v927_v16 = vadd.f32 %v911_v15, %v876_v37  ;;  %v345_v34 = vmul.f32 %v4994_v0, %v6455_v28  ;;  %3570 = vmatpush3.bf16.msra.mxu0 %v3741_v3  ;;  %v346_v44 = vmul.f32 %v5006_v26, %v6460_v48  ;;  %v396_v7 = vmul.f32 %v5013_v10, %v4746_v19  ;;  %v3753_v48 = vld [vmem:[%s6063_s3 + $0x10] sm:$0xff]   ;;  %v6556_v37 = vld [vmem:[#allocation41_spill] sm:$0xff] }
  0xac   : > { %6553 = vst [vmem:[#allocation21_spill] sm:$0xff] %v5338_v46  ;;  %v310_v56 = vadd.f32 %v294_v32, %v243_v5  ;;  %v311_v57 = vadd.f32 %v295_v42, %v244_v43  ;;  %3571 = vmatprep.subr.bf16.mxu0 %v3743_v31  ;;  %1828 = vmatmul.mubr.bf16.gmra.mxu0 %v5338_v46  ;;  %v3758_v43 = vld [vmem:[%s6063_s3 + $0x48] sm:$0xff]   ;;  %v6555_v5 = vld [vmem:[#allocation11_spill] sm:$0xff]  ;;  %v5379_v42 = vld [vmem:[%s6063_s3 + $0xf8] sm:$0xff]  }
  0xad   : > { %1941 = vmatmul.mubr.bf16.gmra.mxu1 %v5338_v46  ;;  %v977_v59 = vadd.f32 %v961_v22, %v926_v45  ;;  %v978_v28 = vadd.f32 %v962_v35, %v927_v16  ;;  %v397_v3 = vmul.f32 %v5023_v60, %v4765_v36  ;;  %1837 = vmatprep.mubr.bf16.mxu0 %v6506_v8  ;;  %v5366_v36 = vld [vmem:[%s6061_s1 + $0x118] sm:$0xff] }
  0xae   : > { %1950 = vmatprep.mubr.bf16.mxu1 %v6506_v8  ;;  %v361_v19 = vadd.f32 %v345_v34, %v310_v56  ;;  %v362_v63 = vadd.f32 %v346_v44, %v311_v57  ;;  %v447_v15 = vmul.f32 %v5032_v14, %v4768_v53  ;;  %6554 = vst [vmem:[#allocation69_spill] sm:$0xff] %v5366_v36  ;;  %v5391_v56 = vld [vmem:[%s6061_s1 + $0x128] sm:$0xff] }
  0xaf   : > { %v1031_v22 = vadd.f32 %v1015_v21, %v977_v59  ;;  %v1032_v35 = vadd.f32 %v1016_v27, %v978_v28  ;;  %v1118_v41 = vmul.f32 %v5366_v36, %v5173_v13  ;;  %v448_v49 = vmul.f32 %v6555_v5, %v4779_v52  ;;  %3572 = vmatpush3.bf16.msra.mxu0 %v3743_v31  ;;  %v6557_v21 = vld [vmem:[#allocation12_spill] sm:$0xff]  ;;  %v5384_v52 = vld [vmem:[%s6061_s1 + $0x120] sm:$0xff]  ;;  %v6562_v59 = vld [vmem:[#allocation42_spill] sm:$0xff] }
  0xb0   : > { %v412_v25 = vadd.f32 %v396_v7, %v361_v19  ;;  %v413_v53 = vadd.f32 %v397_v3, %v362_v63  ;;  %v501_v32 = vmul.f32 %v6556_v37, %v4860_v29  ;;  %v502_v27 = vmul.f32 %v6557_v21, %v4863_v12  ;;  %3573 = vmatprep.subr.bf16.mxu0 %v3745_v1  ;;  %v6559_v31 = vld [vmem:[#allocation25_spill] sm:$0xff]  ;;  %v6561_v7 = vld [vmem:[#allocation32_spill] sm:$0xff]  ;;  %v5460_v37 = vld [vmem:[%s6061_s1 + $0x150] sm:$0xff] }
  0xb1   : > { %v1082_v45 = vadd.f32 %v1066_v50, %v1031_v22  ;;  %v1083_v16 = vadd.f32 %v1067_v40, %v1032_v35  ;;  %6558 = vst [vmem:[#allocation26_spill] sm:$0xff] %v5384_v52  ;;  %v1168_v34 = vmul.f32 %v5384_v52, %v6559_v31  ;;  %6560 = vst [vmem:[#allocation70_spill] sm:$0xff] %v5391_v56  ;;  %3442 = vmatpush3.bf16.msra.mxu1 %v3753_v48  ;;  %v3759_v50 = vld [vmem:[%s6063_s3 + $0x8] sm:$0xff]   ;;  %v6563_v3 = vld [vmem:[#allocation44_spill] sm:$0xff] }
  0xb2   : > { %v1169_v57 = vmul.f32 %v5391_v56, %v5200_v4  ;;  %v463_v40 = vadd.f32 %v447_v15, %v412_v25  ;;  %v464_v44 = vadd.f32 %v448_v49, %v413_v53  ;;  %v552_v28 = vmul.f32 %v6562_v59, %v6561_v7  ;;  %3443 = vmatprep.subr.bf16.mxu1 %v3758_v43  ;;  %v3764_v63 = vld [vmem:[%s6063_s3 + $0x40] sm:$0xff]   ;;  %v5408_v35 = vld [vmem:[%s6061_s1 + $0x130] sm:$0xff]  ;;  %v6565_v15 = vld [vmem:[#allocation72_spill] sm:$0xff] }
  0xb3   : > { %v553_v19 = vmul.f32 %v6563_v3, %v4877_v30  ;;  %v1133_v22 = vadd.f32 %v1117_v33, %v1082_v45  ;;  %v1134_v48 = vadd.f32 %v1118_v41, %v1083_v16  ;;  %6564 = vst [vmem:[#allocation27_spill] sm:$0xff] %v5408_v35  ;;  %v1219_v49 = vmul.f32 %v5408_v35, %v6565_v15  ;;  %v5415_v25 = vld [vmem:[%s6061_s1 + $0x138] sm:$0xff]  ;;  %v5420_v33 = vld [vmem:[%s4152_s9 + $0xc0] sm:$0xff]  ;;  %v5423_v41 = vld [vmem:[%s4152_s9 + $0xc8] sm:$0xff] }
  0xb4   : > { %6566 = vst [vmem:[#allocation28_spill] sm:$0xff] %v5415_v25  ;;  %v1220_v43 = vmul.f32 %v5415_v25, %v5230_v39  ;;  %3574 = vmatpush3.bf16.msra.mxu0 %v3745_v1  ;;  %6567 = vst [vmem:[#allocation31_spill] sm:$0xff] %v5420_v33  ;;  %v517_v53 = vadd.f32 %v501_v32, %v463_v40  ;;  %v518_v45 = vadd.f32 %v502_v27, %v464_v44  ;;  %v6568_v16 = vld [vmem:[#allocation14_spill] sm:$0xff]  ;;  %v6569_v3 = vld [vmem:[#allocation53_spill] sm:$0xff] }
  0xb5   : > { %v603_v46 = vmul.f32 %v6568_v16, %v4888_v62  ;;  %v604_v59 = vmul.f32 %v6569_v3, %v4891_v38  ;;  %3495 = vmatprep.subr.bf16.mxu0 %v5379_v42  ;;  %v1184_v21 = vadd.f32 %v1168_v34, %v1133_v22  ;;  %v1185_v35 = vadd.f32 %v1169_v57, %v1134_v48  ;;  %v5433_v1 = vld [vmem:[%s6061_s1 + $0x140] sm:$0xff]  ;;  %v5440_v32 = vld [vmem:[%s6061_s1 + $0x148] sm:$0xff]  ;;  %v6573_v16 = vld [vmem:[#allocation23_spill] sm:$0xff] }
  0xb6   : > { %6570 = vst [vmem:[#allocation34_spill] sm:$0xff] %v5433_v1  ;;  %v1273_v25 = vmul.f32 %v5433_v1, %v5420_v33  ;;  %6571 = vst [vmem:[#allocation36_spill] sm:$0xff] %v5440_v32  ;;  %v1274_v27 = vmul.f32 %v5440_v32, %v5423_v41  ;;  %3444 = vmatpush3.bf16.msra.mxu1 %v3759_v50  ;;  %v3765_v34 = vld [vmem:[%s6063_s3] sm:$0xff]   ;;  %v5451_v40 = vld [vmem:[%s4152_s9 + $0xc9] sm:$0xff]  ;;  %v568_v44 = vadd.f32 %v552_v28, %v517_v53 }
  0xb7   : > { %v5448_v57 = vld [vmem:[%s4152_s9 + $0xc1] sm:$0xff]  ;;  %v569_v22 = vadd.f32 %v553_v19, %v518_v45  ;;  %v655_v1 = vmul.f32 %v6573_v16, %v6509_v54  ;;  %3445 = vmatprep.subr.bf16.mxu1 %v3764_v63  ;;  %v1235_v32 = vadd.f32 %v1219_v49, %v1184_v21  ;;  %v1236_v50 = vadd.f32 %v1220_v43, %v1185_v35  ;;  %v5467_v28 = vld [vmem:[%s6061_s1 + $0x158] sm:$0xff]  ;;  %v5475_v63 = vld [vmem:[%s4152_s9 + $0xca] sm:$0xff] }
  0xb8   : > { %v6572_v48 = vld [vmem:[#allocation54_spill] sm:$0xff]  ;;  %6574 = vst [vmem:[#allocation37_spill] sm:$0xff] %v5460_v37  ;;  %v1324_v5 = vmul.f32 %v5460_v37, %v5448_v57  ;;  %6575 = vst [vmem:[#allocation39_spill] sm:$0xff] %v5467_v28  ;;  %v1325_v19 = vmul.f32 %v5467_v28, %v5451_v40  ;;  %v619_v35 = vadd.f32 %v603_v46, %v568_v44  ;;  %v6576_v43 = vld [vmem:[#allocation24_spill] sm:$0xff] }
  0xb9   : > { %v654_v3 = vmul.f32 %v6572_v48, %v4902_v51  ;;  %v5472_v21 = vld [vmem:[%s4152_s9 + $0xc2] sm:$0xff]  ;;  %v620_v49 = vadd.f32 %v604_v59, %v569_v22  ;;  %v705_v53 = vmul.f32 %v6576_v43, %v6511_v18  ;;  %v6577_v45 = vld [vmem:[#allocation68_spill] sm:$0xff]  ;;  %v1289_v48 = vadd.f32 %v1273_v25, %v1235_v32  ;;  %v5499_v32 = vld [vmem:[%s4152_s9 + $0xcb] sm:$0xff] }
  0xba   : > { %v706_v16 = vmul.f32 %v6577_v45, %v6516_v24  ;;  %v1290_v37 = vadd.f32 %v1274_v27, %v1236_v50  ;;  %v5484_v56 = vld [vmem:[%s6061_s1 + $0x160] sm:$0xff]  ;;  %v5491_v46 = vld [vmem:[%s6061_s1 + $0x168] sm:$0xff]  ;;  %3446 = vmatpush3.bf16.msra.mxu1 %v3765_v34  ;;  %6580 = vst [vmem:[#allocation46_spill] sm:$0xff] %v5499_v32  ;;  %v6581_v22 = vld [vmem:[#allocation71_spill] sm:$0xff] }
  0xbb   : > { %6578 = vst [vmem:[#allocation40_spill] sm:$0xff] %v5484_v56  ;;  %v1375_v28 = vmul.f32 %v5484_v56, %v5472_v21  ;;  %6579 = vst [vmem:[#allocation43_spill] sm:$0xff] %v5491_v46  ;;  %v1376_v59 = vmul.f32 %v5491_v46, %v5475_v63  ;;  %v5496_v25 = vld [vmem:[%s4152_s9 + $0xc3] sm:$0xff]  ;;  %v670_v27 = vadd.f32 %v654_v3, %v619_v35  ;;  %3591 = vmatprep.subr.bf16.mxu1 %v5379_v42  ;;  %v5509_v34 = vld [vmem:[%s6061_s1 + $0x170] sm:$0xff] }
  0xbc   : > { %v671_v44 = vadd.f32 %v655_v1, %v620_v49  ;;  %v759_v50 = vmul.f32 %v6581_v22, %v5088_v58  ;;  %v6582_v45 = vld [vmem:[#allocation73_spill] sm:$0xff]  ;;  %v1340_v56 = vadd.f32 %v1324_v5, %v1289_v48  ;;  %v1341_v24 = vadd.f32 %v1325_v19, %v1290_v37  ;;  %6583 = vst [vmem:[#allocation48_spill] sm:$0xff] %v5509_v34  ;;  %v5516_v3 = vld [vmem:[%s6061_s1 + $0x178] sm:$0xff]  ;;  %v5524_v5 = vld [vmem:[%s4152_s9 + $0xcc] sm:$0xff] }
  0xbd   : > { %v760_v43 = vmul.f32 %v6582_v45, %v5116_v20  ;;  %v1426_v46 = vmul.f32 %v5509_v34, %v5496_v25  ;;  %6584 = vst [vmem:[#allocation49_spill] sm:$0xff] %v5516_v3  ;;  %v1427_v1 = vmul.f32 %v5516_v3, %v5499_v32  ;;  %v5521_v35 = vld [vmem:[%s4152_s9 + $0xc4] sm:$0xff]  ;;  %v721_v37 = vadd.f32 %v705_v53, %v670_v27  ;;  %v6587_v49 = vld [vmem:[#allocation7_spill] sm:$0xff] }
  0xbe   : > { %6585 = vst [vmem:[#allocation50_spill] sm:$0xff] %v5521_v35  ;;  %v722_v42 = vadd.f32 %v706_v16, %v671_v44  ;;  %v6586_v48 = vld [vmem:[#allocation5_spill] sm:$0xff]  ;;  %v811_v45 = vmul.f32 %v6587_v49, %v5143_v23  ;;  %v1391_v22 = vadd.f32 %v1375_v28, %v1340_v56  ;;  %v1392_v34 = vadd.f32 %v1376_v59, %v1341_v24  ;;  %v5540_v16 = vld [vmem:[%s6061_s1 + $0x188] sm:$0xff]  ;;  %v6590_v24 = vld [vmem:[#allocation51_spill] sm:$0xff] }
  0xbf   : > { %v810_v19 = vmul.f32 %v6586_v48, %v5119_v9  ;;  %v5533_v20 = vld [vmem:[%s6061_s1 + $0x180] sm:$0xff]  ;;  %6589 = vst [vmem:[#allocation56_spill] sm:$0xff] %v5540_v16  ;;  %v1478_v53 = vmul.f32 %v5540_v16, %v5524_v5  ;;  %v775_v27 = vadd.f32 %v759_v50, %v721_v37  ;;  %v861_v56 = vmul.f32 %v6590_v24, %v5146_v47  ;;  %v6591_v28 = vld [vmem:[#allocation74_spill] sm:$0xff]  ;;  %v6593_v58 = vld [vmem:[#allocation55_spill] sm:$0xff] }
  0xc0   : > { %6588 = vst [vmem:[#allocation8_spill] sm:$0xff] %v5533_v20  ;;  %v1477_v3 = vmul.f32 %v5533_v20, %v5521_v35  ;;  %v776_v44 = vadd.f32 %v760_v43, %v722_v42  ;;  %v862_v59 = vmul.f32 %v6591_v28, %v5173_v13  ;;  %v1442_v49 = vadd.f32 %v1426_v46, %v1391_v22  ;;  %v6592_v20 = vld [vmem:[#allocation52_spill] sm:$0xff]  ;;  %v6594_v16 = vld [vmem:[#allocation15_spill] sm:$0xff] }
  0xc1   : > { %v1443_v48 = vadd.f32 %v1427_v1, %v1392_v34  ;;  %v912_v23 = vmul.f32 %v6592_v20, %v6559_v31  ;;  %v826_v9 = vadd.f32 %v810_v19, %v775_v27  ;;  %v913_v32 = vmul.f32 %v6593_v58, %v5200_v4  ;;  %v6595_v28 = vld [vmem:[#allocation16_spill] sm:$0xff]  ;;  %v6596_v1 = vld [vmem:[#allocation17_spill] sm:$0xff] }
  0xc2   : > { %v827_v35 = vadd.f32 %v811_v45, %v776_v44  ;;  %v963_v50 = vmul.f32 %v6594_v16, %v6565_v15  ;;  %v1493_v43 = vadd.f32 %v1477_v3, %v1442_v49  ;;  %v964_v42 = vmul.f32 %v5285_v55, %v5230_v39  ;;  %v6597_v45 = vld [vmem:[#allocation18_spill] sm:$0xff]  ;;  %v6599_v16 = vld [vmem:[#allocation19_spill] sm:$0xff] }
  0xc3   : > { %v1494_v37 = vadd.f32 %v1478_v53, %v1443_v48  ;;  %v1017_v46 = vmul.f32 %v6595_v28, %v5420_v33  ;;  %v877_v22 = vadd.f32 %v861_v56, %v826_v9  ;;  %v1018_v19 = vmul.f32 %v6596_v1, %v5423_v41 }
  0xc4   : > { %v878_v34 = vadd.f32 %v862_v59, %v827_v35  ;;  %v1068_v27 = vmul.f32 %v6597_v45, %v5448_v57  ;;  %v1069_v3 = vmul.f32 %v6599_v16, %v5451_v40  ;;  %v245_v48 = vmul.f32 %v4966_v6, %v4860_v29 }
  0xc5   : > { %v5562_v44 = vpack.c.bf16 %v1494_v37, %v1493_v43  ;;  %v246_v49 = vmul.f32 %v4973_v17, %v4863_v12  ;;  %v928_v53 = vadd.f32 %v912_v23, %v877_v22  ;;  %v296_v35 = vmul.f32 %v4980_v61, %v6561_v7 }
  0xc6   : > { %v929_v9 = vadd.f32 %v913_v32, %v878_v34  ;;  %v297_v56 = vmul.f32 %v4987_v11, %v4877_v30  ;;  %v347_v59 = vmul.f32 %v4994_v0, %v4888_v62  ;;  %v348_v29 = vmul.f32 %v5006_v26, %v4891_v38 }
  0xc7   : > { %6598 = vst [vmem:[#allocation33_spill] sm:$0xff] %v5562_v44  ;;  %1838 = vmatmul.mubr.bf16.gmra.mxu0 %v5562_v44  ;;  %1951 = vmatmul.mubr.bf16.gmra.mxu1 %v5562_v44  ;;  %v398_v12 = vmul.f32 %v5013_v10, %v4902_v51  ;;  %v979_v23 = vadd.f32 %v963_v50, %v928_v53 }
  0xc8   : > { %1847 = vmatprep.mubr.bf16.mxu0 %v6506_v8  ;;  %1960 = vmatprep.mubr.bf16.mxu1 %v6506_v8  ;;  %v980_v7 = vadd.f32 %v964_v42, %v929_v9  ;;  %v312_v30 = vadd.f32 %v296_v35, %v245_v48  ;;  %v1119_v32 = vmul.f32 %v5326_v2, %v5472_v21  ;;  %v6600_v42 = vld [vmem:[#allocation46_spill] sm:$0xff]  ;;  %v6602_v35 = vld [vmem:[#allocation9_spill] sm:$0xff] }
  0xc9   : > { %v1120_v43 = vmul.f32 %v5366_v36, %v5475_v63  ;;  %v313_v62 = vadd.f32 %v297_v56, %v246_v49  ;;  %v399_v38 = vmul.f32 %v5023_v60, %v6509_v54  ;;  %v1033_v37 = vadd.f32 %v1017_v46, %v979_v23  ;;  %v6601_v48 = vld [vmem:[#allocation70_spill] sm:$0xff]  ;;  %v6603_v49 = vld [vmem:[#allocation11_spill] sm:$0xff]  ;;  %v6608_v36 = vld [vmem:[#allocation28_spill] sm:$0xff] }
  0xca   : > { %v1034_v22 = vadd.f32 %v1018_v19, %v980_v7  ;;  %v363_v51 = vadd.f32 %v347_v59, %v312_v30  ;;  %v449_v34 = vmul.f32 %v5032_v14, %v6511_v18  ;;  %v1170_v50 = vmul.f32 %v5384_v52, %v5496_v25  ;;  %v6604_v19 = vld [vmem:[#allocation13_spill] sm:$0xff]  ;;  %v6606_v7 = vld [vmem:[#allocation50_spill] sm:$0xff]  ;;  %v6607_v30 = vld [vmem:[#allocation27_spill] sm:$0xff] }
  0xcb   : > { %v1171_v53 = vmul.f32 %v6601_v48, %v6600_v42  ;;  %v364_v9 = vadd.f32 %v348_v29, %v313_v62  ;;  %v450_v56 = vmul.f32 %v6603_v49, %v6602_v35  ;;  %v1084_v44 = vadd.f32 %v1068_v27, %v1033_v37  ;;  %v6605_v59 = vld [vmem:[#allocation41_spill] sm:$0xff]  ;;  %v6610_v29 = vld [vmem:[#allocation12_spill] sm:$0xff]  ;;  %v6611_v37 = vld [vmem:[#allocation47_spill] sm:$0xff] }
  0xcc   : > { %v1085_v54 = vadd.f32 %v1069_v3, %v1034_v22  ;;  %v414_v46 = vadd.f32 %v398_v12, %v363_v51  ;;  %v503_v23 = vmul.f32 %v6605_v59, %v6604_v19  ;;  %v1221_v18 = vmul.f32 %v6607_v30, %v6606_v7  ;;  %v6609_v48 = vld [vmem:[#allocation45_spill] sm:$0xff]  ;;  %v5607_v27 = vld [vmem:[%s4152_s9 + $0xd8] sm:$0xff]  ;;  %v6612_v22 = vld [vmem:[#allocation42_spill] sm:$0xff] }
  0xcd   : > { %v1222_v52 = vmul.f32 %v6608_v36, %v5524_v5  ;;  %v415_v2 = vadd.f32 %v399_v38, %v364_v9  ;;  %v504_v62 = vmul.f32 %v6610_v29, %v6609_v48  ;;  %v1135_v14 = vadd.f32 %v1119_v32, %v1084_v44  ;;  %v5610_v3 = vld [vmem:[%s4152_s9 + $0xe0] sm:$0xff]  ;;  %v6613_v30 = vld [vmem:[#allocation34_spill] sm:$0xff]  ;;  %v6614_v36 = vld [vmem:[#allocation36_spill] sm:$0xff] }
  0xce   : > { %v1136_v35 = vadd.f32 %v1120_v43, %v1085_v54  ;;  %v465_v12 = vadd.f32 %v449_v34, %v414_v46  ;;  %v554_v51 = vmul.f32 %v6612_v22, %v6611_v37  ;;  %v1275_v59 = vmul.f32 %v6613_v30, %v5607_v27  ;;  %v6615_v29 = vld [vmem:[#allocation22_spill] sm:$0xff]  ;;  %v6616_v44 = vld [vmem:[#allocation44_spill] sm:$0xff]  ;;  %v6620_v30 = vld [vmem:[#allocation37_spill] sm:$0xff] }
  0xcf   : > { %v1276_v38 = vmul.f32 %v6614_v36, %v5610_v3  ;;  %v466_v9 = vadd.f32 %v450_v56, %v415_v2  ;;  %v555_v32 = vmul.f32 %v6616_v44, %v6615_v29  ;;  %v1186_v43 = vadd.f32 %v1170_v50, %v1135_v14  ;;  %v5621_v49 = vld [vmem:[%s4152_s9 + $0xd9] sm:$0xff]  ;;  %v5624_v34 = vld [vmem:[%s4152_s9 + $0xe1] sm:$0xff]  ;;  %v6621_v36 = vld [vmem:[#allocation39_spill] sm:$0xff] }
  0xd0   : > { %v1187_v54 = vadd.f32 %v1171_v53, %v1136_v35  ;;  %6617 = vst [vmem:[#allocation57_spill] sm:$0xff] %v5621_v49  ;;  %6618 = vst [vmem:[#allocation58_spill] sm:$0xff] %v5624_v34  ;;  %v519_v46 = vadd.f32 %v503_v23, %v465_v12  ;;  %v6619_v22 = vld [vmem:[#allocation14_spill] sm:$0xff]  ;;  %v1326_v45 = vmul.f32 %v6620_v30, %v5621_v49  ;;  %v6622_v14 = vld [vmem:[#allocation53_spill] sm:$0xff] }
  0xd1   : > { %v605_v16 = vmul.f32 %v6619_v22, %v5146_v47  ;;  %v1327_v2 = vmul.f32 %v6621_v36, %v5624_v34  ;;  %v520_v56 = vadd.f32 %v504_v62, %v466_v9  ;;  %v606_v50 = vmul.f32 %v6622_v14, %v5173_v13  ;;  %v5635_v44 = vld [vmem:[%s4152_s9 + $0xda] sm:$0xff]  ;;  %v5638_v23 = vld [vmem:[%s4152_s9 + $0xe2] sm:$0xff]  ;;  %v6627_v36 = vld [vmem:[#allocation43_spill] sm:$0xff] }
  0xd2   : > { %v1237_v53 = vadd.f32 %v1221_v18, %v1186_v43  ;;  %v1238_v35 = vadd.f32 %v1222_v52, %v1187_v54  ;;  %6623 = vst [vmem:[#allocation59_spill] sm:$0xff] %v5635_v44  ;;  %6624 = vst [vmem:[#allocation60_spill] sm:$0xff] %v5638_v23  ;;  %v570_v12 = vadd.f32 %v554_v51, %v519_v46  ;;  %v6625_v22 = vld [vmem:[#allocation54_spill] sm:$0xff]  ;;  %v6626_v30 = vld [vmem:[#allocation40_spill] sm:$0xff] }
  0xd3   : > { %v656_v60 = vmul.f32 %v6625_v22, %v6559_v31  ;;  %v1377_v49 = vmul.f32 %v6626_v30, %v5635_v44  ;;  %v1378_v62 = vmul.f32 %v6627_v36, %v5638_v23  ;;  %v571_v9 = vadd.f32 %v555_v32, %v520_v56  ;;  %v6628_v18 = vld [vmem:[#allocation23_spill] sm:$0xff]  ;;  %v5649_v14 = vld [vmem:[%s4152_s9 + $0xdb] sm:$0xff]  ;;  %v5652_v51 = vld [vmem:[%s4152_s9 + $0xe3] sm:$0xff] }
  0xd4   : > { %v657_v52 = vmul.f32 %v6628_v18, %v5200_v4  ;;  %v1291_v43 = vadd.f32 %v1275_v59, %v1237_v53  ;;  %v1292_v54 = vadd.f32 %v1276_v38, %v1238_v35  ;;  %6629 = vst [vmem:[#allocation61_spill] sm:$0xff] %v5649_v14  ;;  %6630 = vst [vmem:[#allocation62_spill] sm:$0xff] %v5652_v51  ;;  %v6631_v22 = vld [vmem:[#allocation24_spill] sm:$0xff]  ;;  %v6633_v36 = vld [vmem:[#allocation49_spill] sm:$0xff] }
  0xd5   : > { %v621_v46 = vadd.f32 %v605_v16, %v570_v12  ;;  %v707_v34 = vmul.f32 %v6631_v22, %v6565_v15  ;;  %v6632_v30 = vld [vmem:[#allocation48_spill] sm:$0xff]  ;;  %v1429_v23 = vmul.f32 %v6633_v36, %v5652_v51  ;;  %v622_v32 = vadd.f32 %v606_v50, %v571_v9  ;;  %v5666_v35 = vld [vmem:[%s4152_s9 + $0xe4] sm:$0xff]  ;;  %v6635_v12 = vld [vmem:[#allocation71_spill] sm:$0xff] }
  0xd6   : > { %v1428_v44 = vmul.f32 %v6632_v30, %v5649_v14  ;;  %v6634_v56 = vld [vmem:[#allocation68_spill] sm:$0xff]  ;;  %v1342_v59 = vadd.f32 %v1326_v45, %v1291_v43  ;;  %v1343_v38 = vadd.f32 %v1327_v2, %v1292_v54  ;;  %v761_v22 = vmul.f32 %v6635_v12, %v5420_v33  ;;  %v6638_v9 = vld [vmem:[#allocation73_spill] sm:$0xff] }
  0xd7   : > { %v708_v18 = vmul.f32 %v6634_v56, %v5230_v39  ;;  %v5663_v53 = vld [vmem:[%s4152_s9 + $0xdc] sm:$0xff]  ;;  %v672_v16 = vadd.f32 %v656_v60, %v621_v46  ;;  %v673_v50 = vadd.f32 %v657_v52, %v622_v32  ;;  %v762_v56 = vmul.f32 %v6638_v9, %v5423_v41  ;;  %v6640_v46 = vld [vmem:[#allocation7_spill] sm:$0xff]  ;;  %v6641_v32 = vld [vmem:[#allocation74_spill] sm:$0xff] }
  0xd8   : > { %v6636_v15 = vld [vmem:[#allocation8_spill] sm:$0xff]  ;;  %v1393_v45 = vadd.f32 %v1377_v49, %v1342_v59  ;;  %v1394_v2 = vadd.f32 %v1378_v62, %v1343_v38  ;;  %v6639_v54 = vld [vmem:[#allocation5_spill] sm:$0xff]  ;;  %v813_v12 = vmul.f32 %v6640_v46, %v5451_v40  ;;  %v864_v9 = vmul.f32 %v6641_v32, %v5475_v63 }
  0xd9   : > { %v1479_v30 = vmul.f32 %v6636_v15, %v5663_v53  ;;  %v6637_v14 = vld [vmem:[#allocation56_spill] sm:$0xff]  ;;  %v723_v43 = vadd.f32 %v707_v34, %v672_v16  ;;  %v812_v51 = vmul.f32 %v6639_v54, %v5448_v57  ;;  %v724_v60 = vadd.f32 %v708_v18, %v673_v50 }
  0xda   : > { %v1480_v36 = vmul.f32 %v6637_v14, %v5666_v35  ;;  %v1444_v33 = vadd.f32 %v1428_v44, %v1393_v45  ;;  %v1445_v39 = vadd.f32 %v1429_v23, %v1394_v2  ;;  %v863_v14 = vmul.f32 %v6590_v24, %v5472_v21  ;;  %v6642_v44 = vld [vmem:[#allocation15_spill] sm:$0xff] }
  0xdb   : > { %v777_v15 = vadd.f32 %v761_v22, %v723_v43  ;;  %v778_v52 = vadd.f32 %v762_v56, %v724_v60  ;;  %v914_v49 = vmul.f32 %v6592_v20, %v5496_v25  ;;  %v915_v34 = vmul.f32 %v6593_v58, %v6600_v42  ;;  %v6648_v2 = vld [vmem:[#allocation19_spill] sm:$0xff]  ;;  %v6649_v60 = vld [vmem:[#allocation72_spill] sm:$0xff] }
  0xdc   : > { %v1495_v62 = vadd.f32 %v1479_v30, %v1444_v33  ;;  %v1496_v18 = vadd.f32 %v1480_v36, %v1445_v39  ;;  %v965_v23 = vmul.f32 %v6642_v44, %v6606_v7  ;;  %v966_v38 = vmul.f32 %v5285_v55, %v5524_v5 }
  0xdd   : > { %v828_v59 = vadd.f32 %v812_v51, %v777_v15  ;;  %v829_v22 = vadd.f32 %v813_v12, %v778_v52  ;;  %v1019_v56 = vmul.f32 %v6595_v28, %v5607_v27  ;;  %v1020_v16 = vmul.f32 %v6596_v1, %v5610_v3 }
  0xde   : > { %v5696_v50 = vpack.c.bf16 %v1496_v18, %v1495_v62  ;;  %v247_v39 = vmul.f32 %v4966_v6, %v6604_v19  ;;  %v248_v36 = vmul.f32 %v4973_v17, %v6609_v48  ;;  %v298_v33 = vmul.f32 %v4980_v61, %v6611_v37  ;;  %v6646_v37 = vld [vmem:[#allocation18_spill] sm:$0xff] }
  0xdf   : > { %v879_v45 = vadd.f32 %v863_v14, %v828_v59  ;;  %v880_v15 = vadd.f32 %v864_v9, %v829_v22  ;;  %v299_v30 = vmul.f32 %v4987_v11, %v6615_v29  ;;  %v349_v51 = vmul.f32 %v4994_v0, %v5146_v47  ;;  %v6644_v11 = vld [vmem:[#allocation10_spill] sm:$0xff]  ;;  %v6645_v47 = vld [vmem:[#allocation57_spill] sm:$0xff]  ;;  %v6654_v59 = vld [vmem:[#allocation20_spill] sm:$0xff] }
  0xe0   : > { %6643 = vst [vmem:[#allocation63_spill] sm:$0xff] %v5696_v50  ;;  %1848 = vmatmul.mubr.bf16.gmra.mxu0 %v5696_v50  ;;  %1961 = vmatmul.mubr.bf16.gmra.mxu1 %v5696_v50  ;;  %v350_v6 = vmul.f32 %v5006_v26, %v5173_v13  ;;  %v400_v17 = vmul.f32 %v5013_v10, %v6559_v31  ;;  %v6647_v9 = vld [vmem:[#allocation58_spill] sm:$0xff]  ;;  %v6655_v22 = vld [vmem:[#allocation60_spill] sm:$0xff] }
  0xe1   : > { %v930_v14 = vadd.f32 %v914_v49, %v879_v45  ;;  %1857 = vmatprep.mubr.bf16.mxu0 %v6506_v8  ;;  %v931_v61 = vadd.f32 %v915_v34, %v880_v15  ;;  %v314_v48 = vadd.f32 %v298_v33, %v247_v39  ;;  %v315_v19 = vadd.f32 %v299_v30, %v248_v36  ;;  %v6650_v26 = vld [vmem:[#allocation38_spill] sm:$0xff]  ;;  %v6652_v34 = vld [vmem:[#allocation11_spill] sm:$0xff]  ;;  %v6656_v45 = vld [vmem:[#allocation69_spill] sm:$0xff] }
  0xe2   : > { %v401_v29 = vmul.f32 %v6644_v11, %v5200_v4  ;;  %v1070_v12 = vmul.f32 %v6646_v37, %v6645_v47  ;;  %v1071_v43 = vmul.f32 %v6648_v2, %v6647_v9  ;;  %v451_v13 = vmul.f32 %v6650_v26, %v6649_v60  ;;  %1970 = vmatprep.mubr.bf16.mxu1 %v6506_v8  ;;  %v6651_v49 = vld [vmem:[#allocation6_spill] sm:$0xff]  ;;  %v6653_v4 = vld [vmem:[#allocation59_spill] sm:$0xff]  ;;  %v6658_v15 = vld [vmem:[#allocation41_spill] sm:$0xff] }
  0xe3   : > { %v981_v0 = vadd.f32 %v965_v23, %v930_v14  ;;  %v982_v10 = vadd.f32 %v966_v38, %v931_v61  ;;  %v365_v31 = vadd.f32 %v349_v51, %v314_v48  ;;  %v366_v52 = vadd.f32 %v350_v6, %v315_v19  ;;  %v6657_v36 = vld [vmem:[#allocation31_spill] sm:$0xff]  ;;  %v6659_v38 = vld [vmem:[#allocation12_spill] sm:$0xff]  ;;  %v6660_v61 = vld [vmem:[#allocation61_spill] sm:$0xff] }
  0xe4   : > { %v452_v62 = vmul.f32 %v6652_v34, %v6651_v49  ;;  %v1121_v23 = vmul.f32 %v6654_v59, %v6653_v4  ;;  %v1122_v39 = vmul.f32 %v6656_v45, %v6655_v22  ;;  %v505_v33 = vmul.f32 %v6658_v15, %v6657_v36  ;;  %v6662_v19 = vld [vmem:[#allocation62_spill] sm:$0xff] }
  0xe5   : > { %v1035_v18 = vadd.f32 %v1019_v56, %v981_v0  ;;  %v1036_v30 = vadd.f32 %v1020_v16, %v982_v10  ;;  %v416_v14 = vadd.f32 %v400_v17, %v365_v31  ;;  %v417_v11 = vadd.f32 %v401_v29, %v366_v52  ;;  %v6661_v56 = vld [vmem:[#allocation26_spill] sm:$0xff]  ;;  %v6665_v17 = vld [vmem:[#allocation44_spill] sm:$0xff] }
  0xe6   : > { %v506_v51 = vmul.f32 %v6659_v38, %v5423_v41  ;;  %v1172_v48 = vmul.f32 %v6661_v56, %v6660_v61  ;;  %v6663_v0 = vld [vmem:[#allocation70_spill] sm:$0xff]  ;;  %v557_v29 = vmul.f32 %v6665_v17, %v5451_v40  ;;  %v6666_v41 = vld [vmem:[#allocation27_spill] sm:$0xff]  ;;  %v6667_v31 = vld [vmem:[#allocation28_spill] sm:$0xff] }
  0xe7   : > { %v1086_v6 = vadd.f32 %v1070_v12, %v1035_v18  ;;  %v1173_v60 = vmul.f32 %v6663_v0, %v6662_v19  ;;  %v6664_v26 = vld [vmem:[#allocation42_spill] sm:$0xff]  ;;  %v1087_v34 = vadd.f32 %v1071_v43, %v1036_v30  ;;  %v467_v36 = vadd.f32 %v451_v13, %v416_v14  ;;  %v5752_v43 = vld [vmem:[%s4152_s9 + $0xf8] sm:$0xff]  ;;  %v6669_v40 = vld [vmem:[#allocation53_spill] sm:$0xff] }
  0xe8   : > { %v556_v49 = vmul.f32 %v6664_v26, %v5448_v57  ;;  %v468_v16 = vadd.f32 %v452_v62, %v417_v11  ;;  %v1223_v12 = vmul.f32 %v6666_v41, %v5663_v53  ;;  %v1224_v52 = vmul.f32 %v6667_v31, %v5666_v35  ;;  %v6668_v18 = vld [vmem:[#allocation14_spill] sm:$0xff]  ;;  %v5749_v57 = vld [vmem:[%s4152_s9 + $0xf0] sm:$0xff]  ;;  %v3316_v41 = vld [vmem:[%s4152_s9 + $0xfc] sm:$0xff] }
  0xe9   : > { %v1137_v10 = vadd.f32 %v1121_v23, %v1086_v6  ;;  %v607_v15 = vmul.f32 %v6668_v18, %v5472_v21  ;;  %v1138_v38 = vadd.f32 %v1122_v39, %v1087_v34  ;;  %v521_v13 = vadd.f32 %v505_v33, %v467_v36  ;;  %v6670_v14 = vld [vmem:[#allocation34_spill] sm:$0xff]  ;;  %v6671_v6 = vld [vmem:[#allocation36_spill] sm:$0xff] }
  0xea   : > { %v522_v62 = vadd.f32 %v506_v51, %v468_v16  ;;  %v608_v23 = vmul.f32 %v6669_v40, %v5475_v63  ;;  %v1277_v11 = vmul.f32 %v6670_v14, %v5749_v57  ;;  %v1278_v26 = vmul.f32 %v6671_v6, %v5752_v43  ;;  %v6672_v21 = vld [vmem:[#allocation54_spill] sm:$0xff]  ;;  %v3261_v17 = vld [vmem:[%s4152_s9 + $0xf1] sm:$0xff]  ;;  %v5764_v18 = vld [vmem:[%s4152_s9 + $0xf9] sm:$0xff] }
  0xeb   : > { %v1188_v30 = vadd.f32 %v1172_v48, %v1137_v10  ;;  %v658_v39 = vmul.f32 %v6672_v21, %v5496_v25  ;;  %v1189_v34 = vadd.f32 %v1173_v60, %v1138_v38  ;;  %v572_v33 = vadd.f32 %v556_v49, %v521_v13  ;;  %v6673_v63 = vld [vmem:[#allocation23_spill] sm:$0xff]  ;;  %v6674_v16 = vld [vmem:[#allocation37_spill] sm:$0xff]  ;;  %v6676_v6 = vld [vmem:[#allocation24_spill] sm:$0xff] }
  0xec   : > { %v573_v51 = vadd.f32 %v557_v29, %v522_v62  ;;  %v659_v36 = vmul.f32 %v6673_v63, %v6600_v42  ;;  %v1328_v10 = vmul.f32 %v6674_v16, %v3261_v17  ;;  %v6675_v40 = vld [vmem:[#allocation39_spill] sm:$0xff]  ;;  %v709_v25 = vmul.f32 %v6676_v6, %v6606_v7  ;;  %v3280_v21 = vld [vmem:[%s4152_s9 + $0xfa] sm:$0xff] }
  0xed   : > { %v1239_v48 = vadd.f32 %v1223_v12, %v1188_v30  ;;  %v1329_v50 = vmul.f32 %v6675_v40, %v5764_v18  ;;  %v1240_v60 = vadd.f32 %v1224_v52, %v1189_v34  ;;  %v3279_v38 = vld [vmem:[%s4152_s9 + $0xf2] sm:$0xff]  ;;  %v623_v14 = vadd.f32 %v607_v15, %v572_v33  ;;  %v3298_v52 = vld [vmem:[%s4152_s9 + $0xfb] sm:$0xff] }
  0xee   : > { %v624_v49 = vadd.f32 %v608_v23, %v573_v51  ;;  %v6677_v29 = vld [vmem:[#allocation68_spill] sm:$0xff]  ;;  %v6679_v30 = vld [vmem:[#allocation43_spill] sm:$0xff]  ;;  %v6681_v15 = vld [vmem:[#allocation73_spill] sm:$0xff] }
  0xef   : > { %v710_v13 = vmul.f32 %v6677_v29, %v5524_v5  ;;  %v1293_v42 = vadd.f32 %v1277_v11, %v1239_v48  ;;  %v6678_v12 = vld [vmem:[#allocation40_spill] sm:$0xff]  ;;  %v1380_v63 = vmul.f32 %v6679_v30, %v3280_v21  ;;  %v6680_v40 = vld [vmem:[#allocation71_spill] sm:$0xff]  ;;  %v1294_v31 = vadd.f32 %v1278_v26, %v1240_v60  ;;  %v6683_v11 = vld [vmem:[#allocation49_spill] sm:$0xff] }
  0xf0   : > { %v1379_v62 = vmul.f32 %v6678_v12, %v3279_v38  ;;  %v763_v16 = vmul.f32 %v6680_v40, %v5607_v27  ;;  %v3297_v7 = vld [vmem:[%s4152_s9 + $0xf3] sm:$0xff]  ;;  %v674_v6 = vadd.f32 %v658_v39, %v623_v14  ;;  %v675_v34 = vadd.f32 %v659_v36, %v624_v49 }
  0xf1   : > { %v764_v23 = vmul.f32 %v6681_v15, %v5610_v3  ;;  %v1344_v33 = vadd.f32 %v1328_v10, %v1293_v42  ;;  %v6682_v5 = vld [vmem:[#allocation48_spill] sm:$0xff]  ;;  %v1431_v48 = vmul.f32 %v6683_v11, %v3298_v52  ;;  %v814_v29 = vmul.f32 %v6639_v54, %v6645_v47 }
  0xf2   : > { %v1430_v51 = vmul.f32 %v6682_v5, %v3297_v7  ;;  %v1345_v30 = vadd.f32 %v1329_v50, %v1294_v31  ;;  %v3315_v12 = vld [vmem:[%s4152_s9 + $0xf4] sm:$0xff]  ;;  %v725_v27 = vadd.f32 %v709_v25, %v674_v6  ;;  %v726_v26 = vadd.f32 %v710_v13, %v675_v34 }
  0xf3   : > { %v815_v14 = vmul.f32 %v6640_v46, %v6647_v9  ;;  %v1395_v39 = vadd.f32 %v1379_v62, %v1344_v33  ;;  %v6684_v36 = vld [vmem:[#allocation8_spill] sm:$0xff]  ;;  %v865_v60 = vmul.f32 %v6590_v24, %v6653_v4  ;;  %v866_v54 = vmul.f32 %v6641_v32, %v6655_v22  ;;  %v6686_v34 = vld [vmem:[#allocation27_spill] sm:$0xff] }
  0xf4   : > { %v1481_v40 = vmul.f32 %v6684_v36, %v3315_v12  ;;  %v6685_v3 = vld [vmem:[#allocation56_spill] sm:$0xff]  ;;  %v1396_v49 = vadd.f32 %v1380_v63, %v1345_v30  ;;  %v779_v42 = vadd.f32 %v763_v16, %v725_v27  ;;  %v780_v15 = vadd.f32 %v764_v23, %v726_v26  ;;  %v3246_v63 = vld [vmem:[%s4152_s9 + $0x110] sm:$0xff] }
  0xf5   : > { %v1482_v10 = vmul.f32 %v6685_v3, %v3316_v41  ;;  %v1446_v50 = vadd.f32 %v1430_v51, %v1395_v39  ;;  %v916_v47 = vmul.f32 %v6592_v20, %v6660_v61  ;;  %v917_v25 = vmul.f32 %v6593_v58, %v6662_v19  ;;  %v6687_v33 = vld [vmem:[#allocation28_spill] sm:$0xff] }
  0xf6   : > { %v1447_v31 = vadd.f32 %v1431_v48, %v1396_v49  ;;  %v830_v46 = vadd.f32 %v814_v29, %v779_v42  ;;  %v831_v9 = vadd.f32 %v815_v14, %v780_v15  ;;  %v967_v24 = vmul.f32 %v6642_v44, %v5663_v53  ;;  %v6688_v48 = vld [vmem:[#allocation34_spill] sm:$0xff]  ;;  %v3282_v29 = vld [vmem:[%s4152_s9 + $0x112] sm:$0xff]  ;;  %v6690_v14 = vld [vmem:[#allocation37_spill] sm:$0xff] }
  0xf7   : > { %v1497_v13 = vadd.f32 %v1481_v40, %v1446_v50  ;;  %v968_v32 = vmul.f32 %v5285_v55, %v5666_v35  ;;  %v1021_v22 = vmul.f32 %v6595_v28, %v5749_v57  ;;  %v1022_v58 = vmul.f32 %v6596_v1, %v5752_v43  ;;  %v6691_v40 = vld [vmem:[#allocation39_spill] sm:$0xff]  ;;  %v6692_v42 = vld [vmem:[#allocation40_spill] sm:$0xff] }
  0xf8   : > { %v1498_v4 = vadd.f32 %v1482_v10, %v1447_v31  ;;  %v881_v16 = vadd.f32 %v865_v60, %v830_v46  ;;  %v882_v62 = vadd.f32 %v866_v54, %v831_v9  ;;  %v1072_v19 = vmul.f32 %v6646_v37, %v3261_v17  ;;  %v3299_v10 = vld [vmem:[%s4152_s9 + $0x10b] sm:$0xff]  ;;  %v3318_v31 = vld [vmem:[%s4152_s9 + $0x114] sm:$0xff] }
  0xf9   : > { %v1073_v55 = vmul.f32 %v6648_v2, %v5764_v18  ;;  %v1123_v35 = vmul.f32 %v6654_v59, %v3279_v38  ;;  %v1124_v37 = vmul.f32 %v6656_v45, %v3280_v21  ;;  %v1174_v2 = vmul.f32 %v6661_v56, %v3297_v7  ;;  %v3245_v18 = vld [vmem:[%s4152_s9 + $0x108] sm:$0xff]  ;;  %v3264_v45 = vld [vmem:[%s4152_s9 + $0x111] sm:$0xff] }
  0xfa   : > { %v5809_v20 = vpack.c.bf16 %v1498_v4, %v1497_v13  ;;  %v932_v61 = vadd.f32 %v916_v47, %v881_v16  ;;  %v933_v30 = vadd.f32 %v917_v25, %v882_v62  ;;  %v1175_v17 = vmul.f32 %v6663_v0, %v3298_v52  ;;  %v3263_v38 = vld [vmem:[%s4152_s9 + $0x109] sm:$0xff]  ;;  %v6689_v7 = vld [vmem:[#allocation36_spill] sm:$0xff] }
  0xfb   : > { %v1225_v23 = vmul.f32 %v6686_v34, %v3315_v12  ;;  %v1226_v59 = vmul.f32 %v6687_v33, %v3316_v41  ;;  %v1279_v56 = vmul.f32 %v6688_v48, %v3245_v18  ;;  %v1280_v0 = vmul.f32 %v6689_v7, %v3246_v63  ;;  %v3281_v52 = vld [vmem:[%s4152_s9 + $0x10a] sm:$0xff]  ;;  %v3300_v41 = vld [vmem:[%s4152_s9 + $0x113] sm:$0xff] }
  0xfc   : > { %1858 = vmatmul.mubr.bf16.gmra.mxu0 %v5809_v20  ;;  %v983_v53 = vadd.f32 %v967_v24, %v932_v61  ;;  %v984_v44 = vadd.f32 %v968_v32, %v933_v30  ;;  %1971 = vmatmul.mubr.bf16.gmra.mxu1 %v5809_v20  ;;  %v1330_v39 = vmul.f32 %v6690_v14, %v3263_v38  ;;  %v6693_v54 = vld [vmem:[#allocation43_spill] sm:$0xff]  ;;  %v5921_v48 = vld [vmem:[%s6063_s3 + $0xc8] sm:$0xff]  }
  0xfd   : > { %1867 = vmatprep.mubr.bf16.mxu0 %v6506_v8  ;;  %1980 = vmatprep.mubr.bf16.mxu1 %v6506_v8  ;;  %v1331_v12 = vmul.f32 %v6691_v40, %v3264_v45  ;;  %v1381_v15 = vmul.f32 %v6692_v42, %v3281_v52  ;;  %v1382_v50 = vmul.f32 %v6693_v54, %v3282_v29  ;;  %v3317_v47 = vld [vmem:[%s4152_s9 + $0x10c] sm:$0xff]  ;;  %v3769_v54 = vld [vmem:[%s6063_s3 + $0x80] sm:$0xff]   ;;  %s6009_s9 = scalar_lea.sflag [#allocation3], %s202_s30 }
  0xfe   : > { %v1037_v28 = vadd.f32 %v1021_v22, %v983_v53  ;;  %v1038_v1 = vadd.f32 %v1022_v58, %v984_v44  ;;  %v1432_v25 = vmul.f32 %v6682_v5, %v3299_v10  ;;  %v1433_v13 = vmul.f32 %v6683_v11, %v3300_v41  ;;  %v5850_v5 = vld [vmem:[%s6063_s3 + $0xb8] sm:$0xff]   ;;  %v5855_v11 = vld [vmem:[%s6063_s3 + $0xf0] sm:$0xff]   ;;  %v5869_v44 = vld [vmem:[%s6063_s3 + $0xe8] sm:$0xff]  }
  0xff   : > { %v1483_v16 = vmul.f32 %v6684_v36, %v3317_v47  ;;  %v1484_v62 = vmul.f32 %v6685_v3, %v3318_v31  ;;  %v6695_v36 = vld [vmem:[#allocation30_spill] sm:$0xff]  ;;  %v5862_v3 = vld [vmem:[%s6063_s3 + $0xb0] sm:$0xff]  }
 0x100   : > { %v1088_v57 = vadd.f32 %v1072_v19, %v1037_v28  ;;  %v1089_v43 = vadd.f32 %v1073_v55, %v1038_v1  ;;  %v6694_v19 = vld [vmem:[#allocation29_spill] sm:$0xff]  ;;  %v6696_v53 = vld [vmem:[#allocation35_spill] sm:$0xff]  ;;  %v5875_v55 = vld [vmem:[%s6063_s3 + $0xa8] sm:$0xff]  }
 0x101   : > { %v5881_v28 = vld [vmem:[%s6063_s3 + $0xe0] sm:$0xff]   ;;  %v6699_v34 = vld [vmem:[#allocation63_spill] sm:$0xff]  ;;  %v3767_v40 = vld [vmem:[%s6063_s3 + $0x88] sm:$0xff]  }
 0x102   : > { %v1139_v6 = vadd.f32 %v1123_v35, %v1088_v57  ;;  %v1140_v8 = vadd.f32 %v1124_v37, %v1089_v43  ;;  %v6697_v1 = vld [vmem:[#allocation21_spill] sm:$0xff]  ;;  %v5895_v57 = vld [vmem:[%s6063_s3 + $0xd8] sm:$0xff]   ;;  %v5914_v38 = vld [vmem:[%s6063_s3 + $0x90] sm:$0xff]  }
 0x103   : > { %v5888_v35 = vld [vmem:[%s6063_s3 + $0xa0] sm:$0xff]  }
 0x104   : > { %v1190_v21 = vadd.f32 %v1174_v2, %v1139_v6  ;;  %v1191_v51 = vadd.f32 %v1175_v17, %v1140_v8  ;;  %v6698_v37 = vld [vmem:[#allocation33_spill] sm:$0xff]  ;;  %v5901_v17 = vld [vmem:[%s6063_s3 + $0x98] sm:$0xff]   ;;  %v5907_v6 = vld [vmem:[%s6063_s3 + $0xd0] sm:$0xff]  }
 0x106   : > { %v1241_v27 = vadd.f32 %v1225_v23, %v1190_v21  ;;  %v1242_v26 = vadd.f32 %v1226_v59, %v1191_v51 }
 0x108   : > { %v1295_v60 = vadd.f32 %v1279_v56, %v1241_v27  ;;  %v1296_v49 = vadd.f32 %v1280_v0, %v1242_v26 }
 0x10a   : > { %v1346_v46 = vadd.f32 %v1330_v39, %v1295_v60  ;;  %v1347_v9 = vadd.f32 %v1331_v12, %v1296_v49  ;;  %v3768_v12 = vld [vmem:[%s6063_s3 + $0xc0] sm:$0xff]  }
 0x10c   : > { %v1397_v24 = vadd.f32 %v1381_v15, %v1346_v46  ;;  %v1398_v4 = vadd.f32 %v1382_v50, %v1347_v9 }
 0x10e   : > { %v1448_v32 = vadd.f32 %v1432_v25, %v1397_v24  ;;  %v1449_v22 = vadd.f32 %v1433_v13, %v1398_v4 }
 0x110   : > { %v1499_v61 = vadd.f32 %v1483_v16, %v1448_v32  ;;  %v1500_v30 = vadd.f32 %v1484_v62, %v1449_v22 }
 0x112   : > { %v1508_v58 = vpack.c.bf16 %v1500_v30, %v1499_v61 }
 0x114   : > { %1868 = vmatmul.mubr.bf16.gmra.mxu0 %v1508_v58  ;;  %1981 = vmatmul.mubr.bf16.gmra.mxu1 %v1508_v58 }
 0x115   : > { %3575 = vmatprep.mubr.bf16.mxu0 %v6694_v19 }
 0x11c   : > { %3576 = vmatmul.mubr.bf16.vlgmr.msra.gmra.mxu0 %v6695_v36 }
 0x11d   : > { %3496 = vmatpush3.bf16.msra.mxu0 %v5850_v5  ;;  %3579 = vmatprep.mubr.bf16.mxu0 %v6696_v53 }
 0x11e   : > { %3497 = vmatprep.subr.bf16.mxu0 %v5855_v11 }
 0x11f   : > { %v1799_v43 = vpop.f32.mrf.mxu0 }
 0x120   : > { %v1912_v2 = vpop.f32.mrf.mxu1  ;;  %v2088_v56 = vmax.f32 %v1799_v43, 0.0 }
 0x121   : > { %3498 = vmatpush3.bf16.msra.mxu0 %v5862_v3  ;;  %v1801_v18 = vpop.f32.mrf.mxu0  ;;  %v2090_v29 = vmax.f32 %v1912_v2, 0.0 }
 0x122   : > { %3499 = vmatprep.subr.bf16.mxu0 %v5869_v44  ;;  %v1914_v63 = vpop.f32.mrf.mxu1  ;;  %v2089_v59 = vmax.f32 %v1801_v18, 0.0  ;;  %v2152_v10 = vmul.f32 %v2088_v56, %v2088_v56 }
 0x123   : > { %v2091_v8 = vmax.f32 %v1914_v63, 0.0  ;;  %v1803_v23 = vpop.f32.mrf.mxu0  ;;  %v2154_v49 = vmul.f32 %v2090_v29, %v2090_v29 }
 0x124   : > { %3580 = vmatmul.mubr.bf16.gmra.mxu0 %v6697_v1  ;;  %v1916_v33 = vpop.f32.mrf.mxu1  ;;  %v2092_v45 = vmax.f32 %v1803_v23, 0.0  ;;  %v2153_v26 = vmul.f32 %v2089_v59, %v2089_v59 }
 0x125   : > { %3500 = vmatpush3.bf16.msra.mxu0 %v5875_v55  ;;  %3583 = vmatprep.mubr.bf16.mxu0 %v6698_v37  ;;  %v1805_v21 = vpop.f32.mrf.mxu0  ;;  %v2155_v7 = vmul.f32 %v2091_v8, %v2091_v8  ;;  %v2094_v27 = vmax.f32 %v1916_v33, 0.0 }
 0x126   : > { %3501 = vmatprep.subr.bf16.mxu0 %v5881_v28  ;;  %v1918_v51 = vpop.f32.mrf.mxu1  ;;  %v2093_v0 = vmax.f32 %v1805_v21, 0.0  ;;  %v2156_v14 = vmul.f32 %v2092_v45, %v2092_v45 }
 0x127   : > { %v2095_v52 = vmax.f32 %v1918_v51, 0.0  ;;  %v2158_v42 = vmul.f32 %v2094_v27, %v2094_v27 }
 0x128   : > { %v2312_v15 = vpack.c.bf16 %v2156_v14, %v2152_v10 }
 0x129   : > { %3502 = vmatpush3.bf16.msra.mxu0 %v5888_v35  ;;  %v2159_v39 = vmul.f32 %v2095_v52, %v2095_v52  ;;  %v2314_v31 = vpack.c.bf16 %v2158_v42, %v2154_v49 }
 0x12a   : > { %3503 = vmatprep.subr.bf16.mxu0 %v5895_v57 }
 0x12b   : > { %v2315_v60 = vpack.c.bf16 %v2159_v39, %v2155_v7 }
 0x12c   : > { %3584 = vmatmul.mubr.bf16.gmra.mxu0 %v6699_v34 }
 0x12d   : > { %3504 = vmatpush3.bf16.msra.mxu0 %v5901_v17  ;;  %3587 = vmatprep.mubr.bf16.mxu0 %v5809_v20  ;;  %v2157_v20 = vmul.f32 %v2093_v0, %v2093_v0 }
 0x12e   : > { %3505 = vmatprep.subr.bf16.mxu0 %v5907_v6  ;;  %v1809_v50 = vpop.f32.mrf.mxu0  ;;  %v1922_v47 = vpop.f32.mrf.mxu1 }
 0x12f   : > { %v2313_v41 = vpack.c.bf16 %v2157_v20, %v2153_v26  ;;  %v2098_v46 = vmax.f32 %v1922_v47, 0.0  ;;  %v2096_v22 = vmax.f32 %v1809_v50, 0.0 }
 0x130   : > { %v1811_v9 = vpop.f32.mrf.mxu0  ;;  %v1924_v25 = vpop.f32.mrf.mxu1 }
 0x131   : > { %3506 = vmatpush3.bf16.msra.mxu0 %v5914_v38  ;;  %2632 = vmatprep.mubr.bf16.mxu1 %v2313_v41  ;;  %v2099_v13 = vmax.f32 %v1924_v25, 0.0  ;;  %v2097_v16 = vmax.f32 %v1811_v9, 0.0  ;;  %v2162_v61 = vmul.f32 %v2098_v46, %v2098_v46  ;;  %v2160_v2 = vmul.f32 %v2096_v22, %v2096_v22 }
 0x132   : > { %3507 = vmatprep.subr.bf16.mxu0 %v5921_v48  ;;  %2633 = vmatmul.mubr.bf16.vlgmr.msra.gmra.mxu1 %v2312_v15  ;;  %v1813_v24 = vpop.f32.mrf.mxu0  ;;  %v1926_v4 = vpop.f32.mrf.mxu1 }
 0x133   : > { %3599 = vmatpush3.bf16.msra.mxu1 %v5850_v5  ;;  %v2100_v62 = vmax.f32 %v1813_v24, 0.0  ;;  %v2102_v32 = vmax.f32 %v1926_v4, 0.0  ;;  %v2163_v19 = vmul.f32 %v2099_v13, %v2099_v13 }
 0x134   : > { %3588 = vmatmul.mubr.bf16.gmra.mxu0 %v1508_v58  ;;  %3592 = vmatprep.subr.bf16.mxu1 %v5855_v11  ;;  %v1815_v30 = vpop.f32.mrf.mxu0  ;;  %v1928_v58 = vpop.f32.mrf.mxu1  ;;  %v2161_v11 = vmul.f32 %v2097_v16, %v2097_v16 }
 0x135   : > { %3508 = vmatpush3.bf16.msra.mxu0 %v3767_v40  ;;  %2729 = vmatprep.mubr.bf16.mxu0 %v2315_v60  ;;  %v2166_v36 = vmul.f32 %v2102_v32, %v2102_v32  ;;  %v2101_v53 = vmax.f32 %v1815_v30, 0.0  ;;  %v2103_v5 = vmax.f32 %v1928_v58, 0.0  ;;  %v2164_v1 = vmul.f32 %v2100_v62, %v2100_v62 }
 0x136   : > { %3509 = vmatprep.subr.bf16.mxu0 %v3768_v12 }
 0x137   : > { %3600 = vmatpush3.bf16.msra.mxu1 %v5862_v3  ;;  %v2165_v37 = vmul.f32 %v2101_v53, %v2101_v53  ;;  %v2167_v43 = vmul.f32 %v2103_v5, %v2103_v5  ;;  %v2318_v18 = vpack.c.bf16 %v2166_v36, %v2162_v61  ;;  %v2316_v34 = vpack.c.bf16 %v2164_v1, %v2160_v2 }
 0x138   : > { %3593 = vmatprep.subr.bf16.mxu1 %v5869_v44 }
 0x139   : > { %3510 = vmatpush3.bf16.msra.mxu0 %v3769_v54  ;;  %v2317_v63 = vpack.c.bf16 %v2165_v37, %v2161_v11  ;;  %v2319_v8 = vpack.c.bf16 %v2167_v43, %v2163_v19 }
 0x13b   : > { %3601 = vmatpush3.bf16.msra.mxu1 %v5875_v55  ;;  %2640 = vmatprep.mubr.bf16.mxu1 %v2317_v63 }
 0x13c   : > { %2730 = vmatmul.mubr.bf16.vlgmr.msra.gmra.mxu0 %v2314_v31  ;;  %3594 = vmatprep.subr.bf16.mxu1 %v5881_v28 }
 0x13d   : > { %2737 = vmatprep.mubr.bf16.mxu0 %v2319_v8  ;;  %2641 = vmatmul.mubr.bf16.gmra.mxu1 %v2316_v34 }
 0x13f   : > { %3602 = vmatpush3.bf16.msra.mxu1 %v5888_v35 }
 0x140   : > { %3595 = vmatprep.subr.bf16.mxu1 %v5895_v57 }
 0x143   : > { %3603 = vmatpush3.bf16.msra.mxu1 %v5901_v17 }
 0x144   : > { %2738 = vmatmul.mubr.bf16.gmra.mxu0 %v2318_v18  ;;  %3596 = vmatprep.subr.bf16.mxu1 %v5907_v6 }
 0x147   : > { %3604 = vmatpush3.bf16.msra.mxu1 %v5914_v38 }
 0x148   : > { %3597 = vmatprep.subr.bf16.mxu1 %v5921_v48 }
 0x14b   : > { %3605 = vmatpush3.bf16.msra.mxu1 %v3767_v40 }
 0x14c   : > { %3598 = vmatprep.subr.bf16.mxu1 %v3768_v12 }
 0x14f   : > { %3606 = vmatpush3.bf16.msra.mxu1 %v3769_v54  ;;  %v1819_v3 = vpop.f32.mrf.mxu0  ;;  %v1932_v44 = vpop.f32.mrf.mxu1 }
 0x150   : > { %v2106_v55 = vmax.f32 %v1932_v44, 0.0  ;;  %v2104_v21 = vmax.f32 %v1819_v3, 0.0 }
 0x151   : > { %v1821_v28 = vpop.f32.mrf.mxu0  ;;  %v1934_v23 = vpop.f32.mrf.mxu1 }
 0x152   : > { %v2107_v33 = vmax.f32 %v1934_v23, 0.0  ;;  %v2105_v57 = vmax.f32 %v1821_v28, 0.0  ;;  %v2170_v6 = vmul.f32 %v2106_v55, %v2106_v55  ;;  %v2168_v14 = vmul.f32 %v2104_v21, %v2104_v21 }
 0x153   : > { %v1823_v35 = vpop.f32.mrf.mxu0  ;;  %v1936_v59 = vpop.f32.mrf.mxu1 }
 0x154   : > { %v2108_v45 = vmax.f32 %v1823_v35, 0.0  ;;  %v2110_v17 = vmax.f32 %v1936_v59, 0.0  ;;  %v2171_v56 = vmul.f32 %v2107_v33, %v2107_v33  ;;  %v2169_v29 = vmul.f32 %v2105_v57, %v2105_v57 }
 0x155   : > { %v1825_v51 = vpop.f32.mrf.mxu0  ;;  %v1938_v38 = vpop.f32.mrf.mxu1 }
 0x156   : > { %v2174_v48 = vmul.f32 %v2110_v17, %v2110_v17  ;;  %v2109_v7 = vmax.f32 %v1825_v51, 0.0  ;;  %v2111_v0 = vmax.f32 %v1938_v38, 0.0  ;;  %v2172_v52 = vmul.f32 %v2108_v45, %v2108_v45 }
 0x158   : > { %v2173_v27 = vmul.f32 %v2109_v7, %v2109_v7  ;;  %v2175_v26 = vmul.f32 %v2111_v0, %v2111_v0  ;;  %v2322_v20 = vpack.c.bf16 %v2174_v48, %v2170_v6  ;;  %v2320_v12 = vpack.c.bf16 %v2172_v52, %v2168_v14 }
 0x15a   : > { %v2321_v39 = vpack.c.bf16 %v2173_v27, %v2169_v29  ;;  %v2323_v40 = vpack.c.bf16 %v2175_v26, %v2171_v56 }
 0x15c   : > { %2648 = vmatprep.mubr.bf16.mxu1 %v2321_v39  ;;  %2745 = vmatprep.mubr.bf16.mxu0 %v2323_v40 }
 0x15d   : > { %2649 = vmatmul.mubr.bf16.gmra.mxu1 %v2320_v12  ;;  %2746 = vmatmul.mubr.bf16.gmra.mxu0 %v2322_v20 }
 0x16c   : > { %v1829_v10 = vpop.f32.mrf.mxu0 }
 0x16d   : > { %v1942_v41 = vpop.f32.mrf.mxu1  ;;  %v2112_v9 = vmax.f32 %v1829_v10, 0.0 }
 0x16e   : > { %v2114_v60 = vmax.f32 %v1942_v41, 0.0  ;;  %v1831_v49 = vpop.f32.mrf.mxu0 }
 0x16f   : > { %v1944_v42 = vpop.f32.mrf.mxu1  ;;  %v2113_v47 = vmax.f32 %v1831_v49, 0.0  ;;  %v2176_v19 = vmul.f32 %v2112_v9, %v2112_v9 }
 0x170   : > { %v2115_v15 = vmax.f32 %v1944_v42, 0.0  ;;  %v1833_v54 = vpop.f32.mrf.mxu0  ;;  %v2178_v25 = vmul.f32 %v2114_v60, %v2114_v60 }
 0x171   : > { %v1946_v50 = vpop.f32.mrf.mxu1  ;;  %v2116_v31 = vmax.f32 %v1833_v54, 0.0  ;;  %v2177_v61 = vmul.f32 %v2113_v47, %v2113_v47 }
 0x172   : > { %v2118_v46 = vmax.f32 %v1946_v50, 0.0  ;;  %v1835_v13 = vpop.f32.mrf.mxu0  ;;  %v2179_v4 = vmul.f32 %v2115_v15, %v2115_v15 }
 0x173   : > { %v1948_v24 = vpop.f32.mrf.mxu1  ;;  %v2117_v62 = vmax.f32 %v1835_v13, 0.0  ;;  %v2180_v22 = vmul.f32 %v2116_v31, %v2116_v31 }
 0x174   : > { %v2182_v16 = vmul.f32 %v2118_v46, %v2118_v46  ;;  %v2119_v32 = vmax.f32 %v1948_v24, 0.0 }
 0x175   : > { %v2181_v30 = vmul.f32 %v2117_v62, %v2117_v62  ;;  %v2324_v1 = vpack.c.bf16 %v2180_v22, %v2176_v19 }
 0x176   : > { %v2183_v58 = vmul.f32 %v2119_v32, %v2119_v32  ;;  %v2326_v36 = vpack.c.bf16 %v2182_v16, %v2178_v25 }
 0x177   : > { %v2325_v53 = vpack.c.bf16 %v2181_v30, %v2177_v61 }
 0x178   : > { %v2327_v5 = vpack.c.bf16 %v2183_v58, %v2179_v4 }
 0x179   : > { %2656 = vmatprep.mubr.bf16.mxu1 %v2325_v53 }
 0x17a   : > { %2753 = vmatprep.mubr.bf16.mxu0 %v2327_v5  ;;  %2657 = vmatmul.mubr.bf16.gmra.mxu1 %v2324_v1 }
 0x17b   : > { %2754 = vmatmul.mubr.bf16.gmra.mxu0 %v2326_v36 }
 0x187   : > { %v1839_v11 = vpop.f32.mrf.mxu0  ;;  %v1952_v37 = vpop.f32.mrf.mxu1 }
 0x188   : > { %v2122_v43 = vmax.f32 %v1952_v37, 0.0  ;;  %v2120_v28 = vmax.f32 %v1839_v11, 0.0 }
 0x189   : > { %v1841_v2 = vpop.f32.mrf.mxu0  ;;  %v1954_v18 = vpop.f32.mrf.mxu1 }
 0x18a   : > { %v2123_v63 = vmax.f32 %v1954_v18, 0.0  ;;  %v2121_v3 = vmax.f32 %v1841_v2, 0.0  ;;  %v2186_v23 = vmul.f32 %v2122_v43, %v2122_v43  ;;  %v2184_v56 = vmul.f32 %v2120_v28, %v2120_v28 }
 0x18b   : > { %v1843_v8 = vpop.f32.mrf.mxu0  ;;  %v1956_v34 = vpop.f32.mrf.mxu1 }
 0x18c   : > { %v2124_v44 = vmax.f32 %v1843_v8, 0.0  ;;  %v2126_v55 = vmax.f32 %v1956_v34, 0.0  ;;  %v2187_v59 = vmul.f32 %v2123_v63, %v2123_v63  ;;  %v2185_v6 = vmul.f32 %v2121_v3, %v2121_v3 }
 0x18d   : > { %v1845_v33 = vpop.f32.mrf.mxu0  ;;  %v1958_v35 = vpop.f32.mrf.mxu1 }
 0x18e   : > { %v2190_v57 = vmul.f32 %v2126_v55, %v2126_v55  ;;  %v2125_v45 = vmax.f32 %v1845_v33, 0.0  ;;  %v2127_v17 = vmax.f32 %v1958_v35, 0.0  ;;  %v2188_v21 = vmul.f32 %v2124_v44, %v2124_v44 }
 0x190   : > { %v2189_v51 = vmul.f32 %v2125_v45, %v2125_v45  ;;  %v2191_v38 = vmul.f32 %v2127_v17, %v2127_v17  ;;  %v2330_v48 = vpack.c.bf16 %v2190_v57, %v2186_v23  ;;  %v2328_v52 = vpack.c.bf16 %v2188_v21, %v2184_v56 }
 0x192   : > { %v2329_v7 = vpack.c.bf16 %v2189_v51, %v2185_v6  ;;  %v2331_v0 = vpack.c.bf16 %v2191_v38, %v2187_v59 }
 0x194   : > { %2664 = vmatprep.mubr.bf16.mxu1 %v2329_v7  ;;  %2761 = vmatprep.mubr.bf16.mxu0 %v2331_v0 }
 0x195   : > { %2665 = vmatmul.mubr.bf16.gmra.mxu1 %v2328_v52  ;;  %2762 = vmatmul.mubr.bf16.gmra.mxu0 %v2330_v48 }
 0x1a0   : > { %v1849_v29 = vpop.f32.mrf.mxu0  ;;  %v1962_v27 = vpop.f32.mrf.mxu1 }
 0x1a1   : > { %v2130_v26 = vmax.f32 %v1962_v27, 0.0  ;;  %v2128_v49 = vmax.f32 %v1849_v29, 0.0 }
 0x1a2   : > { %v1851_v14 = vpop.f32.mrf.mxu0  ;;  %v1964_v20 = vpop.f32.mrf.mxu1 }
 0x1a3   : > { %v2131_v39 = vmax.f32 %v1964_v20, 0.0  ;;  %v2129_v10 = vmax.f32 %v1851_v14, 0.0  ;;  %v2194_v42 = vmul.f32 %v2130_v26, %v2130_v26  ;;  %v2192_v4 = vmul.f32 %v2128_v49, %v2128_v49 }
 0x1a4   : > { %v1853_v40 = vpop.f32.mrf.mxu0  ;;  %v1966_v12 = vpop.f32.mrf.mxu1 }
 0x1a5   : > { %v2132_v41 = vmax.f32 %v1853_v40, 0.0  ;;  %v2134_v60 = vmax.f32 %v1966_v12, 0.0  ;;  %v2195_v50 = vmul.f32 %v2131_v39, %v2131_v39  ;;  %v2193_v25 = vmul.f32 %v2129_v10, %v2129_v10 }
 0x1a6   : > { %v1855_v15 = vpop.f32.mrf.mxu0  ;;  %v1968_v54 = vpop.f32.mrf.mxu1 }
 0x1a7   : > { %v2198_v47 = vmul.f32 %v2134_v60, %v2134_v60  ;;  %v2133_v31 = vmax.f32 %v1855_v15, 0.0  ;;  %v2135_v46 = vmax.f32 %v1968_v54, 0.0  ;;  %v2196_v9 = vmul.f32 %v2132_v41, %v2132_v41 }
 0x1a9   : > { %v2197_v13 = vmul.f32 %v2133_v31, %v2133_v31  ;;  %v2199_v24 = vmul.f32 %v2135_v46, %v2135_v46  ;;  %v2334_v16 = vpack.c.bf16 %v2198_v47, %v2194_v42  ;;  %v2332_v22 = vpack.c.bf16 %v2196_v9, %v2192_v4 }
 0x1ab   : > { %v2333_v62 = vpack.c.bf16 %v2197_v13, %v2193_v25  ;;  %v2335_v32 = vpack.c.bf16 %v2199_v24, %v2195_v50 }
 0x1ad   : > { %2672 = vmatprep.mubr.bf16.mxu1 %v2333_v62  ;;  %2769 = vmatprep.mubr.bf16.mxu0 %v2335_v32 }
 0x1ae   : > { %2673 = vmatmul.mubr.bf16.gmra.mxu1 %v2332_v22  ;;  %2770 = vmatmul.mubr.bf16.gmra.mxu0 %v2334_v16 }
 0x1bc   : > { %v1859_v61 = vpop.f32.mrf.mxu0  ;;  %v1972_v37 = vpop.f32.mrf.mxu1 }
 0x1bd   : > { %v2136_v53 = vmax.f32 %v1859_v61, 0.0  ;;  %v2138_v41 = vmax.f32 %v1972_v37, 0.0 }
 0x1be   : > { %v1861_v30 = vpop.f32.mrf.mxu0  ;;  %v1974_v34 = vpop.f32.mrf.mxu1 }
 0x1bf   : > { %v2137_v19 = vmax.f32 %v1861_v30, 0.0  ;;  %v2200_v18 = vmul.f32 %v2136_v53, %v2136_v53  ;;  %v2139_v33 = vmax.f32 %v1974_v34, 0.0  ;;  %v2202_v46 = vmul.f32 %v2138_v41, %v2138_v41 }
 0x1c0   : > { %v1863_v58 = vpop.f32.mrf.mxu0  ;;  %v1976_v3 = vpop.f32.mrf.mxu1 }
 0x1c1   : > { %v2140_v36 = vmax.f32 %v1863_v58, 0.0  ;;  %v2201_v43 = vmul.f32 %v2137_v19, %v2137_v19  ;;  %v2203_v51 = vmul.f32 %v2139_v33, %v2139_v33  ;;  %v2142_v49 = vmax.f32 %v1976_v3, 0.0 }
 0x1c2   : > { %v1865_v5 = vpop.f32.mrf.mxu0  ;;  %v1978_v44 = vpop.f32.mrf.mxu1 }
 0x1c3   : > { %v2141_v1 = vmax.f32 %v1865_v5, 0.0  ;;  %v2204_v11 = vmul.f32 %v2140_v36, %v2140_v36  ;;  %v2143_v35 = vmax.f32 %v1978_v44, 0.0  ;;  %v2206_v9 = vmul.f32 %v2142_v49, %v2142_v49 }
 0x1c5   : > { %v2205_v2 = vmul.f32 %v2141_v1, %v2141_v1  ;;  %v2336_v8 = vpack.c.bf16 %v2204_v11, %v2200_v18  ;;  %v2207_v56 = vmul.f32 %v2143_v35, %v2143_v35  ;;  %v2338_v16 = vpack.c.bf16 %v2206_v9, %v2202_v46 }
 0x1c7   : > { %v2337_v63 = vpack.c.bf16 %v2205_v2, %v2201_v43  ;;  %v2339_v14 = vpack.c.bf16 %v2207_v56, %v2203_v51 }
 0x1c9   : > { %2680 = vmatprep.mubr.bf16.mxu1 %v2337_v63 }
 0x1ca   : > { %2681 = vmatmul.mubr.bf16.gmra.mxu1 %v2336_v8 }
 0x1d4   : > { %v1869_v55 = vpop.f32.mrf.mxu0  ;;  %v1982_v28 = vpop.f32.mrf.mxu1 }
 0x1d5   : > { %v2144_v6 = vmax.f32 %v1869_v55, 0.0  ;;  %v2146_v62 = vmax.f32 %v1982_v28, 0.0 }
 0x1d6   : > { %v1871_v23 = vpop.f32.mrf.mxu0  ;;  %v1984_v59 = vpop.f32.mrf.mxu1 }
 0x1d7   : > { %v2145_v17 = vmax.f32 %v1871_v23, 0.0  ;;  %v2208_v26 = vmul.f32 %v2144_v6, %v2144_v6  ;;  %v2147_v40 = vmax.f32 %v1984_v59, 0.0  ;;  %v2210_v30 = vmul.f32 %v2146_v62, %v2146_v62 }
 0x1d8   : > { %v1873_v57 = vpop.f32.mrf.mxu0  ;;  %v1986_v45 = vpop.f32.mrf.mxu1 }
 0x1d9   : > { %v2148_v21 = vmax.f32 %v1873_v57, 0.0  ;;  %v2209_v29 = vmul.f32 %v2145_v17, %v2145_v17  ;;  %v2211_v54 = vmul.f32 %v2147_v40, %v2147_v40  ;;  %v2150_v32 = vmax.f32 %v1986_v45, 0.0 }
 0x1da   : > { %v1875_v38 = vpop.f32.mrf.mxu0  ;;  %v1988_v0 = vpop.f32.mrf.mxu1 }
 0x1db   : > { %v2149_v48 = vmax.f32 %v1875_v38, 0.0  ;;  %v2212_v7 = vmul.f32 %v2148_v21, %v2148_v21  ;;  %v2151_v12 = vmax.f32 %v1988_v0, 0.0  ;;  %v2214_v58 = vmul.f32 %v2150_v32, %v2150_v32 }
 0x1dc   : > { %v3577_v52 = vpop.f32.mrf.mxu0 }
 0x1dd   : > { %v2213_v27 = vmul.f32 %v2149_v48, %v2149_v48  ;;  %v2340_v60 = vpack.c.bf16 %v2212_v7, %v2208_v26  ;;  %v2215_v50 = vmul.f32 %v2151_v12, %v2151_v12  ;;  %v3363_v47 = vmul.f32 -1.442695, %v3577_v52 }
 0x1de   : > { %v2025_v20 = vpop.f32.mrf.mxu0  ;;  %v2342_v1 = vpack.c.bf16 %v2214_v58, %v2210_v30 }
 0x1df   : > { %v2341_v39 = vpack.c.bf16 %v2213_v27, %v2209_v29  ;;  %v3361_v10 = vmul.f32 -1.442695, %v2025_v20  ;;  %v2343_v24 = vpack.c.bf16 %v2215_v50, %v2211_v54 }
 0x1e0   : > { %v3578_v42 = vpop.f32.mrf.mxu0 }
 0x1e1   : > { %2688 = vmatprep.mubr.bf16.mxu1 %v2341_v39  ;;  %3770 = vpow2.f32 %v3361_v10  ;;  %v3364_v4 = vmul.f32 -1.442695, %v3578_v42 }
 0x1e2   : > { %2689 = vmatmul.mubr.bf16.gmra.mxu1 %v2340_v60  ;;  %v2028_v15 = vpop.f32.mrf.mxu0 }
 0x1e3   : > { %2777 = vmatprep.mubr.bf16.mxu1 %v2339_v14  ;;  %v3362_v31 = vmul.f32 -1.442695, %v2028_v15 }
 0x1e4   : > { %v5946_v25 = vpop.f32.mrf.mxu0 }
 0x1e5   : > { %3772 = vpow2.f32 %v3362_v31 }
 0x1e6   : > { %v2041_v13 = vpop.f32.mrf.mxu0  ;;  %3774 = vpow2.f32 %v3363_v47 }
 0x1e7   : > { %3776 = vpow2.f32 %v3364_v4  ;;  %v3365_v29 = vmul.f32 -1.442695, %v2041_v13 }
 0x1e8   : > { %v5948_v22 = vpop.f32.mrf.mxu0 }
 0x1e9   : > { %v3368_v30 = vmul.f32 -1.442695, %v5948_v22 }
 0x1ea   : > { %2778 = vmatmul.mubr.bf16.vlgmr.msra.gmra.mxu1 %v2338_v16  ;;  %v2044_v61 = vpop.f32.mrf.mxu0 }
 0x1eb   : > { %2785 = vmatprep.mubr.bf16.mxu1 %v2343_v24  ;;  %v3366_v60 = vmul.f32 -1.442695, %v2044_v61  ;;  %v3367_v61 = vmul.f32 -1.442695, %v5946_v25 }
 0x1ec   : > { %v5950_v19 = vpop.f32.mrf.mxu0 }
 0x1ee   : > { %v3771_v36 = vpop.eup %3770  ;;  %v5952_v53 = vpop.f32.mrf.mxu0 }
 0x1ef   : > { %v2264_v5 = vadd.f32 1.0, %v3771_v36 }
 0x1f0   : > { %v5954_v11 = vpop.f32.mrf.mxu0 }
 0x1f1   : > { %3778 = vrcp.f32 %v2264_v5 }
 0x1f2   : > { %v3773_v37 = vpop.eup %3772  ;;  %2786 = vmatmul.mubr.bf16.gmra.mxu1 %v2342_v1  ;;  %v5956_v43 = vpop.f32.mrf.mxu0 }
 0x1f3   : > { %v2265_v2 = vadd.f32 1.0, %v3773_v37  ;;  %v3775_v18 = vpop.eup %3774  ;;  %v3447_v3 = vpop.f32.mrf.mxu1 }
 0x1f4   : > { %v5958_v63 = vpop.f32.mrf.mxu0  ;;  %v2266_v34 = vadd.f32 1.0, %v3775_v18  ;;  %v3777_v44 = vpop.eup %3776 }
 0x1f5   : > { %3780 = vrcp.f32 %v2265_v2  ;;  %v3448_v28 = vpop.f32.mrf.mxu1  ;;  %v2267_v33 = vadd.f32 1.0, %v3777_v44 }
 0x1f6   : > { %v5960_v8 = vpop.f32.mrf.mxu0  ;;  %3782 = vrcp.f32 %v2266_v34  ;;  %v3449_v57 = vadd.f32 %v3448_v28, %v3447_v3 }
 0x1f7   : > { %v3450_v35 = vpop.f32.mrf.mxu1  ;;  %3784 = vrcp.f32 %v2267_v33 }
 0x1f8   : > { %v5962_v55 = vpop.f32.mrf.mxu0  ;;  %3786 = vpow2.f32 %v3365_v29 }
 0x1f9   : > { %v3451_v17 = vpop.f32.mrf.mxu1  ;;  %3788 = vpow2.f32 %v3366_v60 }
 0x1fa   : > { %v5964_v23 = vpop.f32.mrf.mxu0  ;;  %v3452_v56 = vadd.f32 %v3451_v17, %v3450_v35 }
 0x1fc   : > { %v3511_v59 = vpop.f32.mrf.mxu0 }
 0x1fd   : > { %v3453_v27 = vpop.f32.mrf.mxu1 }
 0x1fe   : > { %v3512_v45 = vpop.f32.mrf.mxu0  ;;  %v3779_v6 = vpop.eup %3778 }
 0x1ff   : > { %v3513_v21 = vadd.f32 %v3512_v45, %v3511_v59  ;;  %v3454_v20 = vpop.f32.mrf.mxu1 }
 0x200   : > { %v3514_v51 = vpop.f32.mrf.mxu0  ;;  %v3455_v12 = vadd.f32 %v3454_v20, %v3453_v27 }
 0x201   : > { %v2732_v38 = vadd.f32 %v3513_v21, %v3449_v57  ;;  %v3456_v49 = vpop.f32.mrf.mxu1 }
 0x202   : > { %v3515_v48 = vpop.f32.mrf.mxu0  ;;  %v3781_v52 = vpop.eup %3780 }
 0x203   : > { %v2794_v7 = vmul.f32 %v3779_v6, %v2732_v38  ;;  %v3516_v0 = vadd.f32 %v3515_v48, %v3514_v51  ;;  %v3783_v41 = vpop.eup %3782  ;;  %v3457_v54 = vpop.f32.mrf.mxu1  ;;  %v3369_v51 = vmul.f32 -1.442695, %v5952_v53 }
 0x204   : > { %v3517_v26 = vpop.f32.mrf.mxu0  ;;  %v3458_v31 = vadd.f32 %v3457_v54, %v3456_v49  ;;  %v3785_v9 = vpop.eup %3784 }
 0x205   : > { %2810 = vst [vmem:[%s5969_s6] sm:$0xff] %v2794_v7  ;;  %v2735_v14 = vadd.f32 %v3516_v0, %v3452_v56  ;;  %v3787_v4 = vpop.eup %3786  ;;  %v3370_v56 = vmul.f32 -1.442695, %v5956_v43 }
 0x206   : > { %v3518_v39 = vpop.f32.mrf.mxu0  ;;  %v2268_v16 = vadd.f32 1.0, %v3787_v4  ;;  %v3789_v62 = vpop.eup %3788 }
 0x207   : > { %v2795_v40 = vmul.f32 %v3781_v52, %v2735_v14  ;;  %v3519_v10 = vadd.f32 %v3518_v39, %v3517_v26  ;;  %v2269_v32 = vadd.f32 1.0, %v3789_v62 }
 0x208   : > { %v3520_v42 = vpop.f32.mrf.mxu0  ;;  %3790 = vrcp.f32 %v2268_v16 }
 0x209   : > { %2811 = vst [vmem:[%s5969_s6 + $0x8] sm:$0xff] %v2795_v40  ;;  %v2740_v15 = vadd.f32 %v3519_v10, %v3455_v12  ;;  %3792 = vrcp.f32 %v2269_v32 }
 0x20a   : > { %v3521_v50 = vpop.f32.mrf.mxu0  ;;  %3794 = vpow2.f32 %v3367_v61 }
 0x20b   : > { %v2796_v47 = vmul.f32 %v3783_v41, %v2740_v15  ;;  %v3522_v46 = vadd.f32 %v3521_v50, %v3520_v42  ;;  %3796 = vpow2.f32 %v3368_v30 }
 0x20d   : > { %2812 = vst [vmem:[%s5969_s6 + $0x10] sm:$0xff] %v2796_v47  ;;  %v2743_v13 = vadd.f32 %v3522_v46, %v3458_v31  ;;  %v3371_v47 = vmul.f32 -1.442695, %v5950_v19  ;;  %v3372_v31 = vmul.f32 -1.442695, %v5954_v11 }
 0x20f   : > { %v2797_v24 = vmul.f32 %v3785_v9, %v2743_v13 }
 0x211   : > { %2813 = vst [vmem:[%s5969_s6 + $0x18] sm:$0xff] %v2797_v24 }
 0x215   : > { %v3791_v18 = vpop.eup %3790 }
 0x216   : > { %v3793_v57 = vpop.eup %3792 }
 0x217   : > { %v3795_v22 = vpop.eup %3794 }
 0x218   : > { %v2270_v21 = vadd.f32 1.0, %v3795_v22  ;;  %v3797_v6 = vpop.eup %3796 }
 0x219   : > { %v2271_v38 = vadd.f32 1.0, %v3797_v6 }
 0x21a   : > { %3798 = vrcp.f32 %v2270_v21 }
 0x21b   : > { %3800 = vpow2.f32 %v3369_v51 }
 0x21c   : > { %3802 = vrcp.f32 %v2271_v38 }
 0x21d   : > { %v3459_v58 = vpop.f32.mrf.mxu1  ;;  %v3523_v36 = vpop.f32.mrf.mxu0  ;;  %3804 = vpow2.f32 %v3370_v56 }
 0x21f   : > { %v3460_v5 = vpop.f32.mrf.mxu1  ;;  %v3524_v1 = vpop.f32.mrf.mxu0 }
 0x220   : > { %v3461_v37 = vadd.f32 %v3460_v5, %v3459_v58  ;;  %v3525_v2 = vadd.f32 %v3524_v1, %v3523_v36 }
 0x221   : > { %v3462_v34 = vpop.f32.mrf.mxu1  ;;  %v3526_v3 = vpop.f32.mrf.mxu0 }
 0x222   : > { %v2748_v44 = vadd.f32 %v3525_v2, %v3461_v37 }
 0x223   : > { %v3463_v28 = vpop.f32.mrf.mxu1  ;;  %v3527_v33 = vpop.f32.mrf.mxu0 }
 0x224   : > { %v2798_v25 = vmul.f32 %v3791_v18, %v2748_v44  ;;  %v3464_v35 = vadd.f32 %v3463_v28, %v3462_v34  ;;  %v3528_v59 = vadd.f32 %v3527_v33, %v3526_v3 }
 0x226   : > { %2814 = vst [vmem:[%s5969_s6 + $0x20] sm:$0xff] %v2798_v25  ;;  %v2751_v45 = vadd.f32 %v3528_v59, %v3464_v35 }
 0x227   : > { %v3799_v26 = vpop.eup %3798 }
 0x228   : > { %v2799_v17 = vmul.f32 %v3793_v57, %v2751_v45  ;;  %v3801_v12 = vpop.eup %3800 }
 0x229   : > { %v3803_v43 = vpop.eup %3802  ;;  %v2272_v42 = vadd.f32 1.0, %v3801_v12 }
 0x22a   : > { %2815 = vst [vmem:[%s5969_s6 + $0x28] sm:$0xff] %v2799_v17  ;;  %v3805_v54 = vpop.eup %3804 }
 0x22b   : > { %3806 = vrcp.f32 %v2272_v42  ;;  %v2273_v50 = vadd.f32 1.0, %v3805_v54 }
 0x22d   : > { %3808 = vrcp.f32 %v2273_v50 }
 0x22e   : > { %3810 = vpow2.f32 %v3371_v47 }
 0x22f   : > { %3812 = vpow2.f32 %v3372_v31 }
 0x238   : > { %v3807_v62 = vpop.eup %3806 }
 0x23a   : > { %v3465_v48 = vpop.f32.mrf.mxu1  ;;  %v3809_v37 = vpop.eup %3808 }
 0x23b   : > { %v3529_v7 = vpop.f32.mrf.mxu0  ;;  %v3811_v11 = vpop.eup %3810 }
 0x23c   : > { %v3466_v0 = vpop.f32.mrf.mxu1  ;;  %v2274_v34 = vadd.f32 1.0, %v3811_v11  ;;  %v3813_v3 = vpop.eup %3812 }
 0x23d   : > { %v3530_v52 = vpop.f32.mrf.mxu0  ;;  %v3467_v29 = vadd.f32 %v3466_v0, %v3465_v48  ;;  %v2275_v44 = vadd.f32 1.0, %v3813_v3 }
 0x23e   : > { %v3531_v27 = vadd.f32 %v3530_v52, %v3529_v7  ;;  %v3468_v14 = vpop.f32.mrf.mxu1  ;;  %3814 = vrcp.f32 %v2274_v34 }
 0x23f   : > { %v3532_v20 = vpop.f32.mrf.mxu0  ;;  %3816 = vrcp.f32 %v2275_v44 }
 0x240   : > { %v2756_v39 = vadd.f32 %v3531_v27, %v3467_v29  ;;  %v3469_v53 = vpop.f32.mrf.mxu1  ;;  %v3373_v29 = vmul.f32 -1.442695, %v5960_v8  ;;  %v3374_v27 = vmul.f32 -1.442695, %v5964_v23 }
 0x241   : > { %v3533_v40 = vpop.f32.mrf.mxu0  ;;  %v3470_v41 = vadd.f32 %v3469_v53, %v3468_v14  ;;  %v3375_v14 = vmul.f32 -1.442695, %v5958_v63 }
 0x242   : > { %v2800_v10 = vmul.f32 %v3799_v26, %v2756_v39  ;;  %v3534_v60 = vadd.f32 %v3533_v40, %v3532_v20  ;;  %3818 = vpow2.f32 %v3373_v29  ;;  %v3376_v39 = vmul.f32 -1.442695, %v5962_v55 }
 0x243   : > { %3820 = vpow2.f32 %v3374_v27 }
 0x244   : > { %2816 = vst [vmem:[%s5969_s6 + $0x30] sm:$0xff] %v2800_v10  ;;  %v2759_v49 = vadd.f32 %v3534_v60, %v3470_v41  ;;  %3822 = vpow2.f32 %v3375_v14 }
 0x245   : > { %3824 = vpow2.f32 %v3376_v39 }
 0x246   : > { %v2801_v15 = vmul.f32 %v3803_v43, %v2759_v49 }
 0x248   : > { %2817 = vst [vmem:[%s5969_s6 + $0x38] sm:$0xff] %v2801_v15 }
 0x24b   : > { %v3815_v22 = vpop.eup %3814 }
 0x24c   : > { %v3817_v0 = vpop.eup %3816 }
 0x24f   : > { %v3819_v40 = vpop.eup %3818 }
 0x250   : > { %v2276_v10 = vadd.f32 1.0, %v3819_v40  ;;  %v3821_v41 = vpop.eup %3820 }
 0x251   : > { %v2277_v8 = vadd.f32 1.0, %v3821_v41  ;;  %v3823_v43 = vpop.eup %3822 }
 0x252   : > { %3826 = vrcp.f32 %v2276_v10  ;;  %v2278_v42 = vadd.f32 1.0, %v3823_v43  ;;  %v3825_v63 = vpop.eup %3824 }
 0x253   : > { %3828 = vrcp.f32 %v2277_v8  ;;  %v2279_v55 = vadd.f32 1.0, %v3825_v63 }
 0x254   : > { %3830 = vrcp.f32 %v2278_v42 }
 0x255   : > { %v3471_v46 = vpop.f32.mrf.mxu1  ;;  %v3535_v9 = vpop.f32.mrf.mxu0  ;;  %3832 = vrcp.f32 %v2279_v55 }
 0x257   : > { %v3472_v13 = vpop.f32.mrf.mxu1  ;;  %v3536_v24 = vpop.f32.mrf.mxu0 }
 0x258   : > { %v3473_v4 = vadd.f32 %v3472_v13, %v3471_v46  ;;  %v3537_v16 = vadd.f32 %v3536_v24, %v3535_v9 }
 0x259   : > { %v3474_v32 = vpop.f32.mrf.mxu1  ;;  %v3538_v61 = vpop.f32.mrf.mxu0 }
 0x25a   : > { %v2764_v30 = vadd.f32 %v3537_v16, %v3473_v4 }
 0x25b   : > { %v3475_v58 = vpop.f32.mrf.mxu1  ;;  %v3539_v36 = vpop.f32.mrf.mxu0 }
 0x25c   : > { %v2802_v19 = vmul.f32 %v3807_v62, %v2764_v30  ;;  %v3476_v5 = vadd.f32 %v3475_v58, %v3474_v32  ;;  %v3540_v1 = vadd.f32 %v3539_v36, %v3538_v61 }
 0x25e   : > { %2818 = vst [vmem:[%s5969_s6 + $0x40] sm:$0xff] %v2802_v19  ;;  %v2767_v2 = vadd.f32 %v3540_v1, %v3476_v5 }
 0x25f   : > { %v3827_v13 = vpop.eup %3826 }
 0x260   : > { %v2803_v18 = vmul.f32 %v3809_v37, %v2767_v2  ;;  %v3829_v30 = vpop.eup %3828 }
 0x261   : > { %v3831_v11 = vpop.eup %3830 }
 0x262   : > { %2819 = vst [vmem:[%s5969_s6 + $0x48] sm:$0xff] %v2803_v18 }
 0x26e   : > { %v3477_v28 = vpop.f32.mrf.mxu1  ;;  %v3541_v33 = vpop.f32.mrf.mxu0 }
 0x270   : > { %v3478_v25 = vpop.f32.mrf.mxu1  ;;  %v3542_v35 = vpop.f32.mrf.mxu0 }
 0x271   : > { %v3479_v59 = vadd.f32 %v3478_v25, %v3477_v28  ;;  %v3543_v57 = vadd.f32 %v3542_v35, %v3541_v33  ;;  %v3833_v28 = vpop.eup %3832 }
 0x272   : > { %v3480_v45 = vpop.f32.mrf.mxu1  ;;  %v3544_v17 = vpop.f32.mrf.mxu0 }
 0x273   : > { %v2772_v21 = vadd.f32 %v3543_v57, %v3479_v59 }
 0x274   : > { %v3481_v6 = vpop.f32.mrf.mxu1  ;;  %v3545_v51 = vpop.f32.mrf.mxu0 }
 0x275   : > { %v2804_v38 = vmul.f32 %v3815_v22, %v2772_v21  ;;  %v3482_v56 = vadd.f32 %v3481_v6, %v3480_v45  ;;  %v3546_v48 = vadd.f32 %v3545_v51, %v3544_v17 }
 0x277   : > { %2820 = vst [vmem:[%s5969_s6 + $0x50] sm:$0xff] %v2804_v38  ;;  %v2775_v7 = vadd.f32 %v3546_v48, %v3482_v56 }
 0x279   : > { %v2805_v52 = vmul.f32 %v3817_v0, %v2775_v7 }
 0x27b   : > { %2821 = vst [vmem:[%s5969_s6 + $0x58] sm:$0xff] %v2805_v52 }
 0x28a   : > { %v3483_v26 = vpop.f32.mrf.mxu1 }
 0x28c   : > { %v3484_v20 = vpop.f32.mrf.mxu1 }
 0x28d   : > { %v3485_v47 = vadd.f32 %v3484_v20, %v3483_v26 }
 0x28e   : > { %v3486_v53 = vpop.f32.mrf.mxu1 }
 0x290   : > { %v3487_v12 = vpop.f32.mrf.mxu1 }
 0x291   : > { %v3488_v4 = vadd.f32 %v3487_v12, %v3486_v53 }
 0x2a2   : > { %v3489_v60 = vpop.f32.mrf.mxu1 }
 0x2a4   : > { %v3490_v49 = vpop.f32.mrf.mxu1 }
 0x2a5   : > { %v3491_v36 = vadd.f32 %v3490_v49, %v3489_v60 }
 0x2a6   : > { %v3492_v23 = vpop.f32.mrf.mxu1 }
 0x2a8   : > { %v3493_v15 = vpop.f32.mrf.mxu1 }
 0x2a9   : > { %v3494_v18 = vadd.f32 %v3493_v15, %v3492_v23 }
 0x2aa   : > { %v3547_v54 = vpop.f32.mrf.mxu1 }
 0x2ac   : > { %v3548_v50 = vpop.f32.mrf.mxu1 }
 0x2ad   : > { %v3549_v31 = vadd.f32 %v3548_v50, %v3547_v54 }
 0x2ae   : > { %v3550_v46 = vpop.f32.mrf.mxu1 }
 0x2af   : > { %v2780_v9 = vadd.f32 %v3549_v31, %v3485_v47 }
 0x2b0   : > { %v3551_v24 = vpop.f32.mrf.mxu1 }
 0x2b1   : > { %v2806_v16 = vmul.f32 %v3827_v13, %v2780_v9  ;;  %v3552_v62 = vadd.f32 %v3551_v24, %v3550_v46 }
 0x2b2   : > { %v3553_v32 = vpop.f32.mrf.mxu1 }
 0x2b3   : > { %2822 = vst [vmem:[%s5969_s6 + $0x60] sm:$0xff] %v2806_v16  ;;  %v2783_v61 = vadd.f32 %v3552_v62, %v3488_v4 }
 0x2b4   : > { %v3554_v58 = vpop.f32.mrf.mxu1 }
 0x2b5   : > { %v2807_v19 = vmul.f32 %v3829_v30, %v2783_v61  ;;  %v3555_v5 = vadd.f32 %v3554_v58, %v3553_v32 }
 0x2b6   : > { %v3556_v1 = vpop.f32.mrf.mxu1 }
 0x2b7   : > { %2823 = vst [vmem:[%s5969_s6 + $0x68] sm:$0xff] %v2807_v19  ;;  %v2788_v37 = vadd.f32 %v3555_v5, %v3491_v36 }
 0x2b8   : > { %v3557_v2 = vpop.f32.mrf.mxu1 }
 0x2b9   : > { %v2808_v34 = vmul.f32 %v3831_v11, %v2788_v37  ;;  %v3558_v3 = vadd.f32 %v3557_v2, %v3556_v1 }
 0x2bb   : > { %2824 = vst [vmem:[%s5969_s6 + $0x70] sm:$0xff] %v2808_v34  ;;  %v2791_v44 = vadd.f32 %v3558_v3, %v3494_v18 }
 0x2bd   : > { %v2809_v33 = vmul.f32 %v3833_v28, %v2791_v44 }
 0x2bf   : > { %2825 = vst [vmem:[%s5969_s6 + $0x78] sm:$0xff] %v2809_v33 }
 0x2c0   : > { %3897 = shalt.err (!%p3894_p6)
}
 0x2c1   : > { %s3898_s30 = scalar_lea.hbm %s6002_s23, 2048  ;;  %s3902_s13 = scalar_lea.hbm %s6064_s4, 8192 }
 0x2c2   : > { %p3899_p7 = scmp.ne.s32.totalorder %s6002_s23, %s3898_s30  ;;  %p3903_p11 = scmp.lt.s32.totalorder %s6002_s23, %s6064_s4 }
 0x2c3   : > { %p3904_p12 = scmp.lt.s32.totalorder %s3902_s13, %s3898_s30 }
 0x2c4   : > { %p3900_p9 = pnand %p3899_p7, %p4058_p3 }
 0x2c5   : > { %p3905_p13 = por %p3904_p12, %p3903_p11 }
 0x2c6   : > { %p3901_p10 = pneg %p3900_p9 }
 0x2c8   : > { %p3906_p0 = pnand %p3905_p13, %p3901_p10 }
 0x2ca   : > { %3909 = shalt.err (!%p3906_p0)
}
 0x2cb   : > { %s3980_s11 = smov 128   ;;  %s3981_s12 = smov 8  }
 0x2cc   : > { %3608 = dma.vmem_to_hbm [thread:$0]  (%p4058_p3), %s6004_s19, 2048, %s6002_s23, %s6009_s9, %s3980_s11, %s3980_s11, %s3981_s12  }
 0x2cd PF: > { %p3614_p1 = scmp.ge.s32.totalorder %s3976_s22, 2  ;;  %s2857_s8 = sand.u32 1, %s3948_s15  }
 0x2ce   : > { %s2858_s24 = scalar_lea.sflag [#allocation3], %s2857_s8 }
 0x2cf   : > { %p3611_p2 = pnand %p3614_p1, %p4067_p8 }
 0x2d1   : > { %p3612_p4 = pneg %p3611_p2 }
 0x2d3   : > { %3943 = dma.done.wait (%p3612_p4), %s2858_s24, 2048  }
 0x2d4   : > { %3945 = vsyncadd (%p3612_p4), %s2858_s24, 4294965248  ;;  %s17_s22 = sadd.s32 1, %s3976_s22   ;;  %s6700_s15 = smov %s3952_s16 }
 0x2d5   : > { %p14_p5 = scmp.ge.s32.totalorder %s17_s22, 6   ;;  %s6701_s16 = smov %s3956_s17 }
 0x2d6   : > { %s6702_s17 = smov %s4076_s7  ;;  %s6703_s18 = smov %s3968_s20 }
 0x2d7   : > { %s6704_s19 = smov %s3972_s21  ;;  %s6705_s20 = smov %s6708_s25 }
 0x2d8   : > { %s6706_s21 = smov %s6712_s26  ;;  %16 = sbr.rel (!%p14_p5) target bundleno = 5 (0x5), region = 100 }
 0x2dd   :  { %2863 = vsyncpa [#allocation3], 1 }
 0x2de   :  { %2865 = vsyncpa [#allocation3 + $0x1], 1 }

</bundles_post_ra>
